<compile_context>
chip_gen: v7x
topology: tpu7x:2x2x1
jax: 0.10.0
libtpu: 0.0.40
codegen_flags: <defaults>
</compile_context>

<pallas_src>
import jax
import jax.numpy as jnp
from jax.experimental import pallas as pl
from jax.experimental.pallas import tpu as pltpu


def _round_up(v, m):
    return ((v + m - 1) // m) * m


def _vmem_limit_bytes():
    try:
        phys = int(pltpu.get_tpu_info().vmem_capacity_bytes)
    except Exception:
        phys = 64 << 20                      # conservative (v7x-sized) fallback
    return min(phys * 3 // 4, 96 << 20)      # headroom for Mosaic internals


def _pick_tile_rows(H, W, Cin, Npad, Cq, budget, target_m=4096):
    """Largest divisor THL of H whose FULL per-step VMEM footprint fits budget."""
    Kc = 9 * Cin
    best = 1
    for thl in range(1, H + 1):
        if H % thl:
            continue
        Mt = thl * W
        if Mt > target_m:
            continue
        band = 2 * (thl + 2) * _round_up(W + 2, 8) * _round_up(Cin, 128) * 2  # 2x buffered, lane-padded, bf16
        wght = 2 * _round_up(Kc, 8) * Npad * 2
        lhs = Mt * _round_up(Kc, 128) * 2                                     # im2col scratch
        accs = 2 * Mt * Npad * 4                                              # acc + acc^2 f32 temps
        outb = 2 * Mt * _round_up(Cq, 128) * 4
        if band + wght + lhs + accs + outb > budget:
            continue
        best = thl
    return best


def _make_kernels(THL, W, Cin, Cq):
    Mt = THL * W

    def build_lhs(xw_ref, lhs_ref):
        # im2col of the (THL+2, W+2, Cin) *un-upsampled* window into VMEM scratch:
        #   lhs[m=(i,j), k=(du,dv,ci)] = xw[i+du, j+dv, ci]
        xw = xw_ref[...]
        k = 0
        for du in range(3):
            for dv in range(3):
                lhs_ref[:, k * Cin:(k + 1) * Cin] = (
                    xw[du:du + THL, dv:dv + W, :].reshape(Mt, Cin))
                k += 1

    def stats_kernel(xw_ref, w_ref, stats_ref, lhs_ref):
        build_lhs(xw_ref, lhs_ref)
        acc = jnp.dot(lhs_ref[...], w_ref[...],
                      preferred_element_type=jnp.float32)        # (Mt, Npad) f32
        s = jnp.sum(acc, axis=0, keepdims=True)
        ss = jnp.sum(acc * acc, axis=0, keepdims=True)
        stats_ref[...] = jnp.concatenate([s, ss], axis=0)

    def apply_kernel(xw_ref, w_ref, a_ref, b_ref, o_ref, lhs_ref):
        build_lhs(xw_ref, lhs_ref)
        acc = jnp.dot(lhs_ref[...], w_ref[...],
                      preferred_element_type=jnp.float32)
        y = acc[:, :Cq] * a_ref[...] + b_ref[...]                 # fused BN scale/shift
        o_ref[...] = jnp.maximum(y, 0.0)                          # ReLU, exact-width store

    return stats_kernel, apply_kernel


@jax.jit
def upconv_block(x_nchw, weight, gamma, beta):
    """x_nchw: (N, Cin, H, W) f32; weight: (Cout, Cin, 3, 3); gamma/beta: (Cout,)."""
    N, Cin, H, W = x_nchw.shape
    Cout = weight.shape[0]
    H2, W2 = 2 * H, 2 * W
    Cq = 4 * Cout                          # (a, b, co) phase-expanded output channels
    Npad = _round_up(Cq, 128)              # lane-dense matmul N; sliced before the store
    Kc = 9 * Cin

    vmem_limit = _vmem_limit_bytes()
    THL = _pick_tile_rows(H, W, Cin, Npad, Cq, int(vmem_limit * 0.6))
    nt = H // THL
    Mt = THL * W

    # ---- host glue (cheap; only original-resolution data ever hits HBM) ----
    x = jnp.transpose(x_nchw, (0, 2, 3, 1))                             # NHWC
    xp = jnp.pad(x, ((0, 0), (1, 1), (1, 1), (0, 0)), mode="edge")      # replicate pad 1
    # halo-overlapped row bands of the ORIGINAL image (bf16, ~input-sized)
    bands = jnp.stack(
        [xp[:, t * THL:t * THL + THL + 2] for t in range(nt)], axis=1
    ).astype(jnp.bfloat16)                                              # (N, nt, THL+2, W+2, Cin)

    # Fold nearest-x2 + reflect pad into the weights:
    #   R[(du,dv,ci),(a,b,co)] = sum_{kh,kw} [du==(a+kh+1)//2][dv==(b+kw+1)//2] W[co,ci,kh,kw]
    S = jnp.array([[[1.0 if (a + kh + 1) // 2 == du else 0.0
                     for kh in range(3)] for a in range(2)] for du in range(3)],
                  dtype=jnp.float32)                                    # (du, a, kh)
    R = jnp.einsum("uak,vbl,ockl->uvcabo", S, S, weight.astype(jnp.float32))
    R = R.reshape(Kc, Cq)
    R = jnp.pad(R, ((0, 0), (0, Npad - Cq))).astype(jnp.bfloat16)       # (9*Cin, Npad)

    stats_kernel, apply_kernel = _make_kernels(THL, W, Cin, Cq)

    band_spec = pl.BlockSpec((None, None, THL + 2, W + 2, Cin),
                             lambda n, t: (n, t, 0, 0, 0))
    w_spec = pl.BlockSpec((Kc, Npad), lambda n, t: (0, 0))
    cparams = pltpu.CompilerParams(
        dimension_semantics=("parallel", "parallel"),
        vmem_limit_bytes=vmem_limit)
    lhs_scratch = pltpu.VMEM((Mt, Kc), jnp.bfloat16)
    flops = 2 * N * nt * Mt * Kc * Npad

    # ---- pass 1: single-dot conv -> per-tile channel sum / sum of squares ----
    stats = pl.pallas_call(
        stats_kernel,
        out_shape=jax.ShapeDtypeStruct((N, nt, 2, Npad), jnp.float32),
        grid=(N, nt),
        in_specs=[band_spec, w_spec],
        out_specs=pl.BlockSpec((None, None, 2, Npad), lambda n, t: (n, t, 0, 0)),
        scratch_shapes=[lhs_scratch],
        compiler_params=cparams,
        cost_estimate=pl.CostEstimate(
            flops=flops, transcendentals=0,
            bytes_accessed=bands.size * 2 + R.size * 2 + N * nt * 2 * Npad * 4),
    )(bands, R)

    # ---- tiny host reduction: train-mode BN stats (biased var, eps=1e-5) ----
    count = N * H2 * W2
    tot = jnp.sum(stats[..., :Cq].reshape(N, nt, 2, 4, Cout), axis=(0, 1, 3))  # (2, Cout)
    mean = tot[0] / count
    var = jnp.maximum(tot[1] / count - mean * mean, 0.0)
    inv = jax.lax.rsqrt(var + 1e-5)
    scale = gamma.astype(jnp.float32) * inv
    shift = beta.astype(jnp.float32) - mean * scale
    a_vec = jnp.tile(scale, 4).reshape(1, Cq)      # same per-channel factor for all 4 phases
    b_vec = jnp.tile(shift, 4).reshape(1, Cq)

    # ---- pass 2: recompute conv, fused BN scale/shift + ReLU, exact-width store ----
    out_p = pl.pallas_call(
        apply_kernel,
        out_shape=jax.ShapeDtypeStruct((N, nt, Mt, Cq), jnp.float32),
        grid=(N, nt),
        in_specs=[band_spec, w_spec,
                  pl.BlockSpec((1, Cq), lambda n, t: (0, 0)),
                  pl.BlockSpec((1, Cq), lambda n, t: (0, 0))],
        out_specs=pl.BlockSpec((None, None, Mt, Cq), lambda n, t: (n, t, 0, 0)),
        scratch_shapes=[lhs_scratch],
        compiler_params=cparams,
        cost_estimate=pl.CostEstimate(
            flops=flops, transcendentals=0,
            bytes_accessed=bands.size * 2 + R.size * 2 + N * nt * Mt * Cq * 4),
    )(bands, R, a_vec, b_vec)

    # ---- phase untangle + NCHW: fused by XLA into the one required transpose pass ----
    out = out_p.reshape(N, nt, THL, W, 2, 2, Cout)          # (n, t, i, j, a, b, c)
    out = out.transpose(0, 1, 2, 4, 3, 5, 6).reshape(N, H2, W2, Cout)
    return jnp.transpose(out, (0, 3, 1, 2))


def _reference(x_nchw, weight, gamma, beta):
    """Pure-JAX f32 reference with the same semantics (for sanity checking)."""
    x = jnp.repeat(jnp.repeat(x_nchw, 2, axis=2), 2, axis=3)
    xpad = jnp.pad(x, ((0, 0), (0, 0), (1, 1), (1, 1)), mode="reflect")
    y = jax.lax.conv_general_dilated(
        xpad, weight, window_strides=(1, 1), padding="VALID",
        dimension_numbers=("NCHW", "OIHW", "NCHW"))
    mean = jnp.mean(y, axis=(0, 2, 3), keepdims=True)
    var = jnp.mean((y - mean) ** 2, axis=(0, 2, 3), keepdims=True)
    y_hat = (y - mean) * jax.lax.rsqrt(var + 1e-5)
    y_hat = y_hat * gamma.reshape(1, -1, 1, 1) + beta.reshape(1, -1, 1, 1)
    return jnp.maximum(y_hat, 0.0)


if __name__ == "__main__":
    key = jax.random.PRNGKey(0)
    k_x, k_w, k_g, k_b = jax.random.split(key, 4)

    N, Cin, Cout, H, W = 2, 4, 8, 16, 16
    x = jax.random.normal(k_x, (N, Cin, H, W), dtype=jnp.float32)
    weight = jax.random.normal(k_w, (Cout, Cin, 3, 3), dtype=jnp.float32) * 0.1
    gamma = 1.0 + 0.1 * jax.random.normal(k_g, (Cout,), dtype=jnp.float32)
    beta = 0.1 * jax.random.normal(k_b, (Cout,), dtype=jnp.float32)

    out = jax.block_until_ready(upconv_block(x, weight, gamma, beta))
    ref = jax.block_until_ready(_reference(x, weight, gamma, beta))

    assert out.shape == (N, Cout, 2 * H, 2 * W), out.shape
    # bf16 MXU inputs (f32 accumulation) -> slightly looser tolerance than pure f32.
    err = float(jnp.max(jnp.abs(out - ref)))
    assert jnp.allclose(out, ref, atol=5e-2, rtol=5e-2), err
    print("KERNEL_OK")
</pallas_src>

<mosaic_0001>
module attributes {stable_mosaic.version = 11 : i64} {
  func.func @stats_kernel(%arg0: i32, %arg1: i32, %arg2: memref<1x1x18x18x4xbf16, #tpu.memory_space<vmem>>, %arg3: memref<36x128xbf16, #tpu.memory_space<vmem>>, %arg4: memref<1x1x2x128xf32, #tpu.memory_space<vmem>>, %arg5: memref<256x36xbf16, #tpu.memory_space<vmem>>) attributes {dimension_semantics = [#tpu.dimension_semantics<parallel>, #tpu.dimension_semantics<parallel>], iteration_bounds = array<i64: 2, 1>, scalar_prefetch = 0 : i64, scratch_operands = 1 : i64, tpu.core_type = #tpu.core_type<tc>, window_params = [{transform_indices = @transform_0, window_bounds = array<i64: 1, 1, 18, 18, 4>}, {pipeline_mode = #tpu.pipeline_mode<synchronous>, transform_indices = @transform_1, window_bounds = array<i64: 36, 128>}, {transform_indices = @transform_2, window_bounds = array<i64: 1, 1, 2, 128>}]} {
    %c0 = arith.constant 0 : index
    %c0_0 = arith.constant 0 : index
    %c0_1 = arith.constant 0 : index
    %c0_2 = arith.constant 0 : index
    %c0_3 = arith.constant 0 : index
    %0 = vector.load %arg2[%c0, %c0_0, %c0_1, %c0_2, %c0_3] : memref<1x1x18x18x4xbf16, #tpu.memory_space<vmem>>, vector<1x1x18x18x4xbf16>
    %1 = vector.shape_cast %0 : vector<1x1x18x18x4xbf16> to vector<18x18x4xbf16>
    %2 = vector.extract_strided_slice %1 {offsets = [0, 0, 0], sizes = [16, 16, 4], strides = [1, 1, 1]} : vector<18x18x4xbf16> to vector<16x16x4xbf16>
    %3 = vector.shape_cast %2 : vector<16x16x4xbf16> to vector<256x4xbf16>
    %c0_4 = arith.constant 0 : index
    %c0_5 = arith.constant 0 : index
    %4 = vector.load %arg5[%c0_4, %c0_5] : memref<256x36xbf16, #tpu.memory_space<vmem>>, vector<256x4xbf16>
    tpu.vector_store %arg5[%c0_4, %c0_5], %3 {strides = array<i32>} : memref<256x36xbf16, #tpu.memory_space<vmem>>, vector<256x4xbf16>,
    %5 = vector.extract_strided_slice %1 {offsets = [0, 1, 0], sizes = [16, 16, 4], strides = [1, 1, 1]} : vector<18x18x4xbf16> to vector<16x16x4xbf16>
    %6 = vector.shape_cast %5 : vector<16x16x4xbf16> to vector<256x4xbf16>
    %c0_6 = arith.constant 0 : index
    %c4 = arith.constant 4 : index
    %7 = vector.load %arg5[%c0_6, %c4] : memref<256x36xbf16, #tpu.memory_space<vmem>>, vector<256x4xbf16>
    tpu.vector_store %arg5[%c0_6, %c4], %6 {strides = array<i32>} : memref<256x36xbf16, #tpu.memory_space<vmem>>, vector<256x4xbf16>,
    %8 = vector.extract_strided_slice %1 {offsets = [0, 2, 0], sizes = [16, 16, 4], strides = [1, 1, 1]} : vector<18x18x4xbf16> to vector<16x16x4xbf16>
    %9 = vector.shape_cast %8 : vector<16x16x4xbf16> to vector<256x4xbf16>
    %c0_7 = arith.constant 0 : index
    %c8 = arith.constant 8 : index
    %10 = vector.load %arg5[%c0_7, %c8] : memref<256x36xbf16, #tpu.memory_space<vmem>>, vector<256x4xbf16>
    tpu.vector_store %arg5[%c0_7, %c8], %9 {strides = array<i32>} : memref<256x36xbf16, #tpu.memory_space<vmem>>, vector<256x4xbf16>,
    %11 = vector.extract_strided_slice %1 {offsets = [1, 0, 0], sizes = [16, 16, 4], strides = [1, 1, 1]} : vector<18x18x4xbf16> to vector<16x16x4xbf16>
    %12 = vector.shape_cast %11 : vector<16x16x4xbf16> to vector<256x4xbf16>
    %c0_8 = arith.constant 0 : index
    %c12 = arith.constant 12 : index
    %13 = vector.load %arg5[%c0_8, %c12] : memref<256x36xbf16, #tpu.memory_space<vmem>>, vector<256x4xbf16>
    tpu.vector_store %arg5[%c0_8, %c12], %12 {strides = array<i32>} : memref<256x36xbf16, #tpu.memory_space<vmem>>, vector<256x4xbf16>,
    %14 = vector.extract_strided_slice %1 {offsets = [1, 1, 0], sizes = [16, 16, 4], strides = [1, 1, 1]} : vector<18x18x4xbf16> to vector<16x16x4xbf16>
    %15 = vector.shape_cast %14 : vector<16x16x4xbf16> to vector<256x4xbf16>
    %c0_9 = arith.constant 0 : index
    %c16 = arith.constant 16 : index
    %16 = vector.load %arg5[%c0_9, %c16] : memref<256x36xbf16, #tpu.memory_space<vmem>>, vector<256x4xbf16>
    tpu.vector_store %arg5[%c0_9, %c16], %15 {strides = array<i32>} : memref<256x36xbf16, #tpu.memory_space<vmem>>, vector<256x4xbf16>,
    %17 = vector.extract_strided_slice %1 {offsets = [1, 2, 0], sizes = [16, 16, 4], strides = [1, 1, 1]} : vector<18x18x4xbf16> to vector<16x16x4xbf16>
    %18 = vector.shape_cast %17 : vector<16x16x4xbf16> to vector<256x4xbf16>
    %c0_10 = arith.constant 0 : index
    %c20 = arith.constant 20 : index
    %19 = vector.load %arg5[%c0_10, %c20] : memref<256x36xbf16, #tpu.memory_space<vmem>>, vector<256x4xbf16>
    tpu.vector_store %arg5[%c0_10, %c20], %18 {strides = array<i32>} : memref<256x36xbf16, #tpu.memory_space<vmem>>, vector<256x4xbf16>,
    %20 = vector.extract_strided_slice %1 {offsets = [2, 0, 0], sizes = [16, 16, 4], strides = [1, 1, 1]} : vector<18x18x4xbf16> to vector<16x16x4xbf16>
    %21 = vector.shape_cast %20 : vector<16x16x4xbf16> to vector<256x4xbf16>
    %c0_11 = arith.constant 0 : index
    %c24 = arith.constant 24 : index
    %22 = vector.load %arg5[%c0_11, %c24] : memref<256x36xbf16, #tpu.memory_space<vmem>>, vector<256x4xbf16>
    tpu.vector_store %arg5[%c0_11, %c24], %21 {strides = array<i32>} : memref<256x36xbf16, #tpu.memory_space<vmem>>, vector<256x4xbf16>,
    %23 = vector.extract_strided_slice %1 {offsets = [2, 1, 0], sizes = [16, 16, 4], strides = [1, 1, 1]} : vector<18x18x4xbf16> to vector<16x16x4xbf16>
    %24 = vector.shape_cast %23 : vector<16x16x4xbf16> to vector<256x4xbf16>
    %c0_12 = arith.constant 0 : index
    %c28 = arith.constant 28 : index
    %25 = vector.load %arg5[%c0_12, %c28] : memref<256x36xbf16, #tpu.memory_space<vmem>>, vector<256x4xbf16>
    tpu.vector_store %arg5[%c0_12, %c28], %24 {strides = array<i32>} : memref<256x36xbf16, #tpu.memory_space<vmem>>, vector<256x4xbf16>,
    %26 = vector.extract_strided_slice %1 {offsets = [2, 2, 0], sizes = [16, 16, 4], strides = [1, 1, 1]} : vector<18x18x4xbf16> to vector<16x16x4xbf16>
    %27 = vector.shape_cast %26 : vector<16x16x4xbf16> to vector<256x4xbf16>
    %c0_13 = arith.constant 0 : index
    %c32 = arith.constant 32 : index
    %28 = vector.load %arg5[%c0_13, %c32] : memref<256x36xbf16, #tpu.memory_space<vmem>>, vector<256x4xbf16>
    tpu.vector_store %arg5[%c0_13, %c32], %27 {strides = array<i32>} : memref<256x36xbf16, #tpu.memory_space<vmem>>, vector<256x4xbf16>,
    %c0_14 = arith.constant 0 : index
    %c0_15 = arith.constant 0 : index
    %29 = vector.load %arg5[%c0_14, %c0_15] : memref<256x36xbf16, #tpu.memory_space<vmem>>, vector<256x36xbf16>
    %c0_16 = arith.constant 0 : index
    %c0_17 = arith.constant 0 : index
    %30 = vector.load %arg3[%c0_16, %c0_17] : memref<36x128xbf16, #tpu.memory_space<vmem>>, vector<36x128xbf16>
    %cst = arith.constant dense<0.000000e+00> : vector<256x128xf32>
    %31 = tpu.matmul %29, %30, %cst {dimension_numbers = #tpu.dot_dimension_numbers<[1], [0], [0], [1], [0, 0, 1, 1], [], []>} : vector<256x36xbf16>, vector<36x128xbf16>, vector<256x128xf32> -> vector<256x128xf32>
    %cst_18 = arith.constant dense<0.000000e+00> : vector<128xf32>
    %32 = vector.multi_reduction <add>, %31, %cst_18 [0] : vector<256x128xf32> to vector<128xf32>
    %33 = vector.shape_cast %32 : vector<128xf32> to vector<1x128xf32>
    %34 = arith.mulf %31, %31 : vector<256x128xf32>
    %cst_19 = arith.constant dense<0.000000e+00> : vector<128xf32>
    %35 = vector.multi_reduction <add>, %34, %cst_19 [0] : vector<256x128xf32> to vector<128xf32>
    %36 = vector.shape_cast %35 : vector<128xf32> to vector<1x128xf32>
    %37 = tpu.concatenate %33, %36 in 0 : vector<1x128xf32>, vector<1x128xf32> -> vector<2x128xf32>
    %c0_20 = arith.constant 0 : index
    %c0_21 = arith.constant 0 : index
    %c0_22 = arith.constant 0 : index
    %c0_23 = arith.constant 0 : index
    %38 = vector.load %arg4[%c0_20, %c0_21, %c0_22, %c0_23] : memref<1x1x2x128xf32, #tpu.memory_space<vmem>>, vector<1x1x2x128xf32>
    %39 = vector.shape_cast %38 : vector<1x1x2x128xf32> to vector<2x128xf32>
    %40 = vector.shape_cast %37 : vector<2x128xf32> to vector<1x1x2x128xf32>
    tpu.vector_store %arg4[%c0_20, %c0_21, %c0_22, %c0_23], %40 {strides = array<i32>} : memref<1x1x2x128xf32, #tpu.memory_space<vmem>>, vector<1x1x2x128xf32>,
    return
  }
  func.func @transform_0(%arg0: i32, %arg1: i32) -> (i32, i32, i32, i32, i32) {
    %c0_i32 = arith.constant 0 : i32
    %c0_i32_0 = arith.constant 0 : i32
    %c0_i32_1 = arith.constant 0 : i32
    %c0_i32_2 = arith.constant 0 : i32
    return %arg0, %arg1, %c0_i32, %c0_i32_0, %c0_i32_1 : i32, i32, i32, i32, i32
  }
  func.func @transform_1(%arg0: i32, %arg1: i32) -> (i32, i32) {
    %c0_i32 = arith.constant 0 : i32
    %c0_i32_0 = arith.constant 0 : i32
    %c0_i32_1 = arith.constant 0 : i32
    return %c0_i32, %c0_i32_0 : i32, i32
  }
  func.func @transform_2(%arg0: i32, %arg1: i32) -> (i32, i32, i32, i32) {
    %c0_i32 = arith.constant 0 : i32
    %c0_i32_0 = arith.constant 0 : i32
    %c0_i32_1 = arith.constant 0 : i32
    return %arg0, %arg1, %c0_i32, %c0_i32_0 : i32, i32, i32, i32
  }
}

module attributes {stable_mosaic.version = 11 : i64} {
  func.func @apply_kernel(%arg0: i32, %arg1: i32, %arg2: memref<1x1x18x18x4xbf16, #tpu.memory_space<vmem>>, %arg3: memref<36x128xbf16, #tpu.memory_space<vmem>>, %arg4: memref<1x32xf32, #tpu.memory_space<vmem>>, %arg5: memref<1x32xf32, #tpu.memory_space<vmem>>, %arg6: memref<1x1x256x32xf32, #tpu.memory_space<vmem>>, %arg7: memref<256x36xbf16, #tpu.memory_space<vmem>>) attributes {dimension_semantics = [#tpu.dimension_semantics<parallel>, #tpu.dimension_semantics<parallel>], iteration_bounds = array<i64: 2, 1>, scalar_prefetch = 0 : i64, scratch_operands = 1 : i64, tpu.core_type = #tpu.core_type<tc>, window_params = [{transform_indices = @transform_0, window_bounds = array<i64: 1, 1, 18, 18, 4>}, {pipeline_mode = #tpu.pipeline_mode<synchronous>, transform_indices = @transform_1, window_bounds = array<i64: 36, 128>}, {pipeline_mode = #tpu.pipeline_mode<synchronous>, transform_indices = @transform_2, window_bounds = array<i64: 1, 32>}, {pipeline_mode = #tpu.pipeline_mode<synchronous>, transform_indices = @transform_3, window_bounds = array<i64: 1, 32>}, {transform_indices = @transform_4, window_bounds = array<i64: 1, 1, 256, 32>}]} {
    %c0 = arith.constant 0 : index
    %c0_0 = arith.constant 0 : index
    %c0_1 = arith.constant 0 : index
    %c0_2 = arith.constant 0 : index
    %c0_3 = arith.constant 0 : index
    %0 = vector.load %arg2[%c0, %c0_0, %c0_1, %c0_2, %c0_3] : memref<1x1x18x18x4xbf16, #tpu.memory_space<vmem>>, vector<1x1x18x18x4xbf16>
    %1 = vector.shape_cast %0 : vector<1x1x18x18x4xbf16> to vector<18x18x4xbf16>
    %2 = vector.extract_strided_slice %1 {offsets = [0, 0, 0], sizes = [16, 16, 4], strides = [1, 1, 1]} : vector<18x18x4xbf16> to vector<16x16x4xbf16>
    %3 = vector.shape_cast %2 : vector<16x16x4xbf16> to vector<256x4xbf16>
    %c0_4 = arith.constant 0 : index
    %c0_5 = arith.constant 0 : index
    %4 = vector.load %arg7[%c0_4, %c0_5] : memref<256x36xbf16, #tpu.memory_space<vmem>>, vector<256x4xbf16>
    tpu.vector_store %arg7[%c0_4, %c0_5], %3 {strides = array<i32>} : memref<256x36xbf16, #tpu.memory_space<vmem>>, vector<256x4xbf16>,
    %5 = vector.extract_strided_slice %1 {offsets = [0, 1, 0], sizes = [16, 16, 4], strides = [1, 1, 1]} : vector<18x18x4xbf16> to vector<16x16x4xbf16>
    %6 = vector.shape_cast %5 : vector<16x16x4xbf16> to vector<256x4xbf16>
    %c0_6 = arith.constant 0 : index
    %c4 = arith.constant 4 : index
    %7 = vector.load %arg7[%c0_6, %c4] : memref<256x36xbf16, #tpu.memory_space<vmem>>, vector<256x4xbf16>
    tpu.vector_store %arg7[%c0_6, %c4], %6 {strides = array<i32>} : memref<256x36xbf16, #tpu.memory_space<vmem>>, vector<256x4xbf16>,
    %8 = vector.extract_strided_slice %1 {offsets = [0, 2, 0], sizes = [16, 16, 4], strides = [1, 1, 1]} : vector<18x18x4xbf16> to vector<16x16x4xbf16>
    %9 = vector.shape_cast %8 : vector<16x16x4xbf16> to vector<256x4xbf16>
    %c0_7 = arith.constant 0 : index
    %c8 = arith.constant 8 : index
    %10 = vector.load %arg7[%c0_7, %c8] : memref<256x36xbf16, #tpu.memory_space<vmem>>, vector<256x4xbf16>
    tpu.vector_store %arg7[%c0_7, %c8], %9 {strides = array<i32>} : memref<256x36xbf16, #tpu.memory_space<vmem>>, vector<256x4xbf16>,
    %11 = vector.extract_strided_slice %1 {offsets = [1, 0, 0], sizes = [16, 16, 4], strides = [1, 1, 1]} : vector<18x18x4xbf16> to vector<16x16x4xbf16>
    %12 = vector.shape_cast %11 : vector<16x16x4xbf16> to vector<256x4xbf16>
    %c0_8 = arith.constant 0 : index
    %c12 = arith.constant 12 : index
    %13 = vector.load %arg7[%c0_8, %c12] : memref<256x36xbf16, #tpu.memory_space<vmem>>, vector<256x4xbf16>
    tpu.vector_store %arg7[%c0_8, %c12], %12 {strides = array<i32>} : memref<256x36xbf16, #tpu.memory_space<vmem>>, vector<256x4xbf16>,
    %14 = vector.extract_strided_slice %1 {offsets = [1, 1, 0], sizes = [16, 16, 4], strides = [1, 1, 1]} : vector<18x18x4xbf16> to vector<16x16x4xbf16>
    %15 = vector.shape_cast %14 : vector<16x16x4xbf16> to vector<256x4xbf16>
    %c0_9 = arith.constant 0 : index
    %c16 = arith.constant 16 : index
    %16 = vector.load %arg7[%c0_9, %c16] : memref<256x36xbf16, #tpu.memory_space<vmem>>, vector<256x4xbf16>
    tpu.vector_store %arg7[%c0_9, %c16], %15 {strides = array<i32>} : memref<256x36xbf16, #tpu.memory_space<vmem>>, vector<256x4xbf16>,
    %17 = vector.extract_strided_slice %1 {offsets = [1, 2, 0], sizes = [16, 16, 4], strides = [1, 1, 1]} : vector<18x18x4xbf16> to vector<16x16x4xbf16>
    %18 = vector.shape_cast %17 : vector<16x16x4xbf16> to vector<256x4xbf16>
    %c0_10 = arith.constant 0 : index
    %c20 = arith.constant 20 : index
    %19 = vector.load %arg7[%c0_10, %c20] : memref<256x36xbf16, #tpu.memory_space<vmem>>, vector<256x4xbf16>
    tpu.vector_store %arg7[%c0_10, %c20], %18 {strides = array<i32>} : memref<256x36xbf16, #tpu.memory_space<vmem>>, vector<256x4xbf16>,
    %20 = vector.extract_strided_slice %1 {offsets = [2, 0, 0], sizes = [16, 16, 4], strides = [1, 1, 1]} : vector<18x18x4xbf16> to vector<16x16x4xbf16>
    %21 = vector.shape_cast %20 : vector<16x16x4xbf16> to vector<256x4xbf16>
    %c0_11 = arith.constant 0 : index
    %c24 = arith.constant 24 : index
    %22 = vector.load %arg7[%c0_11, %c24] : memref<256x36xbf16, #tpu.memory_space<vmem>>, vector<256x4xbf16>
    tpu.vector_store %arg7[%c0_11, %c24], %21 {strides = array<i32>} : memref<256x36xbf16, #tpu.memory_space<vmem>>, vector<256x4xbf16>,
    %23 = vector.extract_strided_slice %1 {offsets = [2, 1, 0], sizes = [16, 16, 4], strides = [1, 1, 1]} : vector<18x18x4xbf16> to vector<16x16x4xbf16>
    %24 = vector.shape_cast %23 : vector<16x16x4xbf16> to vector<256x4xbf16>
    %c0_12 = arith.constant 0 : index
    %c28 = arith.constant 28 : index
    %25 = vector.load %arg7[%c0_12, %c28] : memref<256x36xbf16, #tpu.memory_space<vmem>>, vector<256x4xbf16>
    tpu.vector_store %arg7[%c0_12, %c28], %24 {strides = array<i32>} : memref<256x36xbf16, #tpu.memory_space<vmem>>, vector<256x4xbf16>,
    %26 = vector.extract_strided_slice %1 {offsets = [2, 2, 0], sizes = [16, 16, 4], strides = [1, 1, 1]} : vector<18x18x4xbf16> to vector<16x16x4xbf16>
    %27 = vector.shape_cast %26 : vector<16x16x4xbf16> to vector<256x4xbf16>
    %c0_13 = arith.constant 0 : index
    %c32 = arith.constant 32 : index
    %28 = vector.load %arg7[%c0_13, %c32] : memref<256x36xbf16, #tpu.memory_space<vmem>>, vector<256x4xbf16>
    tpu.vector_store %arg7[%c0_13, %c32], %27 {strides = array<i32>} : memref<256x36xbf16, #tpu.memory_space<vmem>>, vector<256x4xbf16>,
    %c0_14 = arith.constant 0 : index
    %c0_15 = arith.constant 0 : index
    %29 = vector.load %arg7[%c0_14, %c0_15] : memref<256x36xbf16, #tpu.memory_space<vmem>>, vector<256x36xbf16>
    %c0_16 = arith.constant 0 : index
    %c0_17 = arith.constant 0 : index
    %30 = vector.load %arg3[%c0_16, %c0_17] : memref<36x128xbf16, #tpu.memory_space<vmem>>, vector<36x128xbf16>
    %cst = arith.constant dense<0.000000e+00> : vector<256x128xf32>
    %31 = tpu.matmul %29, %30, %cst {dimension_numbers = #tpu.dot_dimension_numbers<[1], [0], [0], [1], [0, 0, 1, 1], [], []>} : vector<256x36xbf16>, vector<36x128xbf16>, vector<256x128xf32> -> vector<256x128xf32>
    %32 = vector.extract_strided_slice %31 {offsets = [0, 0], sizes = [256, 32], strides = [1, 1]} : vector<256x128xf32> to vector<256x32xf32>
    %c0_18 = arith.constant 0 : index
    %c0_19 = arith.constant 0 : index
    %33 = vector.load %arg4[%c0_18, %c0_19] : memref<1x32xf32, #tpu.memory_space<vmem>>, vector<1x32xf32>
    %34 = vector.broadcast %33 : vector<1x32xf32> to vector<256x32xf32>
    %35 = arith.mulf %32, %34 : vector<256x32xf32>
    %c0_20 = arith.constant 0 : index
    %c0_21 = arith.constant 0 : index
    %36 = vector.load %arg5[%c0_20, %c0_21] : memref<1x32xf32, #tpu.memory_space<vmem>>, vector<1x32xf32>
    %37 = vector.broadcast %36 : vector<1x32xf32> to vector<256x32xf32>
    %38 = arith.addf %35, %37 : vector<256x32xf32>
    %cst_22 = arith.constant 0.000000e+00 : f32
    %39 = vector.broadcast %cst_22 : f32 to vector<256x32xf32>
    %40 = arith.maximumf %38, %39 : vector<256x32xf32>
    %c0_23 = arith.constant 0 : index
    %c0_24 = arith.constant 0 : index
    %c0_25 = arith.constant 0 : index
    %c0_26 = arith.constant 0 : index
    %41 = vector.load %arg6[%c0_23, %c0_24, %c0_25, %c0_26] : memref<1x1x256x32xf32, #tpu.memory_space<vmem>>, vector<1x1x256x32xf32>
    %42 = vector.shape_cast %41 : vector<1x1x256x32xf32> to vector<256x32xf32>
    %43 = vector.shape_cast %40 : vector<256x32xf32> to vector<1x1x256x32xf32>
    tpu.vector_store %arg6[%c0_23, %c0_24, %c0_25, %c0_26], %43 {strides = array<i32>} : memref<1x1x256x32xf32, #tpu.memory_space<vmem>>, vector<1x1x256x32xf32>,
    return
  }
  func.func @transform_0(%arg0: i32, %arg1: i32) -> (i32, i32, i32, i32, i32) {
    %c0_i32 = arith.constant 0 : i32
    %c0_i32_0 = arith.constant 0 : i32
    %c0_i32_1 = arith.constant 0 : i32
    %c0_i32_2 = arith.constant 0 : i32
    return %arg0, %arg1, %c0_i32, %c0_i32_0, %c0_i32_1 : i32, i32, i32, i32, i32
  }
  func.func @transform_1(%arg0: i32, %arg1: i32) -> (i32, i32) {
    %c0_i32 = arith.constant 0 : i32
    %c0_i32_0 = arith.constant 0 : i32
    %c0_i32_1 = arith.constant 0 : i32
    return %c0_i32, %c0_i32_0 : i32, i32
  }
  func.func @transform_2(%arg0: i32, %arg1: i32) -> (i32, i32) {
    %c0_i32 = arith.constant 0 : i32
    %c0_i32_0 = arith.constant 0 : i32
    %c0_i32_1 = arith.constant 0 : i32
    return %c0_i32, %c0_i32_0 : i32, i32
  }
  func.func @transform_3(%arg0: i32, %arg1: i32) -> (i32, i32) {
    %c0_i32 = arith.constant 0 : i32
    %c0_i32_0 = arith.constant 0 : i32
    %c0_i32_1 = arith.constant 0 : i32
    return %c0_i32, %c0_i32_0 : i32, i32
  }
  func.func @transform_4(%arg0: i32, %arg1: i32) -> (i32, i32, i32, i32) {
    %c0_i32 = arith.constant 0 : i32
    %c0_i32_0 = arith.constant 0 : i32
    %c0_i32_1 = arith.constant 0 : i32
    return %arg0, %arg1, %c0_i32, %c0_i32_0 : i32, i32, i32, i32
  }
}

</mosaic_0001>

<bundles_post_ra>
// kernel: tile.18
= control target key start
LH: loop header
LB: loop body
LE: loop exit
PB: predicated region body
PF: predicated region fallthrough
CT: control target
= control target key end

     0   :  { %s22_s0 = inlined_call_operand.vmem [shape: f32[8], index: 0, kind: input, shape index: {}]   ;;  %s23_s1 = inlined_call_operand.vmem [shape: f32[4,8], index: 1, kind: output, shape index: {}]  }
   0x1   :  { %v4_v0 = vld [vmem:[%s22_s0] ss:$0 sm:$0xff] }
   0x2   :  { %5 = vst [vmem:[%s23_s1] sm:$0xf] %v4_v0 }

// kernel: tile.19
= control target key start
LH: loop header
LB: loop body
LE: loop exit
PB: predicated region body
PF: predicated region fallthrough
CT: control target
= control target key end

     0   :  { %vm7_vm0 = vcmask 64512   ;;  %s37_s8 = smov 8   ;;  %s38_s9 = smov 16   ;;  %vm13_vm1 = vcmask 261312   ;;  %vm19_vm2 = vcmask 195712   ;;  %vm25_vm3 = vcmask 130112   ;;  %s55_s0 = inlined_call_operand.vmem [shape: f32[4,8], index: 0, kind: input, shape index: {}]   ;;  %s56_s1 = inlined_call_operand.vmem [shape: f32[1,32], index: 1, kind: output, shape index: {}]  }
   0x1   :  { %v4_v0 = vld [vmem:[%s55_s0] sm:$0xf]  ;;  %s36_s0 = smov 24  }
   0x2   :  { %5 = vst [vmem:[#allocation1] sm:$0xf] %v4_v0 }
   0x9   :  { %v10_v1 = vld [vmem:[#allocation1 + $0x3] sm:$0x1]   ;;  %v22_v2 = vld [vmem:[#allocation1 + $0x1] sm:$0x1]   ;;  %v6_v3 = vld [vmem:[#allocation1] sm:$0x1]  }
   0xa   :  { %11 = vrot.lane.b32.xlu0 %v10_v1, %s36_s0  ;;  %23 = vrot.lane.b32.xlu1 %v22_v2, %s37_s8  ;;  %v16_v4 = vld [vmem:[#allocation1 + $0x2] sm:$0x1]   ;;  %8 = vst.msk [vmem:[#allocation0] sm:$0x1] %vm7_vm0, %v6_v3  }
   0xe   :  { %17 = vrot.lane.b32.xlu0 %v16_v4, %s38_s9 }
  0x7c   :  { %v12_v5 = vpop.permute.xlu0 %11   ;;  %v24_v6 = vpop.permute.xlu1 %23  }
  0x7d   :  { %14 = vst.msk [vmem:[#allocation0] sm:$0x1] %vm13_vm1, %v12_v5  }
  0x80   :  { %v18_v7 = vpop.permute.xlu0 %17  }
  0x81   :  { %20 = vst.msk [vmem:[#allocation0] sm:$0x1] %vm19_vm2, %v18_v7  }
  0x82   :  { %26 = vst.msk [vmem:[#allocation0] sm:$0x1] %vm25_vm3, %v24_v6  }
  0x89   :  { %v30_v8 = vld [vmem:[#allocation0] sm:$0x1] }
  0x8a   :  { %32 = vst [vmem:[%s56_s1] sm:$0x1] %v30_v8 }

// kernel: upconv_block.3
= control target key start
LH: loop header
LB: loop body
LE: loop exit
PB: predicated region body
PF: predicated region fallthrough
CT: control target
= control target key end

     0   :  { %s2385_s15 = smov 0   ;;  %s2387_s16 = smov 0   ;;  %s3585_s0 = inlined_call_operand.vmem [shape: bf16[2,1,18,18,4], index: 0, kind: input, shape index: {}]   ;;  %s3586_s1 = inlined_call_operand.vmem [shape: bf16[36,128], index: 1, kind: input, shape index: {}]   ;;  %s3587_s2 = inlined_call_operand.vmem [shape: f32[1,32], index: 2, kind: input, shape index: {}]   ;;  %s3588_s3 = inlined_call_operand.vmem [shape: f32[1,32], index: 3, kind: input, shape index: {}]   ;;  %s3589_s4 = inlined_call_operand.vmem [shape: f32[2,1,256,32], index: 4, kind: output, shape index: {}]  }
   0x1   :  { %s2389_s17 = smov 0  }
   0x2 LB: > { %s26_s18 = sadd.s32 1, %s2346_s16  ;;  %p2111_p0 = scmp.ge.s32.totalorder %s2350_s17, 1  ;;  %s2350_s17 = sphi %s2389_s17, %s14_s17   ;;  %s2346_s16 = sphi %s2387_s16, %s3625_s16   ;;  %s2342_s15 = sphi %s2385_s15, %s3624_s15  }
   0x3   : > { %p28_p1 = scmp.ge.s32.totalorder %s26_s18, 2  ;;  %p182_p2 = scmp.lt.s32.totalorder %s2350_s17, 3 }
   0x5   : > { %s3627_s18 = smov (%p28_p1, %s26_s18), 0  ;;  %p183_p3 = pnand %p2111_p0, %p182_p2 }
   0x7   : > { %186 = sbr.rel (%p183_p3) target bundleno = 635 (0x27b), region = 36 }
   0xe   : > { %p216_p4 = scmp.lt.s32.totalorder %s2342_s15, 1  ;;  %vm385_vm0 = vcmask 31744   ;;  %vm918_vm1 = vcmask 1042432   ;;  %vm919_vm2 = vcmask 1046532   ;;  %vm402_vm3 = vsmask.f32 3328 }
   0xf   : > { %vm403_vm4 = vsmask.f32 7440  ;;  %s2352_s23 = smov 12   ;;  %vm2441_vm5 = vmor %vm918_vm1, %vm919_vm2  ;;  %s2353_s24 = smov 8   ;;  %vm1707_vm7 = vcmask 1041408   ;;  %vm885_vm8 = vcmask 64544  }
  0x10   : > { %s3629_s15 = smov (!%p216_p4, %s2342_s15), 1  ;;  %vm2486_vm6 = vmor %vm402_vm3, %vm403_vm4  ;;  %s2354_s25 = smov 4   ;;  %vm1129_vm9 = vcmask 97344   ;;  %vm1199_vm10 = vcmask 130144   ;;  %vm1291_vm11 = vcmask 162944   ;;  %vm1367_vm12 = vcmask 195744  }
  0x11   : > { %s2276_s19 = smul.u32 216, %s3629_s15  ;;  %s2355_s26 = smov 16   ;;  %vm1437_vm13 = vcmask 228544   ;;  %vm1529_vm14 = vcmask 261344   ;;  %vm1605_vm15 = vcmask 294144   ;;  %vm1982_vm1 = vcmask 261120  }
  0x12   : > { %s2356_s27 = smov 20   ;;  %s2357_s28 = smov 24  }
  0x13   : > { %s2409_s22 = scalar_lea.vmem %s3585_s0, %s2276_s19  ;;  %s2358_s29 = smov 28  }
  0x14   : > { %v2412_v0 = vld [vmem:[%s2409_s22 + $0x6c] sm:$0xf]  ;;  %v2415_v1 = vld [vmem:[%s2409_s22 + $0x70] sm:$0xf]  ;;  %v2427_v12 = vld [vmem:[%s2409_s22 + $0x60] sm:$0xf] }
  0x15   : > { %v238_v2 = vld [vmem:[%s2409_s22 + $0xc] sm:$0xf]  ;;  %v2420_v3 = vcombine.low %v2412_v0, %v2415_v1  ;;  %v622_v4 = vshrl.u32 %v2412_v0, 16  ;;  %v625_v5 = vshll.u32 %v2412_v0, 16  ;;  %v635_v6 = vshrl.u32 %v2415_v1, 16  ;;  %s2359_s6 = smov 32  }
  0x16   : > { %v239_v7 = vld [vmem:[%s2409_s22 + $0x10] sm:$0xf]  ;;  %v430_v9 = vshrl.u32 %v238_v2, 16  ;;  %v433_v10 = vshll.u32 %v238_v2, 16  ;;  %v2434_v14 = vld [vmem:[%s2409_s22 + $0x64] sm:$0xf] }
  0x17   : > { %3601 = vst [vmem:[#allocation3_spill] sm:$0xff] %v2420_v3  ;;  %v2116_v8 = vcombine.low %v238_v2, %v239_v7  ;;  %v439_v11 = vshll.u32 %v239_v7, 16  ;;  %1167 = vrot.lane.b32.xlu1 %v2420_v3, %s2352_s23  ;;  %v443_v13 = vshrl.u32 %v239_v7, 16  ;;  %395 = vst.msk [vmem:[#allocation2 + $0x48] sm:$0xff] %vm385_vm0, %v2420_v3  ;;  %v2437_v15 = vld [vmem:[%s2409_s22 + $0x68] sm:$0x1] }
  0x18   : > { %v2155_v17 = vrot.slane %v2427_v12, 9  ;;  %v432_v18 = vrot.slane %v430_v9, 4  ;;  %v435_v19 = vrot.slane %v433_v10, 5  ;;  %v979_v20 = vrot.slane %v2434_v14, 5  ;;  %v2451_v22 = vld [vmem:[%s2409_s22] sm:$0xf] }
  0x19   : > { %1151 = vrot.lane.b32.xlu0 %v2116_v8, %s2352_s23  ;;  %387 = vst.msk [vmem:[#allocation2 + $0x8] sm:$0xff] %vm385_vm0, %v2116_v8  ;;  %v982_v21 = vrot.slane %v2437_v15, 5  ;;  %v445_v23 = vrot.slane %v443_v13, 4  ;;  %v2454_v24 = vld [vmem:[%s2409_s22 + $0x4] sm:$0xf]  ;;  %v2147_v26 = vrot.slane %v2451_v22, 9 }
  0x1a   : > { %v237_v25 = vld [vmem:[%s2409_s22 + $0x8] sm:$0x1]  ;;  %v980_v27 = vsel %vm2441_vm5, %v2155_v17, %v979_v20  ;;  %v981_v28 = vrot.slane %v979_v20, 4  ;;  %v923_v29 = vrot.slane %v2454_v24, 5  ;;  %v2462_v31 = vld [vmem:[%s2409_s22 + $0x74] sm:$0x1]  ;;  %v436_v48 = vor.u32 %v435_v19, %v432_v18 }
  0x1b   : > { %v926_v30 = vrot.slane %v237_v25, 5  ;;  %v2156_v32 = vrot.slane %v2412_v0, 9  ;;  %v986_v33 = vrot.slane %v2415_v1, 5  ;;  %v989_v34 = vrot.slane %v2462_v31, 5  ;;  %v240_v35 = vld [vmem:[%s2409_s22 + $0x14] sm:$0x1] }
  0x1c   : > { %v2148_v36 = vrot.slane %v238_v2, 9  ;;  %v983_v37 = vsel %vm2441_vm5, %v981_v28, %v982_v21  ;;  %v924_v38 = vsel %vm2441_vm5, %v2147_v26, %v923_v29  ;;  %v925_v39 = vrot.slane %v923_v29, 4  ;;  %s2210_s19 = sshll.u32 %s3629_s15, 8 }
  0x1d   : > { %v930_v40 = vrot.slane %v239_v7, 5  ;;  %v2472_v41 = vcombine.low %v980_v27, %v983_v37  ;;  %v987_v42 = vsel %vm2441_vm5, %v2156_v32, %v986_v33  ;;  %v988_v43 = vrot.slane %v986_v33, 4 }
  0x1e   : > { %v933_v44 = vrot.slane %v240_v35, 5  ;;  %v927_v45 = vsel %vm2441_vm5, %v925_v39, %v926_v30  ;;  %v441_v52 = vrot.slane %v439_v11, 5  ;;  %v449_v53 = vshll.u32 %v240_v35, 16 }
  0x1f   : > { %3604 = vst [vmem:[#allocation4_spill] sm:$0xff] %v2472_v41  ;;  %v931_v46 = vsel %vm2441_vm5, %v2148_v36, %v930_v40  ;;  %v932_v47 = vrot.slane %v930_v40, 4  ;;  %1097 = vrot.lane.b32.xlu1 %v2472_v41, %s2353_s24  ;;  %v2163_v49 = vcombine.low %v924_v38, %v927_v45  ;;  %v990_v50 = vsel %vm2441_vm5, %v988_v43, %v989_v34  ;;  %v2525_v34 = vld [vmem:[%s2409_s22 + $0x78] sm:$0xf]  ;;  %v2530_v38 = vld [vmem:[%s2409_s22 + $0x7c] sm:$0xf] }
  0x20   : > { %v2490_v54 = vcombine.low %v987_v42, %v990_v50  ;;  %v437_v56 = vrot.slane %v436_v48, 4  ;;  %v406_v57 = vshrl.u32 %v2451_v22, 16  ;;  %v446_v59 = vor.u32 %v445_v23, %v441_v52  ;;  %v2539_v48 = vld [vmem:[%s2409_s22 + $0x18] sm:$0xf] }
  0x21   : > { %v934_v55 = vsel %vm2441_vm5, %v932_v47, %v933_v44  ;;  %1081 = vrot.lane.b32.xlu0 %v2163_v49, %s2353_s24  ;;  %v451_v60 = vrot.slane %v449_v53, 5  ;;  %v409_v61 = vshll.u32 %v2451_v22, 16  ;;  %v415_v2 = vshll.u32 %v2454_v24, 16  ;;  %v2542_v49 = vld [vmem:[%s2409_s22 + $0x1c] sm:$0xf] }
  0x22   : > { %3607 = vst [vmem:[#allocation5_spill] sm:$0xff] %v2490_v54  ;;  %v2496_v58 = vcombine.low %v931_v46, %v934_v55  ;;  %v442_v62 = vsel %vm2486_vm6, %v437_v56, %v441_v52  ;;  %v408_v63 = vrot.slane %v406_v57, 4  ;;  %v419_v7 = vshrl.u32 %v2454_v24, 16 }
  0x23   : > { %1099 = vrot.lane.b32.xlu1 %v2490_v54, %s2353_s24  ;;  %v447_v8 = vrot.slane %v446_v59, 4  ;;  %v411_v9 = vrot.slane %v409_v61, 5  ;;  %v425_v10 = vshll.u32 %v237_v25, 16  ;;  %v624_v11 = vrot.slane %v622_v4, 4 }
  0x24   : > { %v417_v13 = vrot.slane %v415_v2, 5  ;;  %v421_v17 = vrot.slane %v419_v7, 4  ;;  %v627_v18 = vrot.slane %v625_v5, 5  ;;  %v631_v19 = vshll.u32 %v2415_v1, 16 }
  0x25   : > { %1083 = vrot.lane.b32.xlu0 %v2496_v58, %s2353_s24  ;;  %v452_v20 = vsel %vm2486_vm6, %v447_v8, %v451_v60  ;;  %v412_v21 = vor.u32 %v411_v9, %v408_v63  ;;  %v427_v23 = vrot.slane %v425_v10, 5  ;;  %v637_v25 = vrot.slane %v635_v6, 4  ;;  %v2556_v60 = vld [vmem:[%s2409_s22 + $0x80] sm:$0x1] }
  0x26   : > { %v2516_v4 = vcombine.low %v442_v62, %v452_v20  ;;  %v422_v26 = vor.u32 %v421_v17, %v417_v13  ;;  %v628_v27 = vor.u32 %v627_v18, %v624_v11  ;;  %v633_v0 = vrot.slane %v631_v19, 5  ;;  %v2577_v19 = vld [vmem:[%s2409_s22 + $0x20] sm:$0x1] }
  0x27   : > { %v413_v5 = vrot.slane %v412_v21, 4  ;;  %v641_v28 = vshll.u32 %v2462_v31, 16  ;;  %v598_v29 = vshrl.u32 %v2427_v12, 16  ;;  %v601_v30 = vshll.u32 %v2427_v12, 16 }
  0x28   : > { %839 = vrot.lane.b32.xlu1 %v2516_v4, %s2354_s25  ;;  %v423_v1 = vrot.slane %v422_v26, 4  ;;  %v629_v32 = vrot.slane %v628_v27, 4  ;;  %v638_v6 = vor.u32 %v637_v25, %v633_v0  ;;  %v607_v33 = vshll.u32 %v2434_v14, 16 }
  0x29   : > { %v418_v31 = vsel %vm2486_vm6, %v413_v5, %v417_v13  ;;  %v643_v35 = vrot.slane %v641_v28, 5  ;;  %v600_v36 = vrot.slane %v598_v29, 4  ;;  %v603_v37 = vrot.slane %v601_v30, 5 }
  0x2a   : > { %v428_v39 = vsel %vm2486_vm6, %v423_v1, %v427_v23  ;;  %v634_v40 = vsel %vm2486_vm6, %v629_v32, %v633_v0  ;;  %v639_v42 = vrot.slane %v638_v6, 4  ;;  %v609_v43 = vrot.slane %v607_v33, 5 }
  0x2b   : > { %v2131_v44 = vcombine.low %v418_v31, %v428_v39  ;;  %v604_v45 = vor.u32 %v603_v37, %v600_v36  ;;  %v611_v46 = vshrl.u32 %v2434_v14, 16  ;;  %v617_v47 = vshll.u32 %v2437_v15, 16  ;;  %v2589_v36 = vld [vmem:[%s2409_s22 + $0x84] sm:$0xf]  ;;  %v2592_v37 = vld [vmem:[%s2409_s22 + $0x88] sm:$0xf] }
  0x2c   : > { %v644_v50 = vsel %vm2486_vm6, %v639_v42, %v643_v35  ;;  %v2548_v52 = vcombine.low %v2525_v34, %v2530_v38  ;;  %v646_v53 = vshrl.u32 %v2525_v34, 16  ;;  %v649_v55 = vshll.u32 %v2525_v34, 16 }
  0x2d   : > { %837 = vrot.lane.b32.xlu0 %v2131_v44, %s2354_s25  ;;  %v2553_v56 = vcombine.low %v634_v40, %v644_v50  ;;  %v605_v15 = vrot.slane %v604_v45, 4  ;;  %v613_v57 = vrot.slane %v611_v46, 4  ;;  %v619_v59 = vrot.slane %v617_v47, 5 }
  0x2e   : > { %v659_v61 = vshrl.u32 %v2530_v38, 16  ;;  %396 = vst.msk [vmem:[#allocation2 + $0x50] sm:$0xff] %vm385_vm0, %v2548_v52  ;;  %v2563_v62 = vcombine.low %v2539_v48, %v2542_v49  ;;  %v454_v63 = vshrl.u32 %v2539_v48, 16  ;;  %v457_v2 = vshll.u32 %v2539_v48, 16 }
  0x2f   : > { %3608 = vst [vmem:[#allocation6_spill] sm:$0xff] %v2553_v56  ;;  %855 = vrot.lane.b32.xlu1 %v2553_v56, %s2354_s25  ;;  %v610_v7 = vsel %vm2486_vm6, %v605_v15, %v609_v43  ;;  %v614_v8 = vor.u32 %v613_v57, %v609_v43  ;;  %v467_v9 = vshrl.u32 %v2542_v49, 16  ;;  %v648_v10 = vrot.slane %v646_v53, 4  ;;  %v2609_v53 = vld [vmem:[%s2409_s22 + $0x24] sm:$0xf] }
  0x30   : > { %388 = vst.msk [vmem:[#allocation2 + $0x10] sm:$0xff] %vm385_vm0, %v2563_v62  ;;  %v651_v11 = vrot.slane %v649_v55, 5  ;;  %v655_v13 = vshll.u32 %v2530_v38, 16  ;;  %v661_v17 = vrot.slane %v659_v61, 4  ;;  %v665_v18 = vshll.u32 %v2556_v60, 16 }
  0x31   : > { %v615_v20 = vrot.slane %v614_v8, 4  ;;  %v456_v21 = vrot.slane %v454_v63, 4  ;;  %v459_v23 = vrot.slane %v457_v2, 5  ;;  %v463_v25 = vshll.u32 %v2542_v49, 16  ;;  %v2612_v55 = vld [vmem:[%s2409_s22 + $0x28] sm:$0xf] }
  0x32   : > { %v652_v26 = vor.u32 %v651_v11, %v648_v10  ;;  %v657_v27 = vrot.slane %v655_v13, 5  ;;  %v469_v0 = vrot.slane %v467_v9, 4  ;;  %v473_v30 = vshll.u32 %v2577_v19, 16 }
  0x33   : > { %v620_v5 = vsel %vm2486_vm6, %v615_v20, %v619_v59  ;;  %1169 = vrot.lane.b32.xlu1 %v2548_v52, %s2352_s23  ;;  %v460_v28 = vor.u32 %v459_v23, %v456_v21  ;;  %v465_v29 = vrot.slane %v463_v25, 5  ;;  %v667_v33 = vrot.slane %v665_v18, 5 }
  0x34   : > { %v2585_v1 = vcombine.low %v610_v7, %v620_v5  ;;  %v653_v32 = vrot.slane %v652_v26, 4  ;;  %v662_v6 = vor.u32 %v661_v17, %v657_v27  ;;  %v993_v35 = vrot.slane %v2530_v38, 5  ;;  %v2660_v26 = vld [vmem:[%s2409_s22 + $0x90] sm:$0xf] }
  0x35   : > { %v470_v31 = vor.u32 %v469_v0, %v465_v29  ;;  %v461_v42 = vrot.slane %v460_v28, 4  ;;  %v475_v38 = vrot.slane %v473_v30, 5  ;;  %v2157_v44 = vrot.slane %v2525_v34, 9 }
  0x36   : > { %3609 = vst [vmem:[#allocation7_spill] sm:$0xff] %v2585_v1  ;;  %853 = vrot.lane.b32.xlu0 %v2585_v1, %s2354_s25  ;;  %v658_v39 = vsel %vm2486_vm6, %v653_v32, %v657_v27  ;;  %v663_v40 = vrot.slane %v662_v6, 4  ;;  %v995_v46 = vrot.slane %v993_v35, 4  ;;  %v996_v47 = vrot.slane %v2556_v60, 5  ;;  %v2663_v27 = vld [vmem:[%s2409_s22 + $0x94] sm:$0xf] }
  0x37   : > { %1259 = vrot.lane.b32.xlu1 %v2553_v56, %s2355_s26  ;;  %v471_v43 = vrot.slane %v470_v31, 4  ;;  %v2606_v50 = vcombine.low %v2589_v36, %v2592_v37  ;;  %v466_v34 = vsel %vm2486_vm6, %v461_v42, %v465_v29  ;;  %v994_v59 = vsel %vm2441_vm5, %v2157_v44, %v993_v35  ;;  %v2681_v31 = vld [vmem:[%s2409_s22 + $0x34] sm:$0xf] }
  0x38   : > { %v668_v45 = vsel %vm2486_vm6, %v663_v40, %v667_v33  ;;  %v937_v60 = vrot.slane %v2542_v49, 5  ;;  %v2631_v61 = vcombine.low %v2609_v53, %v2612_v55  ;;  %v997_v63 = vsel %vm2441_vm5, %v995_v46, %v996_v47  ;;  %v2678_v33 = vld [vmem:[%s2409_s22 + $0x30] sm:$0xf] }
  0x39   : > { %v2614_v15 = vcombine.low %v658_v39, %v668_v45  ;;  %397 = vst.msk [vmem:[#allocation2 + $0x58] sm:$0xff] %vm385_vm0, %v2606_v50  ;;  %v476_v57 = vsel %vm2486_vm6, %v471_v43, %v475_v38  ;;  %v670_v2 = vshrl.u32 %v2589_v36, 16  ;;  %v673_v7 = vshll.u32 %v2589_v36, 16  ;;  %v2690_v39 = vld [vmem:[%s2409_s22 + $0x2c] sm:$0x1] }
  0x3a   : > { %1153 = vrot.lane.b32.xlu0 %v2563_v62, %s2352_s23  ;;  %v683_v8 = vshrl.u32 %v2592_v37, 16  ;;  %389 = vst.msk [vmem:[#allocation2 + $0x18] sm:$0xff] %vm385_vm0, %v2631_v61  ;;  %v679_v9 = vshll.u32 %v2592_v37, 16  ;;  %v2643_v49 = vcombine.low %v466_v34, %v476_v57  ;;  %v2149_v10 = vrot.slane %v2539_v48, 9 }
  0x3b   : > { %1261 = vrot.lane.b32.xlu1 %v2614_v15, %s2355_s26  ;;  %v2648_v11 = vcombine.low %v994_v59, %v997_v63  ;;  %v939_v13 = vrot.slane %v937_v60, 4  ;;  %v940_v17 = vrot.slane %v2577_v19, 5  ;;  %v672_v18 = vrot.slane %v670_v2, 4  ;;  %v2715_v2 = vld [vmem:[%s2409_s22 + $0x9c] sm:$0xf] }
  0x3c   : > { %v675_v20 = vrot.slane %v673_v7, 5  ;;  %v681_v21 = vrot.slane %v679_v9, 5  ;;  %v685_v23 = vrot.slane %v683_v8, 4  ;;  %v938_v48 = vsel %vm2441_vm5, %v2149_v10, %v937_v60 }
  0x3d   : > { %v478_v25 = vshrl.u32 %v2609_v53, 16  ;;  %v941_v19 = vsel %vm2441_vm5, %v939_v13, %v940_v17  ;;  %v481_v0 = vshll.u32 %v2609_v53, 16  ;;  %v491_v5 = vshrl.u32 %v2612_v55, 16  ;;  %v2723_v13 = vld [vmem:[%s2409_s22 + $0xa0] sm:$0xf] }
  0x3e   : > { %1243 = vrot.lane.b32.xlu0 %v2516_v4, %s2355_s26  ;;  %v2652_v4 = vld [vmem:[%s2409_s22 + $0x8c] sm:$0x1]  ;;  %v487_v28 = vshll.u32 %v2612_v55, 16  ;;  %v676_v29 = vor.u32 %v675_v20, %v672_v18  ;;  %v686_v30 = vor.u32 %v685_v23, %v681_v21  ;;  %v2675_v6 = vcombine.low %v2660_v26, %v2663_v27 }
  0x3f   : > { %1335 = vrot.lane.b32.xlu1 %v2490_v54, %s2356_s27  ;;  %v689_v32 = vshll.u32 %v2652_v4, 16  ;;  %v2685_v35 = vcombine.low %v938_v48, %v941_v19  ;;  %v480_v40 = vrot.slane %v478_v25, 4  ;;  %v483_v42 = vrot.slane %v481_v0, 5  ;;  %v2734_v48 = vld [vmem:[%s2409_s22 + $0x3c] sm:$0xf] }
  0x40   : > { %v2692_v43 = vrot.slane %v487_v28, 5  ;;  %v493_v38 = vrot.slane %v491_v5, 4  ;;  %398 = vst.msk [vmem:[#allocation2 + $0x60] sm:$0xff] %vm385_vm0, %v2675_v6  ;;  %v677_v44 = vrot.slane %v676_v29, 4  ;;  %v687_v45 = vrot.slane %v686_v30, 4 }
  0x41   : > { %v2698_v46 = vcombine.low %v2678_v33, %v2681_v31  ;;  %v484_v47 = vor.u32 %v483_v42, %v480_v40  ;;  %v694_v60 = vshrl.u32 %v2660_v26, 16  ;;  %v697_v63 = vshll.u32 %v2660_v26, 16  ;;  %v2742_v28 = vld [vmem:[%s2409_s22 + $0x40] sm:$0xf] }
  0x42   : > { %1245 = vrot.lane.b32.xlu0 %v2643_v49, %s2355_s26  ;;  %v494_v34 = vor.u32 %v493_v38, %v2692_v43  ;;  %v682_v57 = vsel %vm2486_vm6, %v677_v44, %v681_v21  ;;  %v1000_v8 = vrot.slane %v2592_v37, 5  ;;  %v707_v9 = vshrl.u32 %v2663_v27, 16  ;;  %v2758_v38 = vld [vmem:[%s2409_s22 + $0x98] sm:$0x1] }
  0x43   : > { %1337 = vrot.lane.b32.xlu1 %v2648_v11, %s2356_s27  ;;  %390 = vst.msk [vmem:[#allocation2 + $0x20] sm:$0xff] %vm385_vm0, %v2698_v46  ;;  %v703_v10 = vshll.u32 %v2663_v27, 16  ;;  %v485_v18 = vrot.slane %v484_v47, 4  ;;  %v2158_v21 = vrot.slane %v2589_v36, 9  ;;  %v502_v37 = vshrl.u32 %v2678_v33, 16 }
  0x44   : > { %v495_v20 = vrot.slane %v494_v34, 4  ;;  %v505_v23 = vshll.u32 %v2678_v33, 16  ;;  %v1003_v25 = vrot.slane %v2652_v4, 5  ;;  %v696_v19 = vrot.slane %v694_v60, 4  ;;  %v2766_v44 = vld [vmem:[%s2409_s22 + $0x38] sm:$0x1] }
  0x45   : > { %v699_v0 = vrot.slane %v697_v63, 5  ;;  %v2739_v5 = vcombine.low %v2715_v2, %v2723_v13  ;;  %v1002_v36 = vrot.slane %v1000_v8, 4  ;;  %v2747_v29 = vrot.slane %v703_v10, 5  ;;  %v2324_v10 = vld [vmem:[%s3586_s1 + $0x8] sm:$0xff]  }
  0x46   : > { %1319 = vrot.lane.b32.xlu0 %v2496_v58, %s2356_s27  ;;  %v691_v58 = vrot.slane %v689_v32, 5  ;;  %v709_v30 = vrot.slane %v707_v9, 4  ;;  %v490_v4 = vsel %vm2486_vm6, %v485_v18, %v2692_v43  ;;  %v947_v42 = vrot.slane %v2690_v39, 5 }
  0x47   : > { %1405 = vrot.lane.b32.xlu1 %v2548_v52, %s2357_s28  ;;  %v497_v52 = vshll.u32 %v2690_v39, 16  ;;  %399 = vst.msk [vmem:[#allocation2 + $0x68] sm:$0xff] %vm385_vm0, %v2739_v5  ;;  %v2770_v43 = vcombine.low %v2734_v48, %v2742_v28  ;;  %v1001_v39 = vsel %vm2441_vm5, %v2158_v21, %v1000_v8  ;;  %v700_v47 = vor.u32 %v699_v0, %v696_v19 }
  0x48   : > { %v692_v59 = vsel %vm2486_vm6, %v687_v45, %v691_v58  ;;  %v504_v45 = vrot.slane %v502_v37, 4  ;;  %v507_v58 = vrot.slane %v505_v23, 5  ;;  %v511_v34 = vshll.u32 %v2681_v31, 16 }
  0x49   : > { %v499_v7 = vrot.slane %v497_v52, 5  ;;  %v2727_v17 = vcombine.low %v682_v57, %v692_v59  ;;  %v515_v52 = vshrl.u32 %v2681_v31, 16  ;;  %v1004_v59 = vsel %vm2441_vm5, %v1002_v36, %v1003_v25  ;;  %391 = vst.msk [vmem:[#allocation2 + $0x28] sm:$0xff] %vm385_vm0, %v2770_v43 }
  0x4a   : > { %1321 = vrot.lane.b32.xlu0 %v2685_v35, %s2356_s27  ;;  %v710_v60 = vor.u32 %v709_v30, %v2747_v29  ;;  %v713_v63 = vshll.u32 %v2758_v38, 16  ;;  %v521_v9 = vshll.u32 %v2766_v44, 16  ;;  %v508_v18 = vor.u32 %v507_v58, %v504_v45  ;;  %v2811_v30 = vld [vmem:[%s2409_s22 + $0xa4] sm:$0x1] }
  0x4b   : > { %1407 = vrot.lane.b32.xlu1 %v2606_v50, %s2357_s28  ;;  %v500_v32 = vsel %vm2486_vm6, %v495_v20, %v499_v7  ;;  %v2796_v20 = vcombine.low %v1001_v39, %v1004_v59  ;;  %v701_v21 = vrot.slane %v700_v47, 4  ;;  %v2798_v37 = vrot.slane %v511_v34, 5 }
  0x4c   : > { %v2778_v57 = vcombine.low %v490_v4, %v500_v32  ;;  %v517_v23 = vrot.slane %v515_v52, 4  ;;  %v711_v25 = vrot.slane %v710_v60, 4  ;;  %v715_v19 = vrot.slane %v713_v63, 5  ;;  %v2847_v60 = vld [vmem:[%s2409_s22 + $0xa8] sm:$0xf] }
  0x4d   : > { %v2159_v0 = vrot.slane %v2660_v26, 9  ;;  %v2807_v36 = vrot.slane %v521_v9, 5  ;;  %v2115_v4 = vcombine.low %v2451_v22, %v2454_v24  ;;  %v2160_v32 = vrot.slane %v2715_v2, 9  ;;  %v2826_v22 = vld [vmem:[%s2409_s22 + $0x44] sm:$0x1] }
  0x4e   : > { %1389 = vrot.lane.b32.xlu0 %v2563_v62, %s2357_s28  ;;  %v944_v62 = vrot.slane %v2612_v55, 5  ;;  %v2150_v55 = vrot.slane %v2609_v53, 9  ;;  %v2323_v53 = vld [vmem:[%s3586_s1] sm:$0xff]   ;;  %v1010_v26 = vrot.slane %v2758_v38, 5  ;;  %v2152_v24 = vrot.slane %v2734_v48, 9 }
  0x4f   : > { %1497 = vrot.lane.b32.xlu1 %v2614_v15, %s2358_s29  ;;  %2230 = vmatprep.subr.bf16.mxu0 %v2323_v53  ;;  %386 = vst.msk [vmem:[#allocation2] sm:$0xff] %vm385_vm0, %v2115_v4  ;;  %v958_v38 = vrot.slane %v2742_v28, 5  ;;  %v716_v45 = vsel %vm2486_vm6, %v711_v25, %v715_v19  ;;  %v961_v39 = vrot.slane %v2826_v22, 5  ;;  %v278_v63 = vld [vmem:[%s2409_s22 + $0xac] sm:$0xf]  ;;  %v745_v4 = vshll.u32 %v2847_v60, 16 }
  0x50   : > { %v946_v40 = vrot.slane %v944_v62, 4  ;;  %2268 = vmatprep.subr.bf16.mxu1 %v2323_v53  ;;  %2231 = vmatpush3.bf16.msra.mxu0 %v2323_v53  ;;  %v945_v7 = vsel %vm2441_vm5, %v2150_v55, %v944_v62  ;;  %v1007_v55 = vrot.slane %v2663_v27, 5  ;;  %v706_v27 = vsel %vm2486_vm6, %v701_v21, %v2747_v29  ;;  %v2865_v21 = vld [vmem:[%s2409_s22 + $0x4c] sm:$0xf] }
  0x51   : > { %2271 = vmatpush3.bf16.msra.mxu1 %v2323_v53  ;;  %2232 = vmatprep.subr.bf16.mxu0 %v2324_v10  ;;  %v518_v53 = vor.u32 %v517_v23, %v2798_v37  ;;  %v959_v34 = vsel %vm2441_vm5, %v2152_v24, %v958_v38  ;;  %v960_v59 = vrot.slane %v958_v38, 4  ;;  %v2867_v23 = vcombine.low %v706_v27, %v716_v45 }
  0x52   : > { %1391 = vrot.lane.b32.xlu0 %v2631_v61, %s2357_s28  ;;  %v948_v8 = vsel %vm2441_vm5, %v946_v40, %v947_v42  ;;  %2269 = vmatprep.subr.bf16.mxu1 %v2324_v10  ;;  %v2816_v40 = vrot.slane %v508_v18, 4  ;;  %v1014_v42 = vrot.slane %v2723_v13, 5  ;;  %v2842_v52 = vsel %vm2441_vm5, %v2159_v0, %v1007_v55  ;;  %v2862_v18 = vld [vmem:[%s2409_s22 + $0x48] sm:$0xf] }
  0x53   : > { %1499 = vrot.lane.b32.xlu1 %v2727_v17, %s2358_s29  ;;  %v2802_v62 = vcombine.low %v945_v7, %v948_v8  ;;  %v1009_v47 = vrot.slane %v1007_v55, 4  ;;  %v2869_v25 = vrot.slane %v518_v53, 4  ;;  %v962_v0 = vsel %vm2441_vm5, %v960_v59, %v961_v39 }
  0x54   : > { %2233 = vmatpush3.bf16.msra.mxu0 %v2324_v10  ;;  %v1015_v29 = vsel %vm2441_vm5, %v2160_v32, %v1014_v42  ;;  %v1016_v58 = vrot.slane %v1014_v42, 4  ;;  %v2877_v55 = vcombine.low %v959_v34, %v962_v0  ;;  %v279_v32 = vld [vmem:[%s2409_s22 + $0xb0] sm:$0x1]  ;;  %v755_v42 = vshrl.u32 %v278_v63, 16 }
  0x55   : > { %2272 = vmatpush3.bf16.msra.mxu1 %v2324_v10  ;;  %v2859_v10 = vcombine.low %v2427_v12, %v2434_v14  ;;  %v2882_v12 = vcombine.low %v2847_v60, %v278_v63  ;;  %v742_v14 = vshrl.u32 %v2847_v60, 16  ;;  %v553_v27 = vshll.u32 %v2862_v18, 16 }
  0x56   : > { %1481 = vrot.lane.b32.xlu0 %v2643_v49, %s2358_s29  ;;  %v2897_v53 = vsel %vm2441_vm5, %v1009_v47, %v1010_v26  ;;  %v563_v24 = vshrl.u32 %v2865_v21, 16  ;;  %v747_v45 = vrot.slane %v745_v4, 5  ;;  %v757_v39 = vrot.slane %v755_v42, 4 }
  0x57   : > { %1573 = vrot.lane.b32.xlu1 %v2648_v11, %s2359_s6  ;;  %3610 = vst [vmem:[#allocation8_spill] sm:$0xff] %v2859_v10  ;;  %394 = vst.msk [vmem:[#allocation2 + $0x40] sm:$0xff] %vm385_vm0, %v2859_v10  ;;  %v744_v38 = vrot.slane %v742_v14, 4  ;;  %v761_v34 = vshll.u32 %v279_v32, 16  ;;  %v555_v47 = vrot.slane %v553_v27, 5  ;;  %v2161_v56 = vrot.slane %v2847_v60, 9 }
  0x58   : > { %400 = vst.msk [vmem:[#allocation2 + $0x70] sm:$0xff] %vm385_vm0, %v2882_v12  ;;  %v565_v0 = vrot.slane %v563_v24, 4  ;;  %v1024_v3 = vrot.slane %v279_v32, 5  ;;  %v965_v32 = vrot.slane %v2865_v21, 5 }
  0x59   : > { %v748_v26 = vor.u32 %v747_v45, %v744_v38  ;;  %v763_v8 = vrot.slane %v761_v34, 5  ;;  %v1021_v45 = vrot.slane %v278_v63, 5  ;;  %v2153_v34 = vrot.slane %v2862_v18, 9 }
  0x5a   : > { %1483 = vrot.lane.b32.xlu0 %v2778_v57, %s2358_s29 }
  0x5b   : > { %857 = vrot.lane.b32.xlu1 %v2614_v15, %s2354_s25  ;;  %v1017_v15 = vrot.slane %v2811_v30, 5  ;;  %v749_v42 = vrot.slane %v748_v26, 4 }
  0x5d   : > { %v1018_v9 = vsel %vm2441_vm5, %v1016_v58, %v1017_v15  ;;  %v550_v15 = vshrl.u32 %v2862_v18, 16  ;;  %v751_v58 = vshll.u32 %v278_v63, 16  ;;  %v1022_v63 = vsel %vm2441_vm5, %v2161_v56, %v1021_v45 }
  0x5e   : > { %1557 = vrot.lane.b32.xlu0 %v2685_v35, %s2359_s6  ;;  %v2871_v19 = vcombine.low %v1015_v29, %v1018_v9  ;;  %v255_v29 = vld [vmem:[%s2409_s22 + $0x50] sm:$0x1]  ;;  %v559_v9 = vshll.u32 %v2865_v21, 16  ;;  %v966_v56 = vsel %vm2441_vm5, %v2153_v34, %v965_v32 }
  0x5f   : > { %1575 = vrot.lane.b32.xlu1 %v2796_v20, %s2359_s6  ;;  %v552_v59 = vrot.slane %v550_v15, 4  ;;  %v753_v4 = vrot.slane %v751_v58, 5  ;;  %v569_v7 = vshll.u32 %v255_v29, 16 }
  0x60   : > { %v561_v15 = vrot.slane %v559_v9, 5 }
  0x61   : > { %v556_v54 = vor.u32 %v555_v47, %v552_v59  ;;  %v758_v38 = vor.u32 %v757_v39, %v753_v4  ;;  %v571_v27 = vrot.slane %v569_v7, 5  ;;  %v2918_v59 = vld [vmem:[%s2409_s22 + $0xb4] sm:$0xf]  ;;  %v1023_v7 = vrot.slane %v1021_v45, 4  ;;  %v2926_v39 = vld [vmem:[%s2409_s22 + $0xb8] sm:$0xf] }
  0x62   : > { %841 = vrot.lane.b32.xlu0 %v2643_v49, %s2354_s25  ;;  %v2891_v49 = vcombine.low %v2862_v18, %v2865_v21  ;;  %v566_v58 = vor.u32 %v565_v0, %v561_v15  ;;  %v968_v47 = vrot.slane %v255_v29, 5  ;;  %v967_v21 = vrot.slane %v965_v32, 4 }
  0x63   : > { %859 = vrot.lane.b32.xlu1 %v2727_v17, %s2354_s25  ;;  %v557_v24 = vrot.slane %v556_v54, 4  ;;  %v759_v60 = vrot.slane %v758_v38, 4  ;;  %v1025_v0 = vsel %vm2441_vm5, %v1023_v7, %v1024_v3  ;;  %v2953_v3 = vcombine.low %v2918_v59, %v2926_v39 }
  0x64   : > { %392 = vst.msk [vmem:[#allocation2 + $0x30] sm:$0xff] %vm385_vm0, %v2891_v49  ;;  %v567_v26 = vrot.slane %v566_v58, 4  ;;  %v766_v45 = vshrl.u32 %v2918_v59, 16  ;;  %v779_v58 = vshrl.u32 %v2926_v39, 16 }
  0x65   : > { %v562_v18 = vsel %vm2486_vm6, %v557_v24, %v561_v15  ;;  %v764_v9 = vsel %vm2486_vm6, %v759_v60, %v763_v8  ;;  %v2949_v15 = vcombine.low %v1022_v63, %v1025_v0  ;;  %v2964_v24 = vld [vmem:[%s2409_s22 + $0xbc] sm:$0x1]  ;;  %401 = vst.msk [vmem:[#allocation2 + $0x78] sm:$0xff] %vm385_vm0, %v2953_v3  ;;  %v524_v63 = vsel %vm2486_vm6, %v2869_v25, %v2807_v36 }
  0x66   : > { %1559 = vrot.lane.b32.xlu0 %v2802_v62, %s2359_s6  ;;  %v572_v8 = vsel %vm2486_vm6, %v567_v26, %v571_v27  ;;  %v258_v60 = vld [vmem:[%s2409_s22 + $0x5c] sm:$0x1]  ;;  %v2325_v26 = vld [vmem:[%s3586_s1 + $0x10] ss:$0 sps:$4 sm:$0x33]   ;;  %v781_v0 = vrot.slane %v779_v58, 4 }
  0x67   : > { %1101 = vrot.lane.b32.xlu1 %v2648_v11, %s2353_s24  ;;  %v754_v11 = vsel %vm2486_vm6, %v749_v42, %v753_v4  ;;  %v2938_v4 = vld [vmem:[%s2409_s22 + $0x54] sm:$0xf]  ;;  %v2941_v42 = vld [vmem:[%s2409_s22 + $0x58] sm:$0xf]  ;;  %v2957_v38 = vcombine.low %v562_v18, %v572_v8  ;;  %v768_v18 = vrot.slane %v766_v45, 4  ;;  %v785_v36 = vshll.u32 %v2964_v24, 16  ;;  %2274 = vmatprep.subr.msk.bf16.mxu0 %vm1707_vm7, %v2325_v26 }
  0x68   : > { %v2945_v29 = vcombine.low %v754_v11, %v764_v9  ;;  %v769_v11 = vshll.u32 %v2918_v59, 16  ;;  %v574_v34 = vshrl.u32 %v2938_v4, 16  ;;  %v577_v7 = vshll.u32 %v2938_v4, 16  ;;  %2275 = vmatprep.subr.msk.bf16.mxu1 %vm1707_vm7, %v2325_v26 }
  0x69   : > { %v587_v32 = vshrl.u32 %v2941_v42, 16  ;;  %v775_v9 = vshll.u32 %v2926_v39, 16  ;;  %v787_v54 = vrot.slane %v785_v36, 5  ;;  %v593_v14 = vshll.u32 %v258_v60, 16 }
  0x6a   : > { %843 = vrot.lane.b32.xlu0 %v2778_v57, %s2354_s25  ;;  %v576_v25 = vrot.slane %v574_v34, 4  ;;  %v1709_v34 = vsel %vm1707_vm7, %v2325_v26, 0 }
  0x6b   : > { %1103 = vrot.lane.b32.xlu1 %v2796_v20, %s2353_s24  ;;  %v589_v8 = vrot.slane %v587_v32, 4  ;;  %v777_v45 = vrot.slane %v775_v9, 5  ;;  %2235 = vmatpush3.bf16.msra.mxu0 %v1709_v34 }
  0x6c   : > { %2273 = vmatpush3.bf16.msra.mxu1 %v1709_v34  ;;  %v3614_v34 = vshrl.u32 %v2715_v2, 16 }
  0x6d   : > { %v782_v10 = vor.u32 %v781_v0, %v777_v45  ;;  %v975_v0 = vrot.slane %v258_v60, 5 }
  0x6e   : > { %1085 = vrot.lane.b32.xlu0 %v2685_v35, %s2353_s24  ;;  %v969_v35 = vsel %vm2441_vm5, %v967_v21, %v968_v47  ;;  %v771_v47 = vrot.slane %v769_v11, 5  ;;  %v583_v21 = vshll.u32 %v2941_v42, 16  ;;  %v2162_v11 = vrot.slane %v2918_v59, 9 }
  0x6f   : > { %1171 = vrot.lane.b32.xlu1 %v2606_v50, %s2352_s23  ;;  %v2966_v27 = vcombine.low %v966_v56, %v969_v35  ;;  %v2973_v50 = vcombine.low %v2938_v4, %v2941_v42  ;;  %v579_v56 = vrot.slane %v577_v7, 5  ;;  %v783_v9 = vrot.slane %v782_v10, 4 }
  0x70   : > { %v772_v35 = vor.u32 %v771_v47, %v768_v18  ;;  %v585_v1 = vrot.slane %v583_v21, 5  ;;  %v1028_v18 = vrot.slane %v2926_v39, 5  ;;  %v1031_v47 = vrot.slane %v2964_v24, 5 }
  0x71   : > { %3611 = vst [vmem:[#allocation9_spill] sm:$0xff] %v2973_v50  ;;  %393 = vst.msk [vmem:[#allocation2 + $0x38] sm:$0xff] %vm385_vm0, %v2973_v50  ;;  %v580_v41 = vor.u32 %v579_v56, %v576_v25  ;;  %v595_v50 = vrot.slane %v593_v14, 5  ;;  %v972_v14 = vrot.slane %v2941_v42, 5  ;;  %v788_v10 = vsel %vm2486_vm6, %v783_v9, %v787_v54 }
  0x72   : > { %1087 = vrot.lane.b32.xlu0 %v2802_v62, %s2353_s24  ;;  %v773_v58 = vrot.slane %v772_v35, 4  ;;  %v590_v32 = vor.u32 %v589_v8, %v585_v1  ;;  %v1029_v26 = vsel %vm2441_vm5, %v2162_v11, %v1028_v18  ;;  %v1030_v39 = vrot.slane %v1028_v18, 4 }
  0x73   : > { %1173 = vrot.lane.b32.xlu1 %v2675_v6, %s2352_s23  ;;  %v581_v7 = vrot.slane %v580_v41, 4  ;;  %v727_v54 = vshll.u32 %v2723_v13, 16  ;;  %v535_v18 = vshll.u32 %v2742_v28, 16  ;;  %vm1658_vm0 = vcmask 293888  }
  0x74   : > { %v778_v59 = vsel %vm2486_vm6, %v773_v58, %v777_v45  ;;  %v591_v41 = vrot.slane %v590_v32, 4  ;;  %v1032_v25 = vsel %vm2441_vm5, %v1030_v39, %v1031_v47  ;;  %v3613_v45 = vrot.slane %v2681_v31, 5 }
  0x75   : > { %v3019_v42 = vcombine.low %v778_v59, %v788_v10  ;;  %v3028_v21 = vcombine.low %v1029_v26, %v1032_v25  ;;  %v954_v58 = vrot.slane %v2766_v44, 5  ;;  %v539_v32 = vshrl.u32 %v2742_v28, 16 }
  0x76   : > { %1155 = vrot.lane.b32.xlu0 %v2631_v61, %s2352_s23  ;;  %v2154_v61 = vrot.slane %v2938_v4, 9  ;;  %v974_v4 = vrot.slane %v972_v14, 4  ;;  %v596_v36 = vsel %vm2486_vm6, %v591_v41, %v595_v50  ;;  %v3612_v50 = vsel %vm2486_vm6, %v2816_v40, %v2798_v37 }
  0x77   : > { %1263 = vrot.lane.b32.xlu1 %v2727_v17, %s2355_s26  ;;  %v586_v17 = vsel %vm2486_vm6, %v581_v7, %v585_v1  ;;  %v731_v1 = vshrl.u32 %v2723_v13, 16  ;;  %v3041_v35 = vcombine.low %v3612_v50, %v524_v63  ;;  %v2151_v13 = vrot.slane %v2678_v33, 9 }
  0x78   : > { %v973_v24 = vsel %vm2441_vm5, %v2154_v61, %v972_v14  ;;  %v3026_v56 = vcombine.low %v586_v17, %v596_v36  ;;  %v976_v60 = vsel %vm2441_vm5, %v974_v4, %v975_v0  ;;  %v953_v11 = vrot.slane %v3613_v45, 4 }
  0x79   : > { %v3032_v8 = vcombine.low %v973_v24, %v976_v60  ;;  %v720_v7 = vrot.slane %v3614_v34, 4  ;;  %v3615_v37 = vshll.u32 %v2715_v2, 16  ;;  %v729_v63 = vrot.slane %v727_v54, 5 }
  0x7a   : > { %1157 = vrot.lane.b32.xlu0 %v2698_v46, %s2352_s23  ;;  %v733_v33 = vrot.slane %v731_v1, 4  ;;  %v3616_v44 = vmov %v3613_v45  ;;  %v529_v2 = vshll.u32 %v2734_v48, 16  ;;  %v737_v31 = vshll.u32 %v2811_v30, 16 }
  0x7b   : > { %1265 = vrot.lane.b32.xlu1 %v2867_v23, %s2355_s26  ;;  %v723_v40 = vrot.slane %v3615_v37, 5  ;;  %v537_v17 = vrot.slane %v535_v18, 5  ;;  %v545_v10 = vshll.u32 %v2826_v22, 16 }
  0x7c   : > { %v734_v59 = vor.u32 %v733_v33, %v729_v63  ;;  %v531_v14 = vrot.slane %v529_v2, 5  ;;  %v739_v39 = vrot.slane %v737_v31, 5 }
  0x7d   : > { %v724_v47 = vor.u32 %v723_v40, %v720_v7  ;;  %v547_v25 = vrot.slane %v545_v10, 5 }
  0x7e   : > { %1247 = vrot.lane.b32.xlu0 %v2778_v57, %s2355_s26  ;;  %v3051_v57 = vcombine.low %v2842_v52, %v2897_v53  ;;  %v955_v52 = vsel %vm2441_vm5, %v953_v11, %v954_v58  ;;  %v526_v53 = vshrl.u32 %v2734_v48, 16  ;;  %v541_v48 = vrot.slane %v539_v32, 4 }
  0x7f   : > { %1339 = vrot.lane.b32.xlu1 %v2796_v20, %s2356_s27  ;;  %v952_v20 = vsel %vm2441_vm5, %v2151_v13, %v3616_v44  ;;  %v725_v41 = vrot.slane %v724_v47, 4  ;;  %v735_v26 = vrot.slane %v734_v59, 4 }
  0x80   : > { %v3074_v9 = vcombine.low %v952_v20, %v955_v52  ;;  %v528_v61 = vrot.slane %v526_v53, 4  ;;  %v542_v30 = vor.u32 %v541_v48, %v537_v17 }
  0x81   : > { %v740_v24 = vsel %vm2486_vm6, %v735_v26, %v739_v39 }
  0x82   : > { %1249 = vrot.lane.b32.xlu0 %v3041_v35, %s2355_s26  ;;  %v543_v36 = vrot.slane %v542_v30, 4 }
  0x83   : > { %1341 = vrot.lane.b32.xlu1 %v3051_v57, %s2356_s27 }
  0x86   : > { %1323 = vrot.lane.b32.xlu0 %v2802_v62, %s2356_s27  ;;  %v532_v62 = vor.u32 %v531_v14, %v528_v61  ;;  %v3617_v61 = vld [vmem:[#allocation9_spill] sm:$0xff] }
  0x87   : > { %1409 = vrot.lane.b32.xlu1 %v2675_v6, %s2357_s28  ;;  %v730_v6 = vsel %vm2486_vm6, %v725_v41, %v729_v63 }
  0x88   : > { %v3091_v0 = vcombine.low %v730_v6, %v740_v24  ;;  %v533_v1 = vrot.slane %v532_v62, 4  ;;  %v3226_v6 = vld [vmem:[%s2409_s22 + $0xc4] sm:$0xf] }
  0x89   : > { %v1168_v28 = vpop.permute.xlu1 %1167 }
  0x8a   : > { %1325 = vrot.lane.b32.xlu0 %v3074_v9, %s2356_s27  ;;  %v538_v22 = vsel %vm2486_vm6, %v533_v1, %v537_v17  ;;  %v1230_v1 = vshrl.u32 %v3226_v6, 16 }
  0x8b   : > { %1411 = vrot.lane.b32.xlu1 %v2739_v5, %s2357_s28  ;;  %v1152_v4 = vpop.permute.xlu0 %1151 }
  0x8e   : > { %1393 = vrot.lane.b32.xlu0 %v2698_v46, %s2357_s28  ;;  %v548_v46 = vsel %vm2486_vm6, %v543_v36, %v547_v25  ;;  %v1226_v36 = vshll.u32 %v3226_v6, 16 }
  0x8f   : > { %1501 = vrot.lane.b32.xlu1 %v2867_v23, %s2358_s29  ;;  %v3103_v13 = vcombine.low %v538_v22, %v548_v46 }
  0x90   : > { %v1228_v46 = vrot.slane %v1226_v36, 5 }
  0x91   : > { %v1098_v54 = vpop.permute.xlu1 %1097 }
  0x92   : > { %1395 = vrot.lane.b32.xlu0 %v2770_v43, %s2357_s28 }
  0x93   : > { %1503 = vrot.lane.b32.xlu1 %v3091_v0, %s2358_s29  ;;  %v1082_v60 = vpop.permute.xlu0 %1081 }
  0x95   : > { %v1100_v50 = vpop.permute.xlu1 %1099 }
  0x96   : > { %1485 = vrot.lane.b32.xlu0 %v3041_v35, %s2358_s29 }
  0x97   : > { %1577 = vrot.lane.b32.xlu1 %v3051_v57, %s2359_s6  ;;  %v1084_v45 = vpop.permute.xlu0 %1083 }
  0x9a   : > { %1487 = vrot.lane.b32.xlu0 %v3103_v13, %s2358_s29  ;;  %v840_v11 = vpop.permute.xlu1 %839 }
  0x9b   : > { %861 = vrot.lane.b32.xlu1 %v2867_v23, %s2354_s25  ;;  %887 = vst.msk [vmem:[#allocation2 + $0x8] sm:$0xff] %vm885_vm8, %v840_v11 }
  0x9c   : > { %1131 = vst.msk [vmem:[#allocation2 + $0x8] sm:$0xff] %vm1129_vm9, %v1084_v45 }
  0x9e   : > { %1561 = vrot.lane.b32.xlu0 %v3074_v9, %s2359_s6 }
  0x9f   : > { %v838_v58 = vpop.permute.xlu0 %837  ;;  %1579 = vrot.lane.b32.xlu1 %v2871_v19, %s2359_s6 }
  0xa0   : > { %886 = vst.msk [vmem:[#allocation2] sm:$0xff] %vm885_vm8, %v838_v58 }
  0xa1   : > { %1130 = vst.msk [vmem:[#allocation2] sm:$0xff] %vm1129_vm9, %v1082_v60  ;;  %v856_v34 = vpop.permute.xlu1 %855  ;;  %v1232_v60 = vrot.slane %v1230_v1, 4 }
  0xa2   : > { %845 = vrot.lane.b32.xlu0 %v3041_v35, %s2354_s25  ;;  %895 = vst.msk [vmem:[#allocation2 + $0x48] sm:$0xff] %vm885_vm8, %v856_v34 }
  0xa3   : > { %1200 = vst.msk [vmem:[#allocation2] sm:$0xff] %vm1199_vm10, %v1152_v4  ;;  %863 = vrot.lane.b32.xlu1 %v3091_v0, %s2354_s25 }
  0xa4   : > { %1139 = vst.msk [vmem:[#allocation2 + $0x48] sm:$0xff] %vm1129_vm9, %v1100_v50 }
  0xa5   : > { %v1170_v23 = vpop.permute.xlu1 %1169 }
  0xa6   : > { %1563 = vrot.lane.b32.xlu0 %v2877_v55, %s2359_s6  ;;  %1209 = vst.msk [vmem:[#allocation2 + $0x48] sm:$0xff] %vm1199_vm10, %v1170_v23 }
  0xa7   : > { %1105 = vrot.lane.b32.xlu1 %v3051_v57, %s2353_s24 }
  0xa8   : > { %v854_v7 = vpop.permute.xlu0 %853 }
  0xa9   : > { %894 = vst.msk [vmem:[#allocation2 + $0x40] sm:$0xff] %vm885_vm8, %v854_v7  ;;  %v1260_v35 = vpop.permute.xlu1 %1259 }
  0xaa   : > { %1138 = vst.msk [vmem:[#allocation2 + $0x40] sm:$0xff] %vm1129_vm9, %v1098_v54  ;;  %847 = vrot.lane.b32.xlu0 %v3103_v13, %s2354_s25 }
  0xab   : > { %1208 = vst.msk [vmem:[#allocation2 + $0x40] sm:$0xff] %vm1199_vm10, %v1168_v28  ;;  %1107 = vrot.lane.b32.xlu1 %v2871_v19, %s2353_s24 }
  0xac   : > { %v1154_v37 = vpop.permute.xlu0 %1153  ;;  %1300 = vst.msk [vmem:[#allocation2 + $0x40] sm:$0xff] %vm1291_vm11, %v1260_v35 }
  0xad   : > { %1201 = vst.msk [vmem:[#allocation2 + $0x8] sm:$0xff] %vm1199_vm10, %v1154_v37  ;;  %v1262_v57 = vpop.permute.xlu1 %1261 }
  0xae   : > { %1089 = vrot.lane.b32.xlu0 %v3074_v9, %s2353_s24  ;;  %1301 = vst.msk [vmem:[#allocation2 + $0x48] sm:$0xff] %vm1291_vm11, %v1262_v57 }
  0xaf   : > { %1175 = vrot.lane.b32.xlu1 %v2739_v5, %s2352_s23 }
  0xb0   : > { %v1244_v40 = vpop.permute.xlu0 %1243 }
  0xb1   : > { %1292 = vst.msk [vmem:[#allocation2] sm:$0xff] %vm1291_vm11, %v1244_v40  ;;  %v1336_v63 = vpop.permute.xlu1 %1335 }
  0xb2   : > { %1091 = vrot.lane.b32.xlu0 %v2877_v55, %s2353_s24  ;;  %1376 = vst.msk [vmem:[#allocation2 + $0x40] sm:$0xff] %vm1367_vm12, %v1336_v63 }
  0xb3   : > { %1177 = vrot.lane.b32.xlu1 %v2882_v12, %s2352_s23 }
  0xb4   : > { %v1246_v33 = vpop.permute.xlu0 %1245 }
  0xb5   : > { %1293 = vst.msk [vmem:[#allocation2 + $0x8] sm:$0xff] %vm1291_vm11, %v1246_v33  ;;  %v1338_v44 = vpop.permute.xlu1 %1337 }
  0xb6   : > { %1159 = vrot.lane.b32.xlu0 %v2770_v43, %s2352_s23  ;;  %1377 = vst.msk [vmem:[#allocation2 + $0x48] sm:$0xff] %vm1367_vm12, %v1338_v44 }
  0xb7   : > { %1267 = vrot.lane.b32.xlu1 %v3091_v0, %s2355_s26 }
  0xb8   : > { %v1320_v5 = vpop.permute.xlu0 %1319 }
  0xb9   : > { %1368 = vst.msk [vmem:[#allocation2] sm:$0xff] %vm1367_vm12, %v1320_v5  ;;  %v1406_v20 = vpop.permute.xlu1 %1405 }
  0xba   : > { %1161 = vrot.lane.b32.xlu0 %v2891_v49, %s2352_s23  ;;  %1446 = vst.msk [vmem:[#allocation2 + $0x40] sm:$0xff] %vm1437_vm13, %v1406_v20 }
  0xbb   : > { %1269 = vrot.lane.b32.xlu1 %v2945_v29, %s2355_s26 }
  0xbc   : > { %v1322_v52 = vpop.permute.xlu0 %1321 }
  0xbd   : > { %1369 = vst.msk [vmem:[#allocation2 + $0x8] sm:$0xff] %vm1367_vm12, %v1322_v52  ;;  %v1408_v43 = vpop.permute.xlu1 %1407 }
  0xbe   : > { %1251 = vrot.lane.b32.xlu0 %v3103_v13, %s2355_s26  ;;  %1447 = vst.msk [vmem:[#allocation2 + $0x48] sm:$0xff] %vm1437_vm13, %v1408_v43  ;;  %v285_v13 = vld [vmem:[%s2409_s22 + $0xc8] sm:$0x1] }
  0xbf   : > { %1343 = vrot.lane.b32.xlu1 %v2871_v19, %s2356_s27  ;;  %v1236_v58 = vshll.u32 %v285_v13, 16  ;;  %v1314_v43 = vrot.slane %v285_v13, 5 }
  0xc0   : > { %v1390_v53 = vpop.permute.xlu0 %1389 }
  0xc1   : > { %1438 = vst.msk [vmem:[#allocation2] sm:$0xff] %vm1437_vm13, %v1390_v53  ;;  %v1498_v2 = vpop.permute.xlu1 %1497  ;;  %v1238_v57 = vrot.slane %v1236_v58, 5  ;;  %v3621_v58 = vld [vmem:[#allocation3_spill] sm:$0xff] }
  0xc2   : > { %1253 = vrot.lane.b32.xlu0 %v2957_v38, %s2355_s26  ;;  %1538 = vst.msk [vmem:[#allocation2 + $0x40] sm:$0xff] %vm1529_vm14, %v1498_v2 }
  0xc3   : > { %1345 = vrot.lane.b32.xlu1 %v2949_v15, %s2356_s27 }
  0xc4   : > { %v1392_v32 = vpop.permute.xlu0 %1391 }
  0xc5   : > { %1439 = vst.msk [vmem:[#allocation2 + $0x8] sm:$0xff] %vm1437_vm13, %v1392_v32  ;;  %v1500_v18 = vpop.permute.xlu1 %1499  ;;  %v3282_v32 = vld [vmem:[%s2409_s22 + $0xcc] sm:$0xf] }
  0xc6   : > { %1327 = vrot.lane.b32.xlu0 %v2877_v55, %s2356_s27  ;;  %1539 = vst.msk [vmem:[#allocation2 + $0x48] sm:$0xff] %vm1529_vm14, %v1500_v18  ;;  %v3285_v18 = vld [vmem:[%s2409_s22 + $0xd0] sm:$0xf]  ;;  %v2185_v13 = vrot.slane %v3282_v32, 9 }
  0xc7   : > { %1413 = vrot.lane.b32.xlu1 %v2882_v12, %s2357_s28 }
  0xc8   : > { %v1482_v19 = vpop.permute.xlu0 %1481 }
  0xc9   : > { %1530 = vst.msk [vmem:[#allocation2] sm:$0xff] %vm1529_vm14, %v1482_v19  ;;  %v1574_v47 = vpop.permute.xlu1 %1573  ;;  %v3618_v19 = vld [vmem:[#allocation8_spill] sm:$0xff] }
  0xca   : > { %1329 = vrot.lane.b32.xlu0 %v2966_v27, %s2356_s27  ;;  %1614 = vst.msk [vmem:[#allocation2 + $0x40] sm:$0xff] %vm1605_vm15, %v1574_v47 }
  0xcb   : > { %1415 = vrot.lane.b32.xlu1 %v2953_v3, %s2357_s28 }
  0xcc   : > { %v1484_v59 = vpop.permute.xlu0 %1483 }
  0xcd   : > { %1531 = vst.msk [vmem:[#allocation2 + $0x8] sm:$0xff] %vm1529_vm14, %v1484_v59  ;;  %v858_v55 = vpop.permute.xlu1 %857 }
  0xce   : > { %1397 = vrot.lane.b32.xlu0 %v2891_v49, %s2357_s28  ;;  %896 = vst.msk [vmem:[#allocation2 + $0x50] sm:$0xff] %vm885_vm8, %v858_v55  ;;  %v1455_v55 = vshrl.u32 %v3282_v32, 16 }
  0xcf   : > { %1505 = vrot.lane.b32.xlu1 %v2945_v29, %s2358_s29 }
  0xd0   : > { %v1558_v12 = vpop.permute.xlu0 %1557 }
  0xd1   : > { %1606 = vst.msk [vmem:[#allocation2] sm:$0xff] %vm1605_vm15, %v1558_v12  ;;  %v1576_v31 = vpop.permute.xlu1 %1575  ;;  %v1630_v9 = vld [vmem:[#allocation2 + $0x40] sm:$0xff]  ;;  %v1458_v12 = vshll.u32 %v3282_v32, 16 }
  0xd2   : > { %1399 = vrot.lane.b32.xlu0 %v3617_v61, %s2357_s28  ;;  %1615 = vst.msk [vmem:[#allocation2 + $0x48] sm:$0xff] %vm1605_vm15, %v1576_v31  ;;  %2252 = vmatprep.mubr.msk.bf16.mxu1 %vm1658_vm0, %v1630_v9  ;;  %v1468_v31 = vshrl.u32 %v3285_v18, 16  ;;  %v1464_v9 = vshll.u32 %v3285_v18, 16 }
  0xd3   : > { %1507 = vrot.lane.b32.xlu1 %v3019_v42, %s2358_s29 }
  0xd4   : > { %v842_v49 = vpop.permute.xlu0 %841 }
  0xd5   : > { %888 = vst.msk [vmem:[#allocation2 + $0x10] sm:$0xff] %vm885_vm8, %v842_v49  ;;  %v860_v14 = vpop.permute.xlu1 %859 }
  0xd6   : > { %1489 = vrot.lane.b32.xlu0 %v2957_v38, %s2358_s29  ;;  %897 = vst.msk [vmem:[#allocation2 + $0x58] sm:$0xff] %vm885_vm8, %v860_v14 }
  0xd7   : > { %1581 = vrot.lane.b32.xlu1 %v2949_v15, %s2359_s6 }
  0xd8   : > { %v1560_v17 = vpop.permute.xlu0 %1559  ;;  %v1622_v48 = vld [vmem:[#allocation2] sm:$0xff] }
  0xd9   : > { %1607 = vst.msk [vmem:[#allocation2 + $0x8] sm:$0xff] %vm1605_vm15, %v1560_v17  ;;  %2236 = vmatprep.mubr.msk.bf16.mxu0 %vm1658_vm0, %v1622_v48  ;;  %v1102_v41 = vpop.permute.xlu1 %1101  ;;  %v1631_v26 = vld [vmem:[#allocation2 + $0x48] sm:$0xff]  ;;  %v1457_v17 = vrot.slane %v1455_v55, 4  ;;  %v1460_v48 = vrot.slane %v1458_v12, 5 }
  0xda   : > { %1491 = vrot.lane.b32.xlu0 %v3026_v56, %s2358_s29  ;;  %1140 = vst.msk [vmem:[#allocation2 + $0x50] sm:$0xff] %vm1129_vm9, %v1102_v41  ;;  %2253 = vmatmul.mubr.msk.bf16.vlgmr.msra.gmra.mrb[0].mxu1 %vm1658_vm0, %v1631_v26  ;;  %v1466_v41 = vrot.slane %v1464_v9, 5  ;;  %v1470_v26 = vrot.slane %v1468_v31, 4 }
  0xdb   : > { %865 = vrot.lane.b32.xlu1 %v2945_v29, %s2354_s25  ;;  %v3223_v29 = vld [vmem:[%s2409_s22 + $0xc0] sm:$0xf] }
  0xdc   : > { %v844_v39 = vpop.permute.xlu0 %843  ;;  %v1217_v4 = vshrl.u32 %v3223_v29, 16  ;;  %v1220_v0 = vshll.u32 %v3223_v29, 16  ;;  %v3258_v23 = vcombine.low %v3223_v29, %v3226_v6  ;;  %v2181_v20 = vrot.slane %v3223_v29, 9 }
  0xdd   : > { %889 = vst.msk [vmem:[#allocation2 + $0x18] sm:$0xff] %vm885_vm8, %v844_v39  ;;  %v1104_v28 = vpop.permute.xlu1 %1103 }
  0xde   : > { %1565 = vrot.lane.b32.xlu0 %v2966_v27, %s2359_s6  ;;  %1141 = vst.msk [vmem:[#allocation2 + $0x58] sm:$0xff] %vm1129_vm9, %v1104_v28  ;;  %v1219_v54 = vrot.slane %v1217_v4, 4  ;;  %v1222_v22 = vrot.slane %v1220_v0, 5  ;;  %v288_v28 = vld [vmem:[%s2409_s22 + $0xd4] sm:$0x1]  ;;  %s3450_s22 = scalar_lea.vmem %s3589_s4, %s2210_s19 }
  0xdf   : > { %1583 = vrot.lane.b32.xlu1 %v3028_v21, %s2359_s6  ;;  %v1552_v51 = vrot.slane %v288_v28, 5 }
  0xe0   : > { %v1086_v62 = vpop.permute.xlu0 %1085  ;;  %v1623_v30 = vld [vmem:[#allocation2 + $0x8] sm:$0xff]  ;;  %v1223_v11 = vor.u32 %v1222_v22, %v1219_v54  ;;  %v1549_v22 = vrot.slane %v3285_v18, 5 }
  0xe1   : > { %1132 = vst.msk [vmem:[#allocation2 + $0x10] sm:$0xff] %vm1129_vm9, %v1086_v62  ;;  %2237 = vmatmul.mubr.msk.bf16.vlgmr.msra.gmra.mrb[0].mxu0 %vm1658_vm0, %v1623_v30  ;;  %v1172_v10 = vpop.permute.xlu1 %1171  ;;  %v3619_v62 = vld [vmem:[#allocation7_spill] sm:$0xff]  ;;  %v1461_v30 = vor.u32 %v1460_v48, %v1457_v17 }
  0xe2   : > { %849 = vrot.lane.b32.xlu0 %v2957_v38, %s2354_s25  ;;  %1210 = vst.msk [vmem:[#allocation2 + $0x50] sm:$0xff] %vm1199_vm10, %v1172_v10  ;;  %v1224_v35 = vrot.slane %v1223_v11, 4  ;;  %v1474_v10 = vshll.u32 %v288_v28, 16 }
  0xe3   : > { %867 = vrot.lane.b32.xlu1 %v3019_v42, %s2354_s25  ;;  %v1462_v4 = vrot.slane %v1461_v30, 4 }
  0xe4   : > { %v1088_v24 = vpop.permute.xlu0 %1087  ;;  %v1229_v63 = vsel %vm2486_vm6, %v1224_v35, %v1228_v46  ;;  %v1476_v1 = vrot.slane %v1474_v10, 5 }
  0xe5   : > { %1133 = vst.msk [vmem:[#allocation2 + $0x18] sm:$0xff] %vm1129_vm9, %v1088_v24  ;;  %v1174_v25 = vpop.permute.xlu1 %1173 }
  0xe6   : > { %1567 = vrot.lane.b32.xlu0 %v3032_v8, %s2359_s6  ;;  %1211 = vst.msk [vmem:[#allocation2 + $0x58] sm:$0xff] %vm1199_vm10, %v1174_v25  ;;  %v3620_v25 = vld [vmem:[#allocation4_spill] sm:$0xff] }
  0xe7   : > { %1109 = vrot.lane.b32.xlu1 %v2949_v15, %s2353_s24  ;;  %v1233_v15 = vor.u32 %v1232_v60, %v1228_v46 }
  0xe8   : > { %v1156_v38 = vpop.permute.xlu0 %1155 }
  0xe9   : > { %1202 = vst.msk [vmem:[#allocation2 + $0x10] sm:$0xff] %vm1199_vm10, %v1156_v38  ;;  %v1264_v50 = vpop.permute.xlu1 %1263  ;;  %v1234_v37 = vrot.slane %v1233_v15, 4  ;;  %v1467_v38 = vsel %vm2486_vm6, %v1462_v4, %v1466_v41 }
  0xea   : > { %851 = vrot.lane.b32.xlu0 %v3026_v56, %s2354_s25  ;;  %1302 = vst.msk [vmem:[#allocation2 + $0x50] sm:$0xff] %vm1291_vm11, %v1264_v50 }
  0xeb   : > { %1111 = vrot.lane.b32.xlu1 %v3028_v21, %s2353_s24  ;;  %v1239_v33 = vsel %vm2486_vm6, %v1234_v37, %v1238_v57 }
  0xec   : > { %v1158_v45 = vpop.permute.xlu0 %1157  ;;  %v3277_v5 = vcombine.low %v1229_v63, %v1239_v33 }
  0xed   : > { %1203 = vst.msk [vmem:[#allocation2 + $0x18] sm:$0xff] %vm1199_vm10, %v1158_v45  ;;  %v1266_v34 = vpop.permute.xlu1 %1265  ;;  %v1551_v45 = vrot.slane %v1549_v22, 4 }
  0xee   : > { %1093 = vrot.lane.b32.xlu0 %v2966_v27, %s2353_s24  ;;  %1303 = vst.msk [vmem:[#allocation2 + $0x58] sm:$0xff] %vm1291_vm11, %v1266_v34 }
  0xef   : > { %1179 = vrot.lane.b32.xlu1 %v2953_v3, %s2352_s23  ;;  %v1311_v3 = vrot.slane %v3226_v6, 5  ;;  %v2183_v6 = vcombine.low %v3282_v32, %v3285_v18 }
  0xf0   : > { %v1248_v7 = vpop.permute.xlu0 %1247 }
  0xf1   : > { %1294 = vst.msk [vmem:[#allocation2 + $0x10] sm:$0xff] %vm1291_vm11, %v1248_v7  ;;  %v1340_v40 = vpop.permute.xlu1 %1339  ;;  %v1313_v52 = vrot.slane %v1311_v3, 4  ;;  %v1553_v7 = vsel %vm2441_vm5, %v1551_v45, %v1552_v51 }
  0xf2   : > { %1095 = vrot.lane.b32.xlu0 %v3032_v8, %s2353_s24  ;;  %1378 = vst.msk [vmem:[#allocation2 + $0x50] sm:$0xff] %vm1367_vm12, %v1340_v40 }
  0xf3   : > { %1181 = vrot.lane.b32.xlu1 %v3258_v23, %s2352_s23  ;;  %v1315_v47 = vsel %vm2441_vm5, %v1313_v52, %v1314_v43  ;;  %v3623_v52 = vld [vmem:[#allocation5_spill] sm:$0xff] }
  0xf4   : > { %v1250_v27 = vpop.permute.xlu0 %1249 }
  0xf5   : > { %1295 = vst.msk [vmem:[#allocation2 + $0x18] sm:$0xff] %vm1291_vm11, %v1250_v27  ;;  %v1342_v44 = vpop.permute.xlu1 %1341  ;;  %v3622_v27 = vld [vmem:[#allocation6_spill] sm:$0xff] }
  0xf6   : > { %1163 = vrot.lane.b32.xlu0 %v3617_v61, %s2352_s23  ;;  %1379 = vst.msk [vmem:[#allocation2 + $0x58] sm:$0xff] %vm1367_vm12, %v1342_v44 }
  0xf7   : > { %1271 = vrot.lane.b32.xlu1 %v3019_v42, %s2355_s26  ;;  %v1312_v42 = vsel %vm2441_vm5, %v2181_v20, %v1311_v3 }
  0xf8   : > { %v1324_v53 = vpop.permute.xlu0 %1323  ;;  %v2182_v49 = vcombine.low %v1312_v42, %v1315_v47 }
  0xf9   : > { %1370 = vst.msk [vmem:[#allocation2 + $0x10] sm:$0xff] %vm1367_vm12, %v1324_v53  ;;  %v1410_v2 = vpop.permute.xlu1 %1409 }
  0xfa   : > { %1165 = vrot.lane.b32.xlu0 %v3618_v19, %s2352_s23  ;;  %1448 = vst.msk [vmem:[#allocation2 + $0x50] sm:$0xff] %vm1437_vm13, %v1410_v2 }
  0xfb   : > { %1273 = vrot.lane.b32.xlu1 %v3277_v5, %s2355_s26 }
  0xfc   : > { %v1326_v59 = vpop.permute.xlu0 %1325 }
  0xfd   : > { %1371 = vst.msk [vmem:[#allocation2 + $0x18] sm:$0xff] %vm1367_vm12, %v1326_v59  ;;  %v1412_v61 = vpop.permute.xlu1 %1411 }
  0xfe   : > { %1255 = vrot.lane.b32.xlu0 %v3026_v56, %s2355_s26  ;;  %1449 = vst.msk [vmem:[#allocation2 + $0x58] sm:$0xff] %vm1437_vm13, %v1412_v61 }
  0xff   : > { %1347 = vrot.lane.b32.xlu1 %v3028_v21, %s2356_s27  ;;  %v1471_v21 = vor.u32 %v1470_v26, %v1466_v41 }
 0x100   : > { %v1394_v14 = vpop.permute.xlu0 %1393 }
 0x101   : > { %1440 = vst.msk [vmem:[#allocation2 + $0x10] sm:$0xff] %vm1437_vm13, %v1394_v14  ;;  %v1502_v39 = vpop.permute.xlu1 %1501  ;;  %v1472_v0 = vrot.slane %v1471_v21, 4 }
 0x102   : > { %1257 = vrot.lane.b32.xlu0 %v3619_v62, %s2355_s26  ;;  %1540 = vst.msk [vmem:[#allocation2 + $0x50] sm:$0xff] %vm1529_vm14, %v1502_v39 }
 0x103   : > { %1349 = vrot.lane.b32.xlu1 %v2182_v49, %s2356_s27  ;;  %v1477_v54 = vsel %vm2486_vm6, %v1472_v0, %v1476_v1 }
 0x104   : > { %v1396_v56 = vpop.permute.xlu0 %1395  ;;  %v2184_v60 = vcombine.low %v1467_v38, %v1477_v54 }
 0x105   : > { %1441 = vst.msk [vmem:[#allocation2 + $0x18] sm:$0xff] %vm1437_vm13, %v1396_v56  ;;  %v1504_v29 = vpop.permute.xlu1 %1503 }
 0x106   : > { %1331 = vrot.lane.b32.xlu0 %v3032_v8, %s2356_s27  ;;  %1541 = vst.msk [vmem:[#allocation2 + $0x58] sm:$0xff] %vm1529_vm14, %v1504_v29 }
 0x107   : > { %1417 = vrot.lane.b32.xlu1 %v3258_v23, %s2357_s28  ;;  %v1550_v23 = vsel %vm2441_vm5, %v2185_v13, %v1549_v22 }
 0x108   : > { %v1486_v24 = vpop.permute.xlu0 %1485  ;;  %v2186_v37 = vcombine.low %v1550_v23, %v1553_v7 }
 0x109   : > { %1532 = vst.msk [vmem:[#allocation2 + $0x10] sm:$0xff] %vm1529_vm14, %v1486_v24  ;;  %v1578_v36 = vpop.permute.xlu1 %1577 }
 0x10a   : > { %1333 = vrot.lane.b32.xlu0 %v3620_v25, %s2356_s27  ;;  %1616 = vst.msk [vmem:[#allocation2 + $0x50] sm:$0xff] %vm1605_vm15, %v1578_v36 }
 0x10b   : > { %1419 = vrot.lane.b32.xlu1 %v2183_v6, %s2357_s28 }
 0x10c   : > { %v1488_v8 = vpop.permute.xlu0 %1487 }
 0x10d   : > { %1533 = vst.msk [vmem:[#allocation2 + $0x18] sm:$0xff] %vm1529_vm14, %v1488_v8  ;;  %v862_v46 = vpop.permute.xlu1 %861 }
 0x10e   : > { %1401 = vrot.lane.b32.xlu0 %v3618_v19, %s2357_s28  ;;  %898 = vst.msk [vmem:[#allocation2 + $0x60] sm:$0xff] %vm885_vm8, %v862_v46 }
 0x10f   : > { %1509 = vrot.lane.b32.xlu1 %v3277_v5, %s2358_s29 }
 0x110   : > { %v1562_v50 = vpop.permute.xlu0 %1561 }
 0x111   : > { %1608 = vst.msk [vmem:[#allocation2 + $0x10] sm:$0xff] %vm1605_vm15, %v1562_v50  ;;  %v1580_v11 = vpop.permute.xlu1 %1579  ;;  %v1632_v15 = vld [vmem:[#allocation2 + $0x50] sm:$0xff] }
 0x112   : > { %1403 = vrot.lane.b32.xlu0 %v3621_v58, %s2357_s28  ;;  %1617 = vst.msk [vmem:[#allocation2 + $0x58] sm:$0xff] %vm1605_vm15, %v1580_v11  ;;  %2256 = vmatprep.mubr.msk.bf16.mxu1 %vm1658_vm0, %v1632_v15 }
 0x113   : > { %1511 = vrot.lane.b32.xlu1 %v2184_v60, %s2358_s29 }
 0x114   : > { %v846_v34 = vpop.permute.xlu0 %845 }
 0x115   : > { %890 = vst.msk [vmem:[#allocation2 + $0x20] sm:$0xff] %vm885_vm8, %v846_v34  ;;  %v864_v35 = vpop.permute.xlu1 %863 }
 0x116   : > { %1493 = vrot.lane.b32.xlu0 %v3619_v62, %s2358_s29  ;;  %899 = vst.msk [vmem:[#allocation2 + $0x68] sm:$0xff] %vm885_vm8, %v864_v35 }
 0x117   : > { %1585 = vrot.lane.b32.xlu1 %v2182_v49, %s2359_s6 }
 0x118   : > { %v1564_v57 = vpop.permute.xlu0 %1563  ;;  %v1624_v40 = vld [vmem:[#allocation2 + $0x10] sm:$0xff] }
 0x119   : > { %1609 = vst.msk [vmem:[#allocation2 + $0x18] sm:$0xff] %vm1605_vm15, %v1564_v57  ;;  %2240 = vmatprep.mubr.msk.bf16.mxu0 %vm1658_vm0, %v1624_v40  ;;  %v1106_v3 = vpop.permute.xlu1 %1105  ;;  %v1633_v16 = vld [vmem:[#allocation2 + $0x58] sm:$0xff] }
 0x11a   : > { %1495 = vrot.lane.b32.xlu0 %v3622_v27, %s2358_s29  ;;  %1142 = vst.msk [vmem:[#allocation2 + $0x60] sm:$0xff] %vm1129_vm9, %v1106_v3  ;;  %2257 = vmatmul.mubr.msk.bf16.gmra.mrb[4].mxu1 %vm1658_vm0, %v1633_v16 }
 0x11b   : > { %1587 = vrot.lane.b32.xlu1 %v2186_v37, %s2359_s6 }
 0x11c   : > { %v848_v63 = vpop.permute.xlu0 %847 }
 0x11d   : > { %891 = vst.msk [vmem:[#allocation2 + $0x28] sm:$0xff] %vm885_vm8, %v848_v63  ;;  %v1108_v33 = vpop.permute.xlu1 %1107 }
 0x11e   : > { %1569 = vrot.lane.b32.xlu0 %v3620_v25, %s2359_s6  ;;  %1143 = vst.msk [vmem:[#allocation2 + $0x68] sm:$0xff] %vm1129_vm9, %v1108_v33 }
 0x120   : > { %v1090_v44 = vpop.permute.xlu0 %1089  ;;  %v1625_v5 = vld [vmem:[#allocation2 + $0x18] sm:$0xff] }
 0x121   : > { %1134 = vst.msk [vmem:[#allocation2 + $0x20] sm:$0xff] %vm1129_vm9, %v1090_v44  ;;  %2241 = vmatmul.mubr.msk.bf16.gmra.mrb[4].mxu0 %vm1658_vm0, %v1625_v5  ;;  %v1176_v20 = vpop.permute.xlu1 %1175 }
 0x122   : > { %1571 = vrot.lane.b32.xlu0 %v3623_v52, %s2359_s6  ;;  %1212 = vst.msk [vmem:[#allocation2 + $0x60] sm:$0xff] %vm1199_vm10, %v1176_v20 }
 0x124   : > { %v1092_v43 = vpop.permute.xlu0 %1091 }
 0x125   : > { %1135 = vst.msk [vmem:[#allocation2 + $0x28] sm:$0xff] %vm1129_vm9, %v1092_v43  ;;  %v1178_v53 = vpop.permute.xlu1 %1177  ;;  %v3435_v43 = vld [vmem:[%s3587_s2] ss:$0 sm:$0xff] }
 0x126   : > { %1213 = vst.msk [vmem:[#allocation2 + $0x68] sm:$0xff] %vm1199_vm10, %v1178_v53  ;;  %v3440_v53 = vld [vmem:[%s3588_s3] ss:$0 sm:$0xff] }
 0x128   : > { %v1160_v2 = vpop.permute.xlu0 %1159 }
 0x129   : > { %1204 = vst.msk [vmem:[#allocation2 + $0x20] sm:$0xff] %vm1199_vm10, %v1160_v2  ;;  %v1268_v32 = vpop.permute.xlu1 %1267 }
 0x12a   : > { %1304 = vst.msk [vmem:[#allocation2 + $0x60] sm:$0xff] %vm1291_vm11, %v1268_v32 }
 0x12c   : > { %v1162_v18 = vpop.permute.xlu0 %1161 }
 0x12d   : > { %1205 = vst.msk [vmem:[#allocation2 + $0x28] sm:$0xff] %vm1199_vm10, %v1162_v18  ;;  %v1270_v19 = vpop.permute.xlu1 %1269 }
 0x12e   : > { %1305 = vst.msk [vmem:[#allocation2 + $0x68] sm:$0xff] %vm1291_vm11, %v1270_v19 }
 0x130   : > { %v1252_v42 = vpop.permute.xlu0 %1251 }
 0x131   : > { %1296 = vst.msk [vmem:[#allocation2 + $0x20] sm:$0xff] %vm1291_vm11, %v1252_v42  ;;  %v1344_v47 = vpop.permute.xlu1 %1343 }
 0x132   : > { %1380 = vst.msk [vmem:[#allocation2 + $0x60] sm:$0xff] %vm1367_vm12, %v1344_v47 }
 0x134   : > { %v1254_v59 = vpop.permute.xlu0 %1253 }
 0x135   : > { %1297 = vst.msk [vmem:[#allocation2 + $0x28] sm:$0xff] %vm1291_vm11, %v1254_v59  ;;  %v1346_v55 = vpop.permute.xlu1 %1345 }
 0x136   : > { %1381 = vst.msk [vmem:[#allocation2 + $0x68] sm:$0xff] %vm1367_vm12, %v1346_v55 }
 0x138   : > { %v1328_v12 = vpop.permute.xlu0 %1327 }
 0x139   : > { %1372 = vst.msk [vmem:[#allocation2 + $0x20] sm:$0xff] %vm1367_vm12, %v1328_v12  ;;  %v1414_v31 = vpop.permute.xlu1 %1413 }
 0x13a   : > { %1450 = vst.msk [vmem:[#allocation2 + $0x60] sm:$0xff] %vm1437_vm13, %v1414_v31 }
 0x13c   : > { %v1330_v9 = vpop.permute.xlu0 %1329 }
 0x13d   : > { %1373 = vst.msk [vmem:[#allocation2 + $0x28] sm:$0xff] %vm1367_vm12, %v1330_v9  ;;  %v1416_v61 = vpop.permute.xlu1 %1415 }
 0x13e   : > { %1451 = vst.msk [vmem:[#allocation2 + $0x68] sm:$0xff] %vm1437_vm13, %v1416_v61 }
 0x140   : > { %v1398_v49 = vpop.permute.xlu0 %1397 }
 0x141   : > { %1442 = vst.msk [vmem:[#allocation2 + $0x20] sm:$0xff] %vm1437_vm13, %v1398_v49  ;;  %v1506_v14 = vpop.permute.xlu1 %1505 }
 0x142   : > { %1542 = vst.msk [vmem:[#allocation2 + $0x60] sm:$0xff] %vm1529_vm14, %v1506_v14 }
 0x144   : > { %v1400_v17 = vpop.permute.xlu0 %1399 }
 0x145   : > { %1443 = vst.msk [vmem:[#allocation2 + $0x28] sm:$0xff] %vm1437_vm13, %v1400_v17  ;;  %v1508_v48 = vpop.permute.xlu1 %1507 }
 0x146   : > { %1543 = vst.msk [vmem:[#allocation2 + $0x68] sm:$0xff] %vm1529_vm14, %v1508_v48 }
 0x148   : > { %v1490_v41 = vpop.permute.xlu0 %1489 }
 0x149   : > { %1534 = vst.msk [vmem:[#allocation2 + $0x20] sm:$0xff] %vm1529_vm14, %v1490_v41  ;;  %v1582_v26 = vpop.permute.xlu1 %1581 }
 0x14a   : > { %1618 = vst.msk [vmem:[#allocation2 + $0x60] sm:$0xff] %vm1605_vm15, %v1582_v26 }
 0x14c   : > { %v1492_v39 = vpop.permute.xlu0 %1491 }
 0x14d   : > { %1535 = vst.msk [vmem:[#allocation2 + $0x28] sm:$0xff] %vm1529_vm14, %v1492_v39  ;;  %v866_v28 = vpop.permute.xlu1 %865 }
 0x14e   : > { %900 = vst.msk [vmem:[#allocation2 + $0x70] sm:$0xff] %vm885_vm8, %v866_v28 }
 0x150   : > { %v1566_v62 = vpop.permute.xlu0 %1565 }
 0x151   : > { %1610 = vst.msk [vmem:[#allocation2 + $0x20] sm:$0xff] %vm1605_vm15, %v1566_v62  ;;  %v1584_v56 = vpop.permute.xlu1 %1583  ;;  %v1634_v30 = vld [vmem:[#allocation2 + $0x60] sm:$0xff] }
 0x152   : > { %1619 = vst.msk [vmem:[#allocation2 + $0x68] sm:$0xff] %vm1605_vm15, %v1584_v56  ;;  %2260 = vmatprep.mubr.msk.bf16.mxu1 %vm1658_vm0, %v1634_v30 }
 0x154   : > { %v850_v21 = vpop.permute.xlu0 %849 }
 0x155   : > { %892 = vst.msk [vmem:[#allocation2 + $0x30] sm:$0xff] %vm885_vm8, %v850_v21  ;;  %v868_v10 = vpop.permute.xlu1 %867 }
 0x156   : > { %901 = vst.msk [vmem:[#allocation2 + $0x78] sm:$0xff] %vm885_vm8, %v868_v10 }
 0x158   : > { %v1568_v29 = vpop.permute.xlu0 %1567  ;;  %v1626_v6 = vld [vmem:[#allocation2 + $0x20] sm:$0xff] }
 0x159   : > { %1611 = vst.msk [vmem:[#allocation2 + $0x28] sm:$0xff] %vm1605_vm15, %v1568_v29  ;;  %2244 = vmatprep.mubr.msk.bf16.mxu0 %vm1658_vm0, %v1626_v6  ;;  %v1110_v24 = vpop.permute.xlu1 %1109  ;;  %v1635_v4 = vld [vmem:[#allocation2 + $0x68] sm:$0xff] }
 0x15a   : > { %1144 = vst.msk [vmem:[#allocation2 + $0x70] sm:$0xff] %vm1129_vm9, %v1110_v24  ;;  %2261 = vmatmul.mubr.msk.bf16.gmra.mrb[8].mxu1 %vm1658_vm0, %v1635_v4 }
 0x15c   : > { %v852_v0 = vpop.permute.xlu0 %851 }
 0x15d   : > { %893 = vst.msk [vmem:[#allocation2 + $0x38] sm:$0xff] %vm885_vm8, %v852_v0  ;;  %v1112_v1 = vpop.permute.xlu1 %1111 }
 0x15e   : > { %1145 = vst.msk [vmem:[#allocation2 + $0x78] sm:$0xff] %vm1129_vm9, %v1112_v1 }
 0x160   : > { %v1094_v36 = vpop.permute.xlu0 %1093  ;;  %v1627_v25 = vld [vmem:[#allocation2 + $0x28] sm:$0xff] }
 0x161   : > { %1136 = vst.msk [vmem:[#allocation2 + $0x30] sm:$0xff] %vm1129_vm9, %v1094_v36  ;;  %2245 = vmatmul.mubr.msk.bf16.gmra.mrb[8].mxu0 %vm1658_vm0, %v1627_v25  ;;  %v1180_v8 = vpop.permute.xlu1 %1179 }
 0x162   : > { %1214 = vst.msk [vmem:[#allocation2 + $0x70] sm:$0xff] %vm1199_vm10, %v1180_v8 }
 0x164   : > { %v1096_v38 = vpop.permute.xlu0 %1095 }
 0x165   : > { %1137 = vst.msk [vmem:[#allocation2 + $0x38] sm:$0xff] %vm1129_vm9, %v1096_v38  ;;  %v1182_v54 = vpop.permute.xlu1 %1181 }
 0x166   : > { %1215 = vst.msk [vmem:[#allocation2 + $0x78] sm:$0xff] %vm1199_vm10, %v1182_v54 }
 0x168   : > { %v1164_v22 = vpop.permute.xlu0 %1163 }
 0x169   : > { %1206 = vst.msk [vmem:[#allocation2 + $0x30] sm:$0xff] %vm1199_vm10, %v1164_v22  ;;  %v1272_v46 = vpop.permute.xlu1 %1271 }
 0x16a   : > { %1306 = vst.msk [vmem:[#allocation2 + $0x70] sm:$0xff] %vm1291_vm11, %v1272_v46 }
 0x16c   : > { %v1166_v60 = vpop.permute.xlu0 %1165 }
 0x16d   : > { %1207 = vst.msk [vmem:[#allocation2 + $0x38] sm:$0xff] %vm1199_vm10, %v1166_v60  ;;  %v1274_v50 = vpop.permute.xlu1 %1273 }
 0x16e   : > { %1307 = vst.msk [vmem:[#allocation2 + $0x78] sm:$0xff] %vm1291_vm11, %v1274_v50 }
 0x170   : > { %v1256_v13 = vpop.permute.xlu0 %1255 }
 0x171   : > { %1298 = vst.msk [vmem:[#allocation2 + $0x30] sm:$0xff] %vm1291_vm11, %v1256_v13  ;;  %v1348_v45 = vpop.permute.xlu1 %1347 }
 0x172   : > { %1382 = vst.msk [vmem:[#allocation2 + $0x70] sm:$0xff] %vm1367_vm12, %v1348_v45 }
 0x174   : > { %v1258_v51 = vpop.permute.xlu0 %1257 }
 0x175   : > { %1299 = vst.msk [vmem:[#allocation2 + $0x38] sm:$0xff] %vm1291_vm11, %v1258_v51  ;;  %v1350_v11 = vpop.permute.xlu1 %1349 }
 0x176   : > { %1383 = vst.msk [vmem:[#allocation2 + $0x78] sm:$0xff] %vm1367_vm12, %v1350_v11 }
 0x178   : > { %v1332_v15 = vpop.permute.xlu0 %1331 }
 0x179   : > { %1374 = vst.msk [vmem:[#allocation2 + $0x30] sm:$0xff] %vm1367_vm12, %v1332_v15  ;;  %v1418_v58 = vpop.permute.xlu1 %1417 }
 0x17a   : > { %1452 = vst.msk [vmem:[#allocation2 + $0x70] sm:$0xff] %vm1437_vm13, %v1418_v58 }
 0x17c   : > { %v1334_v34 = vpop.permute.xlu0 %1333 }
 0x17d   : > { %1375 = vst.msk [vmem:[#allocation2 + $0x38] sm:$0xff] %vm1367_vm12, %v1334_v34  ;;  %v1420_v23 = vpop.permute.xlu1 %1419 }
 0x17e   : > { %1453 = vst.msk [vmem:[#allocation2 + $0x78] sm:$0xff] %vm1437_vm13, %v1420_v23 }
 0x180   : > { %v1402_v7 = vpop.permute.xlu0 %1401 }
 0x181   : > { %1444 = vst.msk [vmem:[#allocation2 + $0x30] sm:$0xff] %vm1437_vm13, %v1402_v7  ;;  %v1510_v35 = vpop.permute.xlu1 %1509 }
 0x182   : > { %1544 = vst.msk [vmem:[#allocation2 + $0x70] sm:$0xff] %vm1529_vm14, %v1510_v35 }
 0x184   : > { %v1404_v37 = vpop.permute.xlu0 %1403 }
 0x185   : > { %1445 = vst.msk [vmem:[#allocation2 + $0x38] sm:$0xff] %vm1437_vm13, %v1404_v37  ;;  %v1512_v57 = vpop.permute.xlu1 %1511 }
 0x186   : > { %1545 = vst.msk [vmem:[#allocation2 + $0x78] sm:$0xff] %vm1529_vm14, %v1512_v57 }
 0x188   : > { %v1494_v40 = vpop.permute.xlu0 %1493 }
 0x189   : > { %1536 = vst.msk [vmem:[#allocation2 + $0x30] sm:$0xff] %vm1529_vm14, %v1494_v40  ;;  %v1586_v3 = vpop.permute.xlu1 %1585 }
 0x18a   : > { %1620 = vst.msk [vmem:[#allocation2 + $0x70] sm:$0xff] %vm1605_vm15, %v1586_v3 }
 0x18c   : > { %v1496_v16 = vpop.permute.xlu0 %1495 }
 0x18d   : > { %1537 = vst.msk [vmem:[#allocation2 + $0x38] sm:$0xff] %vm1529_vm14, %v1496_v16  ;;  %v1588_v27 = vpop.permute.xlu1 %1587 }
 0x18e   : > { %1621 = vst.msk [vmem:[#allocation2 + $0x78] sm:$0xff] %vm1605_vm15, %v1588_v27 }
 0x190   : > { %v1570_v63 = vpop.permute.xlu0 %1569 }
 0x191   : > { %1612 = vst.msk [vmem:[#allocation2 + $0x30] sm:$0xff] %vm1605_vm15, %v1570_v63  ;;  %v1636_v33 = vld [vmem:[#allocation2 + $0x70] sm:$0xff] }
 0x192   : > { %2264 = vmatprep.mubr.msk.bf16.mxu1 %vm1658_vm0, %v1636_v33 }
 0x194   : > { %v1572_v44 = vpop.permute.xlu0 %1571 }
 0x195   : > { %1613 = vst.msk [vmem:[#allocation2 + $0x38] sm:$0xff] %vm1605_vm15, %v1572_v44  ;;  %v1637_v5 = vld [vmem:[#allocation2 + $0x78] sm:$0xff] }
 0x196   : > { %2265 = vmatmul.mubr.msk.bf16.gmra.mrb[12].mxu1 %vm1658_vm0, %v1637_v5 }
 0x198   : > { %v1628_v20 = vld [vmem:[#allocation2 + $0x30] sm:$0xff] }
 0x199   : > { %2248 = vmatprep.mubr.msk.bf16.mxu0 %vm1658_vm0, %v1628_v20 }
 0x19c   : > { %v1629_v52 = vld [vmem:[#allocation2 + $0x38] sm:$0xff] }
 0x19d   : > { %2249 = vmatmul.mubr.msk.bf16.gmra.mrb[12].mxu0 %vm1658_vm0, %v1629_v52 }
 0x1ad   : > { %v2254_v2 = vpop.f32.mrb[0].mxu1 }
 0x1ae   : > { %v1897_v32 = vmul.f32 %v2254_v2, %v3435_v43  ;;  %v1809_v18 = vpop.f32.mrb[1].mxu1 }
 0x1af   : > { %v1895_v19 = vmul.f32 %v3435_v43, %v1809_v18  ;;  %v2255_v42 = vpop.f32.mrb[2].mxu1 }
 0x1b0   : > { %v1936_v47 = vadd.f32 %v3440_v53, %v1897_v32  ;;  %v1898_v59 = vmul.f32 %v2255_v42, %v3435_v43  ;;  %v1812_v55 = vpop.f32.mrb[3].mxu1 }
 0x1b1   : > { %v1934_v12 = vadd.f32 %v3440_v53, %v1895_v19  ;;  %v1896_v31 = vmul.f32 %v3435_v43, %v1812_v55 }
 0x1b2   : > { %v1968_v9 = vmax.f32 %v1936_v47, 0.0  ;;  %v1937_v61 = vadd.f32 %v3440_v53, %v1898_v59 }
 0x1b3   : > { %v1966_v49 = vmax.f32 %v1934_v12, 0.0  ;;  %v1935_v14 = vadd.f32 %v3440_v53, %v1896_v31 }
 0x1b4   : > { %v2238_v17 = vpop.f32.mrb[0].mxu0  ;;  %2001 = vst.msk [vmem:[%s3450_s22 + $0x90] sm:$0xff] %vm1982_vm1, %v1968_v9  ;;  %v1969_v48 = vmax.f32 %v1937_v61, 0.0 }
 0x1b5   : > { %v1881_v41 = vmul.f32 %v2238_v17, %v3435_v43  ;;  %v1745_v26 = vpop.f32.mrb[1].mxu0  ;;  %1999 = vst.msk [vmem:[%s3450_s22 + $0x80] sm:$0xff] %vm1982_vm1, %v1966_v49  ;;  %v1967_v39 = vmax.f32 %v1935_v14, 0.0 }
 0x1b6   : > { %v1879_v28 = vmul.f32 %v3435_v43, %v1745_v26  ;;  %v2239_v62 = vpop.f32.mrb[2].mxu0  ;;  %2002 = vst.msk [vmem:[%s3450_s22 + $0x98] sm:$0xff] %vm1982_vm1, %v1969_v48 }
 0x1b7   : > { %v1920_v56 = vadd.f32 %v3440_v53, %v1881_v41  ;;  %v1882_v30 = vmul.f32 %v2239_v62, %v3435_v43  ;;  %v1748_v21 = vpop.f32.mrb[3].mxu0  ;;  %2000 = vst.msk [vmem:[%s3450_s22 + $0x88] sm:$0xff] %vm1982_vm1, %v1967_v39 }
 0x1b8   : > { %v1918_v10 = vadd.f32 %v3440_v53, %v1879_v28  ;;  %v1880_v29 = vmul.f32 %v3435_v43, %v1748_v21 }
 0x1b9   : > { %v1952_v6 = vmax.f32 %v1920_v56, 0.0  ;;  %v1921_v24 = vadd.f32 %v3440_v53, %v1882_v30 }
 0x1ba   : > { %v1950_v4 = vmax.f32 %v1918_v10, 0.0  ;;  %v1919_v0 = vadd.f32 %v3440_v53, %v1880_v29 }
 0x1bb   : > { %1985 = vst.msk [vmem:[%s3450_s22 + $0x10] sm:$0xff] %vm1982_vm1, %v1952_v6  ;;  %v1953_v1 = vmax.f32 %v1921_v24, 0.0 }
 0x1bc   : > { %1983 = vst.msk [vmem:[%s3450_s22] sm:$0xff] %vm1982_vm1, %v1950_v4  ;;  %v1951_v36 = vmax.f32 %v1919_v0, 0.0 }
 0x1bd   : > { %1986 = vst.msk [vmem:[%s3450_s22 + $0x18] sm:$0xff] %vm1982_vm1, %v1953_v1 }
 0x1be   : > { %1984 = vst.msk [vmem:[%s3450_s22 + $0x8] sm:$0xff] %vm1982_vm1, %v1951_v36 }
 0x1ed   : > { %v2258_v25 = vpop.f32.mrb[4].mxu1 }
 0x1ee   : > { %v1901_v8 = vmul.f32 %v2258_v25, %v3435_v43  ;;  %v1825_v38 = vpop.f32.mrb[5].mxu1 }
 0x1ef   : > { %v1899_v54 = vmul.f32 %v3435_v43, %v1825_v38  ;;  %v2259_v22 = vpop.f32.mrb[6].mxu1 }
 0x1f0   : > { %v1940_v46 = vadd.f32 %v3440_v53, %v1901_v8  ;;  %v1902_v60 = vmul.f32 %v2259_v22, %v3435_v43  ;;  %v1828_v50 = vpop.f32.mrb[7].mxu1 }
 0x1f1   : > { %v1938_v13 = vadd.f32 %v3440_v53, %v1899_v54  ;;  %v1900_v45 = vmul.f32 %v3435_v43, %v1828_v50 }
 0x1f2   : > { %v1972_v51 = vmax.f32 %v1940_v46, 0.0  ;;  %v1941_v11 = vadd.f32 %v3440_v53, %v1902_v60 }
 0x1f3   : > { %v1970_v15 = vmax.f32 %v1938_v13, 0.0  ;;  %v1939_v58 = vadd.f32 %v3440_v53, %v1900_v45 }
 0x1f4   : > { %v2242_v34 = vpop.f32.mrb[4].mxu0  ;;  %2005 = vst.msk [vmem:[%s3450_s22 + $0xb0] sm:$0xff] %vm1982_vm1, %v1972_v51  ;;  %v1973_v23 = vmax.f32 %v1941_v11, 0.0 }
 0x1f5   : > { %v1885_v7 = vmul.f32 %v2242_v34, %v3435_v43  ;;  %v1761_v35 = vpop.f32.mrb[5].mxu0  ;;  %2003 = vst.msk [vmem:[%s3450_s22 + $0xa0] sm:$0xff] %vm1982_vm1, %v1970_v15  ;;  %v1971_v37 = vmax.f32 %v1939_v58, 0.0 }
 0x1f6   : > { %v1883_v57 = vmul.f32 %v3435_v43, %v1761_v35  ;;  %v2243_v40 = vpop.f32.mrb[6].mxu0  ;;  %2006 = vst.msk [vmem:[%s3450_s22 + $0xb8] sm:$0xff] %vm1982_vm1, %v1973_v23 }
 0x1f7   : > { %v1924_v3 = vadd.f32 %v3440_v53, %v1885_v7  ;;  %v1886_v16 = vmul.f32 %v2243_v40, %v3435_v43  ;;  %v1764_v27 = vpop.f32.mrb[7].mxu0  ;;  %2004 = vst.msk [vmem:[%s3450_s22 + $0xa8] sm:$0xff] %vm1982_vm1, %v1971_v37 }
 0x1f8   : > { %v1922_v63 = vadd.f32 %v3440_v53, %v1883_v57  ;;  %v1884_v33 = vmul.f32 %v3435_v43, %v1764_v27 }
 0x1f9   : > { %v1956_v44 = vmax.f32 %v1924_v3, 0.0  ;;  %v1925_v5 = vadd.f32 %v3440_v53, %v1886_v16 }
 0x1fa   : > { %v1954_v20 = vmax.f32 %v1922_v63, 0.0  ;;  %v1923_v52 = vadd.f32 %v3440_v53, %v1884_v33 }
 0x1fb   : > { %1989 = vst.msk [vmem:[%s3450_s22 + $0x30] sm:$0xff] %vm1982_vm1, %v1956_v44  ;;  %v1957_v2 = vmax.f32 %v1925_v5, 0.0 }
 0x1fc   : > { %1987 = vst.msk [vmem:[%s3450_s22 + $0x20] sm:$0xff] %vm1982_vm1, %v1954_v20  ;;  %v1955_v32 = vmax.f32 %v1923_v52, 0.0 }
 0x1fd   : > { %1990 = vst.msk [vmem:[%s3450_s22 + $0x38] sm:$0xff] %vm1982_vm1, %v1957_v2 }
 0x1fe   : > { %1988 = vst.msk [vmem:[%s3450_s22 + $0x28] sm:$0xff] %vm1982_vm1, %v1955_v32 }
 0x22d   : > { %v2262_v18 = vpop.f32.mrb[8].mxu1 }
 0x22e   : > { %v1905_v19 = vmul.f32 %v2262_v18, %v3435_v43  ;;  %v1841_v42 = vpop.f32.mrb[9].mxu1 }
 0x22f   : > { %v1903_v47 = vmul.f32 %v3435_v43, %v1841_v42  ;;  %v2263_v59 = vpop.f32.mrb[10].mxu1 }
 0x230   : > { %v1944_v55 = vadd.f32 %v3440_v53, %v1905_v19  ;;  %v1906_v12 = vmul.f32 %v2263_v59, %v3435_v43  ;;  %v1844_v31 = vpop.f32.mrb[11].mxu1 }
 0x231   : > { %v1942_v9 = vadd.f32 %v3440_v53, %v1903_v47  ;;  %v1904_v61 = vmul.f32 %v3435_v43, %v1844_v31 }
 0x232   : > { %v1976_v49 = vmax.f32 %v1944_v55, 0.0  ;;  %v1945_v14 = vadd.f32 %v3440_v53, %v1906_v12 }
 0x233   : > { %v1974_v17 = vmax.f32 %v1942_v9, 0.0  ;;  %v1943_v48 = vadd.f32 %v3440_v53, %v1904_v61 }
 0x234   : > { %v2246_v41 = vpop.f32.mrb[8].mxu0  ;;  %2009 = vst.msk [vmem:[%s3450_s22 + $0xd0] sm:$0xff] %vm1982_vm1, %v1976_v49  ;;  %v1977_v26 = vmax.f32 %v1945_v14, 0.0 }
 0x235   : > { %v1889_v39 = vmul.f32 %v2246_v41, %v3435_v43  ;;  %v1777_v28 = vpop.f32.mrb[9].mxu0  ;;  %2007 = vst.msk [vmem:[%s3450_s22 + $0xc0] sm:$0xff] %vm1982_vm1, %v1974_v17  ;;  %v1975_v62 = vmax.f32 %v1943_v48, 0.0 }
 0x236   : > { %v1887_v56 = vmul.f32 %v3435_v43, %v1777_v28  ;;  %v2247_v30 = vpop.f32.mrb[10].mxu0  ;;  %2010 = vst.msk [vmem:[%s3450_s22 + $0xd8] sm:$0xff] %vm1982_vm1, %v1977_v26 }
 0x237   : > { %v1928_v21 = vadd.f32 %v3440_v53, %v1889_v39  ;;  %v1890_v10 = vmul.f32 %v2247_v30, %v3435_v43  ;;  %v1780_v29 = vpop.f32.mrb[11].mxu0  ;;  %2008 = vst.msk [vmem:[%s3450_s22 + $0xc8] sm:$0xff] %vm1982_vm1, %v1975_v62 }
 0x238   : > { %v1926_v6 = vadd.f32 %v3440_v53, %v1887_v56  ;;  %v1888_v24 = vmul.f32 %v3435_v43, %v1780_v29 }
 0x239   : > { %v1960_v4 = vmax.f32 %v1928_v21, 0.0  ;;  %v1929_v0 = vadd.f32 %v3440_v53, %v1890_v10 }
 0x23a   : > { %v1958_v1 = vmax.f32 %v1926_v6, 0.0  ;;  %v1927_v36 = vadd.f32 %v3440_v53, %v1888_v24 }
 0x23b   : > { %1993 = vst.msk [vmem:[%s3450_s22 + $0x50] sm:$0xff] %vm1982_vm1, %v1960_v4  ;;  %v1961_v25 = vmax.f32 %v1929_v0, 0.0 }
 0x23c   : > { %1991 = vst.msk [vmem:[%s3450_s22 + $0x40] sm:$0xff] %vm1982_vm1, %v1958_v1  ;;  %v1959_v8 = vmax.f32 %v1927_v36, 0.0 }
 0x23d   : > { %1994 = vst.msk [vmem:[%s3450_s22 + $0x58] sm:$0xff] %vm1982_vm1, %v1961_v25 }
 0x23e   : > { %1992 = vst.msk [vmem:[%s3450_s22 + $0x48] sm:$0xff] %vm1982_vm1, %v1959_v8 }
 0x269   : > { %v2266_v38 = vpop.f32.mrb[12].mxu1 }
 0x26a   : > { %v1909_v54 = vmul.f32 %v2266_v38, %v3435_v43  ;;  %v1857_v22 = vpop.f32.mrb[13].mxu1 }
 0x26b   : > { %v1907_v46 = vmul.f32 %v3435_v43, %v1857_v22  ;;  %v2267_v60 = vpop.f32.mrb[14].mxu1 }
 0x26c   : > { %v1948_v50 = vadd.f32 %v3440_v53, %v1909_v54  ;;  %v1910_v13 = vmul.f32 %v2267_v60, %v3435_v43  ;;  %v1860_v45 = vpop.f32.mrb[15].mxu1 }
 0x26d   : > { %v1946_v51 = vadd.f32 %v3440_v53, %v1907_v46  ;;  %v1908_v11 = vmul.f32 %v3435_v43, %v1860_v45 }
 0x26e   : > { %v1980_v15 = vmax.f32 %v1948_v50, 0.0  ;;  %v1949_v58 = vadd.f32 %v3440_v53, %v1910_v13 }
 0x26f   : > { %v1978_v34 = vmax.f32 %v1946_v51, 0.0  ;;  %v1947_v23 = vadd.f32 %v3440_v53, %v1908_v11 }
 0x270   : > { %v2250_v7 = vpop.f32.mrb[12].mxu0  ;;  %2013 = vst.msk [vmem:[%s3450_s22 + $0xf0] sm:$0xff] %vm1982_vm1, %v1980_v15  ;;  %v1981_v35 = vmax.f32 %v1949_v58, 0.0 }
 0x271   : > { %v1893_v37 = vmul.f32 %v2250_v7, %v3435_v43  ;;  %v1793_v57 = vpop.f32.mrb[13].mxu0  ;;  %2011 = vst.msk [vmem:[%s3450_s22 + $0xe0] sm:$0xff] %vm1982_vm1, %v1978_v34  ;;  %v1979_v40 = vmax.f32 %v1947_v23, 0.0 }
 0x272   : > { %v1891_v3 = vmul.f32 %v3435_v43, %v1793_v57  ;;  %v2251_v16 = vpop.f32.mrb[14].mxu0  ;;  %2014 = vst.msk [vmem:[%s3450_s22 + $0xf8] sm:$0xff] %vm1982_vm1, %v1981_v35 }
 0x273   : > { %v1932_v27 = vadd.f32 %v3440_v53, %v1893_v37  ;;  %v1894_v63 = vmul.f32 %v2251_v16, %v3435_v43  ;;  %v1796_v33 = vpop.f32.mrb[15].mxu0  ;;  %2012 = vst.msk [vmem:[%s3450_s22 + $0xe8] sm:$0xff] %vm1982_vm1, %v1979_v40 }
 0x274   : > { %v1930_v44 = vadd.f32 %v3440_v53, %v1891_v3  ;;  %v1892_v5 = vmul.f32 %v3435_v43, %v1796_v33 }
 0x275   : > { %v1964_v20 = vmax.f32 %v1932_v27, 0.0  ;;  %v1933_v52 = vadd.f32 %v3440_v53, %v1894_v63 }
 0x276   : > { %v1962_v2 = vmax.f32 %v1930_v44, 0.0  ;;  %v1931_v32 = vadd.f32 %v3440_v53, %v1892_v5 }
 0x277   : > { %1997 = vst.msk [vmem:[%s3450_s22 + $0x70] sm:$0xff] %vm1982_vm1, %v1964_v20  ;;  %v1965_v18 = vmax.f32 %v1933_v52, 0.0 }
 0x278   : > { %1995 = vst.msk [vmem:[%s3450_s22 + $0x60] sm:$0xff] %vm1982_vm1, %v1962_v2  ;;  %v1963_v19 = vmax.f32 %v1931_v32, 0.0 }
 0x279   : > { %1998 = vst.msk [vmem:[%s3450_s22 + $0x78] sm:$0xff] %vm1982_vm1, %v1965_v18 }
 0x27a   : > { %1996 = vst.msk [vmem:[%s3450_s22 + $0x68] sm:$0xff] %vm1982_vm1, %v1963_v19 }
 0x27b PF: > { %s14_s17 = sadd.s32 1, %s2350_s17   ;;  %s3624_s15 = smov %s2346_s16 }
 0x27c   : > { %p11_p5 = scmp.ge.s32.totalorder %s14_s17, 4   ;;  %s3625_s16 = smov %s3627_s18 }
 0x27e   :  { %13 = sbr.rel (!%p11_p5) target bundleno = 2 (0x2), region = 66 }

// kernel: upconv_block.2
= control target key start
LH: loop header
LB: loop body
LE: loop exit
PB: predicated region body
PF: predicated region fallthrough
CT: control target
= control target key end

     0   :  { %s2268_s9 = smov 0   ;;  %s2270_s10 = smov 0   ;;  %s3197_s0 = inlined_call_operand.vmem [shape: bf16[2,1,18,18,4], index: 0, kind: input, shape index: {}]   ;;  %s3198_s1 = inlined_call_operand.vmem [shape: bf16[36,128], index: 1, kind: input, shape index: {}]   ;;  %s3199_s2 = inlined_call_operand.vmem [shape: f32[2,1,2,128], index: 2, kind: output, shape index: {}]  }
   0x1   :  { %s2272_s11 = smov 0  }
   0x2 LB: > { %s24_s12 = sadd.s32 1, %s2239_s10  ;;  %p2007_p0 = scmp.ge.s32.totalorder %s2243_s11, 1  ;;  %s2243_s11 = sphi %s2272_s11, %s12_s11   ;;  %s2239_s10 = sphi %s2270_s10, %s3205_s10   ;;  %s2235_s9 = sphi %s2268_s9, %s3204_s9  }
   0x3   : > { %p26_p1 = scmp.ge.s32.totalorder %s24_s12, 2  ;;  %p132_p2 = scmp.lt.s32.totalorder %s2243_s11, 3 }
   0x5   : > { %s3207_s12 = smov (%p26_p1, %s24_s12), 0  ;;  %p133_p3 = pnand %p2007_p0, %p132_p2 }
   0x6   : > { %p160_p4 = scmp.lt.s32.totalorder (!%p133_p3), %s2235_s9, 1  ;;  %vm327_vm0 = vcmask (!%p133_p3), 31744   ;;  %vm860_vm1 = vcmask (!%p133_p3), 1042432   ;;  %vm861_vm2 = vcmask (!%p133_p3), 1046532   ;;  %vm344_vm3 = vsmask.f32 (!%p133_p3), 3328 }
   0x7   : > { %136 = sbr.rel (%p133_p3) target bundleno = 641 (0x281), region = 28  ;;  %vm345_vm4 = vsmask.f32 (!%p133_p3), 7440  ;;  %vm2312_vm5 = vmor (!%p133_p3), %vm860_vm1, %vm861_vm2  ;;  %s2245_s17 = smov (!%p133_p3), 12   ;;  %vm1649_vm7 = vcmask (!%p133_p3), 1041408   ;;  %vm827_vm8 = vcmask (!%p133_p3), 64544  }
   0x8   : > { %s2246_s18 = smov (!%p133_p3), 20   ;;  %vm2349_vm6 = vmor (!%p133_p3), %vm344_vm3, %vm345_vm4  ;;  %s2247_s19 = smov (!%p133_p3), 8   ;;  %vm1071_vm9 = vcmask (!%p133_p3), 97344   ;;  %vm1141_vm10 = vcmask (!%p133_p3), 130144   ;;  %vm1233_vm11 = vcmask (!%p133_p3), 162944   ;;  %vm1309_vm12 = vcmask (!%p133_p3), 195744  }
   0x9   : > { %s2248_s20 = smov (!%p133_p3), 4   ;;  %s2249_s23 = smov (!%p133_p3), 16   ;;  %vm1379_vm13 = vcmask (!%p133_p3), 228544   ;;  %vm1471_vm14 = vcmask (!%p133_p3), 261344   ;;  %vm1547_vm15 = vcmask (!%p133_p3), 294144   ;;  %vm1920_vm1 = vcmask (!%p133_p3), 1040384  }
   0xa   : > { %s2250_s26 = smov (!%p133_p3), 24   ;;  %s2251_s27 = smov (!%p133_p3), 28  }
   0xb   : > { %s2252_s28 = smov (!%p133_p3), 32  }
   0xe   : > { %s3209_s9 = smov (!%p160_p4, %s2235_s9), 1 }
   0xf   : > { %s2168_s13 = smul.u32 216, %s3209_s9  ;;  %s2009_s3 = sshll.u32 %s3209_s9, 1 }
  0x10   : > { %s175_s6 = scalar_lea.vmem %s3199_s2, %s2009_s3 }
  0x11   : > { %s2292_s16 = scalar_lea.vmem %s3197_s0, %s2168_s13 }
  0x12   : > { %v2295_v0 = vld [vmem:[%s2292_s16 + $0x18] sm:$0xf]  ;;  %v2298_v1 = vld [vmem:[%s2292_s16 + $0x1c] sm:$0xf]  ;;  %v180_v2 = vld [vmem:[%s2292_s16 + $0xc] sm:$0xf] }
  0x13   : > { %v2303_v3 = vcombine.low %v2295_v0, %v2298_v1  ;;  %v396_v4 = vshrl.u32 %v2295_v0, 16  ;;  %v399_v5 = vshll.u32 %v2295_v0, 16  ;;  %v409_v6 = vshrl.u32 %v2298_v1, 16  ;;  %v181_v7 = vld [vmem:[%s2292_s16 + $0x10] sm:$0xf] }
  0x14   : > { %v2011_v8 = vcombine.low %v180_v2, %v181_v7  ;;  %v372_v9 = vshrl.u32 %v180_v2, 16  ;;  %v375_v10 = vshll.u32 %v180_v2, 16  ;;  %v381_v11 = vshll.u32 %v181_v7, 16  ;;  %v182_v12 = vld [vmem:[%s2292_s16 + $0x14] sm:$0x1] }
  0x15   : > { %1095 = vrot.lane.b32.xlu1 %v2303_v3, %s2245_s17  ;;  %v385_v14 = vshrl.u32 %v181_v7, 16  ;;  %330 = vst.msk [vmem:[#allocation2 + $0x10] sm:$0xff] %vm327_vm0, %v2303_v3  ;;  %v2043_v15 = vrot.slane %v180_v2, 9  ;;  %v872_v16 = vrot.slane %v181_v7, 5  ;;  %v875_v17 = vrot.slane %v182_v12, 5 }
  0x16   : > { %v2321_v18 = vld [vmem:[%s2292_s16] sm:$0xf]  ;;  %v374_v19 = vrot.slane %v372_v9, 4  ;;  %v377_v20 = vrot.slane %v375_v10, 5  ;;  %1093 = vrot.lane.b32.xlu0 %v2011_v8, %s2245_s17  ;;  %329 = vst.msk [vmem:[#allocation2 + $0x8] sm:$0xff] %vm327_vm0, %v2011_v8  ;;  %v2044_v45 = vrot.slane %v2295_v0, 9 }
  0x17   : > { %v2326_v21 = vld [vmem:[%s2292_s16 + $0x4] sm:$0xf]  ;;  %v179_v22 = vld [vmem:[%s2292_s16 + $0x8] sm:$0x1]  ;;  %v387_v23 = vrot.slane %v385_v14, 4  ;;  %v873_v24 = vsel %vm2312_vm5, %v2043_v15, %v872_v16  ;;  %v874_v25 = vrot.slane %v872_v16, 4 }
  0x18   : > { %v2042_v26 = vrot.slane %v2321_v18, 9  ;;  %v865_v27 = vrot.slane %v2326_v21, 5  ;;  %v868_v28 = vrot.slane %v179_v22, 5  ;;  %v348_v29 = vshrl.u32 %v2321_v18, 16  ;;  %v185_v35 = vld [vmem:[%s2292_s16 + $0x20] sm:$0x1] }
  0x19   : > { %v351_v30 = vshll.u32 %v2321_v18, 16  ;;  %v876_v31 = vsel %vm2312_vm5, %v874_v25, %v875_v17  ;;  %v357_v32 = vshll.u32 %v2326_v21, 16  ;;  %v361_v33 = vshrl.u32 %v2326_v21, 16  ;;  %v2363_v7 = vld [vmem:[%s2292_s16 + $0x24] sm:$0xf] }
  0x1a   : > { %v367_v34 = vshll.u32 %v179_v22, 16  ;;  %v2059_v36 = vcombine.low %v873_v24, %v876_v31  ;;  %v866_v37 = vsel %vm2312_vm5, %v2042_v26, %v865_v27  ;;  %v867_v38 = vrot.slane %v865_v27, 4  ;;  %v188_v25 = vld [vmem:[%s2292_s16 + $0x2c] sm:$0x1] }
  0x1b   : > { %v350_v39 = vrot.slane %v348_v29, 4  ;;  %v353_v40 = vrot.slane %v351_v30, 5  ;;  %v359_v41 = vrot.slane %v357_v32, 5  ;;  %v363_v42 = vrot.slane %v361_v33, 4 }
  0x1c   : > { %v369_v43 = vrot.slane %v367_v34, 5  ;;  %1261 = vrot.lane.b32.xlu0 %v2059_v36, %s2246_s18  ;;  %v869_v44 = vsel %vm2312_vm5, %v867_v38, %v868_v28  ;;  %v879_v46 = vrot.slane %v2298_v1, 5  ;;  %v882_v47 = vrot.slane %v185_v35, 5  ;;  %v2395_v38 = vld [vmem:[%s2292_s16 + $0x30] sm:$0xf] }
  0x1d   : > { %v2058_v48 = vcombine.low %v866_v37, %v869_v44  ;;  %v354_v49 = vor.u32 %v353_v40, %v350_v39  ;;  %v364_v50 = vor.u32 %v363_v42, %v359_v41  ;;  %v378_v51 = vor.u32 %v377_v20, %v374_v19  ;;  %v2398_v39 = vld [vmem:[%s2292_s16 + $0x34] sm:$0xf] }
  0x1e   : > { %v880_v53 = vsel %vm2312_vm5, %v2044_v45, %v879_v46  ;;  %v881_v54 = vrot.slane %v879_v46, 4  ;;  %v383_v55 = vrot.slane %v381_v11, 5  ;;  %v391_v56 = vshll.u32 %v182_v12, 16  ;;  %v2211_v45 = vld [vmem:[%s3198_s1] sm:$0xff]  }
  0x1f   : > { %1023 = vrot.lane.b32.xlu1 %v2058_v48, %s2247_s19  ;;  %v355_v57 = vrot.slane %v354_v49, 4  ;;  %v365_v58 = vrot.slane %v364_v50, 4  ;;  %v379_v59 = vrot.slane %v378_v51, 4  ;;  %v398_v60 = vrot.slane %v396_v4, 4  ;;  %2122 = vmatprep.subr.bf16.mxu0 %v2211_v45 }
  0x20   : > { %v883_v61 = vsel %vm2312_vm5, %v881_v54, %v882_v47  ;;  %v388_v62 = vor.u32 %v387_v23, %v383_v55  ;;  %v393_v63 = vrot.slane %v391_v56, 5  ;;  %v401_v2 = vrot.slane %v399_v5, 5  ;;  %v187_v5 = vld [vmem:[%s2292_s16 + $0x28] sm:$0xf]  ;;  %v2420_v54 = vld [vmem:[%s2292_s16 + $0x38] sm:$0x1]  ;;  %2123 = vmatpush3.bf16.msra.mxu0 %v2211_v45  ;;  %2160 = vmatprep.subr.bf16.mxu1 %v2211_v45 }
  0x21   : > { %v360_v8 = vsel %vm2349_vm6, %v355_v57, %v359_v41  ;;  %v370_v9 = vsel %vm2349_vm6, %v365_v58, %v369_v43  ;;  %v2369_v10 = vcombine.low %v880_v53, %v883_v61  ;;  %v384_v4 = vsel %vm2349_vm6, %v379_v59, %v383_v55  ;;  %v2423_v55 = vld [vmem:[%s2292_s16 + $0x3c] sm:$0xf]  ;;  %v2212_v61 = vld [vmem:[%s3198_s1 + $0x8] sm:$0xff]   ;;  %2163 = vmatpush3.bf16.msra.mxu1 %v2211_v45 }
  0x22   : > { %v2026_v11 = vcombine.low %v360_v8, %v370_v9  ;;  %v389_v12 = vrot.slane %v388_v62, 4  ;;  %v402_v14 = vor.u32 %v401_v2, %v398_v60  ;;  %v405_v0 = vshll.u32 %v2298_v1, 16  ;;  %v2432_v60 = vld [vmem:[%s2292_s16 + $0x40] sm:$0xf]  ;;  %2124 = vmatprep.subr.bf16.mxu0 %v2212_v61  ;;  %2161 = vmatprep.subr.bf16.mxu1 %v2212_v61 }
  0x23   : > { %1025 = vrot.lane.b32.xlu1 %v2059_v36, %s2247_s19  ;;  %v411_v15 = vrot.slane %v409_v6, 4  ;;  %v415_v16 = vshll.u32 %v185_v35, 16  ;;  %v2379_v17 = vcombine.low %v2363_v7, %v187_v5  ;;  %v420_v19 = vshrl.u32 %v2363_v7, 16 }
  0x24   : > { %779 = vrot.lane.b32.xlu0 %v2026_v11, %s2248_s20  ;;  %v394_v20 = vsel %vm2349_vm6, %v389_v12, %v393_v63  ;;  %v403_v22 = vrot.slane %v402_v14, 4  ;;  %v407_v23 = vrot.slane %v405_v0, 5  ;;  %v423_v24 = vshll.u32 %v2363_v7, 16  ;;  %2125 = vmatpush3.bf16.msra.mxu0 %v2212_v61 }
  0x25   : > { %v2027_v26 = vcombine.low %v384_v4, %v394_v20  ;;  %v433_v1 = vshrl.u32 %v187_v5, 16  ;;  %331 = vst.msk [vmem:[#allocation2 + $0x18] sm:$0xff] %vm327_vm0, %v2379_v17  ;;  %v422_v6 = vrot.slane %v420_v19, 4  ;;  %v417_v28 = vrot.slane %v415_v16, 5  ;;  %2164 = vmatpush3.bf16.msra.mxu1 %v2212_v61 }
  0x26   : > { %v412_v27 = vor.u32 %v411_v15, %v407_v23  ;;  %v425_v29 = vrot.slane %v423_v24, 5  ;;  %v429_v30 = vshll.u32 %v187_v5, 16  ;;  %v439_v32 = vshll.u32 %v188_v25, 16 }
  0x27   : > { %1263 = vrot.lane.b32.xlu1 %v2369_v10, %s2246_s18  ;;  %v435_v31 = vrot.slane %v433_v1, 4  ;;  %v886_v33 = vrot.slane %v187_v5, 5  ;;  %v408_v34 = vsel %vm2349_vm6, %v403_v22, %v407_v23  ;;  %v2402_v40 = vcombine.low %v2395_v38, %v2398_v39  ;;  %v2460_v5 = vld [vmem:[%s2292_s16 + $0x44] sm:$0x1]  ;;  %v2466_v23 = vld [vmem:[%s2292_s16 + $0x48] sm:$0xf] }
  0x28   : > { %781 = vrot.lane.b32.xlu0 %v2027_v26, %s2248_s20  ;;  %v413_v35 = vrot.slane %v412_v27, 4  ;;  %v426_v36 = vor.u32 %v425_v29, %v422_v6  ;;  %v431_v37 = vrot.slane %v429_v30, 5  ;;  %v441_v44 = vrot.slane %v439_v32, 5 }
  0x29   : > { %v2045_v47 = vrot.slane %v2363_v7, 9  ;;  %v888_v48 = vrot.slane %v886_v33, 4  ;;  %v889_v49 = vrot.slane %v188_v25, 5  ;;  %332 = vst.msk [vmem:[#allocation2 + $0x20] sm:$0xff] %vm327_vm0, %v2402_v40  ;;  %v444_v51 = vshrl.u32 %v2395_v38, 16 }
  0x2a   : > { %v418_v41 = vsel %vm2349_vm6, %v413_v35, %v417_v28  ;;  %v427_v42 = vrot.slane %v426_v36, 4  ;;  %v436_v43 = vor.u32 %v435_v31, %v431_v37  ;;  %v447_v53 = vshll.u32 %v2395_v38, 16  ;;  %v2480_v28 = vld [vmem:[%s2292_s16 + $0x4c] sm:$0xf] }
  0x2b   : > { %v2409_v46 = vcombine.low %v408_v34, %v418_v41  ;;  %v457_v58 = vshrl.u32 %v2398_v39, 16  ;;  %v453_v59 = vshll.u32 %v2398_v39, 16  ;;  %v887_v62 = vsel %vm2312_vm5, %v2045_v47, %v886_v33  ;;  %v2490_v33 = vld [vmem:[%s2292_s16 + $0x50] sm:$0x1] }
  0x2c   : > { %1185 = vrot.lane.b32.xlu0 %v2027_v26, %s2249_s23  ;;  %v437_v50 = vrot.slane %v436_v43, 4  ;;  %v432_v56 = vsel %vm2349_vm6, %v427_v42, %v431_v37  ;;  %v890_v63 = vsel %vm2312_vm5, %v888_v48, %v889_v49  ;;  %v446_v2 = vrot.slane %v444_v51, 4 }
  0x2d   : > { %1187 = vrot.lane.b32.xlu1 %v2409_v46, %s2249_s23  ;;  %v449_v7 = vrot.slane %v447_v53, 5  ;;  %v2445_v8 = vcombine.low %v2423_v55, %v2432_v60  ;;  %v468_v9 = vshrl.u32 %v2423_v55, 16  ;;  %v463_v11 = vshll.u32 %v2420_v54, 16  ;;  %v2509_v53 = vld [vmem:[%s2292_s16 + $0x54] sm:$0xf] }
  0x2e   : > { %v442_v57 = vsel %vm2349_vm6, %v437_v50, %v441_v44  ;;  %v471_v12 = vshll.u32 %v2423_v55, 16  ;;  %v2455_v14 = vrot.slane %v453_v59, 5  ;;  %v459_v0 = vrot.slane %v457_v58, 4  ;;  %v2514_v59 = vld [vmem:[%s2292_s16 + $0x58] sm:$0xf] }
  0x2f   : > { %v2450_v4 = vcombine.low %v432_v56, %v442_v57  ;;  %333 = vst.msk [vmem:[#allocation2 + $0x28] sm:$0xff] %vm327_vm0, %v2445_v8  ;;  %v477_v15 = vshll.u32 %v2432_v60, 16  ;;  %v2046_v16 = vrot.slane %v2395_v38, 9  ;;  %v893_v19 = vrot.slane %v2398_v39, 5 }
  0x30   : > { %1331 = vrot.lane.b32.xlu0 %v2303_v3, %s2250_s26  ;;  %v481_v3 = vshrl.u32 %v2432_v60, 16  ;;  %v470_v20 = vrot.slane %v468_v9, 4  ;;  %v473_v22 = vrot.slane %v471_v12, 5  ;;  %v2470_v24 = vcombine.low %v887_v62, %v890_v63 }
  0x31   : > { %1333 = vrot.lane.b32.xlu1 %v2379_v17, %s2250_s26  ;;  %v896_v25 = vrot.slane %v2420_v54, 5  ;;  %v450_v26 = vor.u32 %v449_v7, %v446_v2  ;;  %v2475_v1 = vrot.slane %v463_v11, 5  ;;  %v2477_v6 = vrot.slane %v477_v15, 5 }
  0x32   : > { %v483_v27 = vrot.slane %v481_v3, 4  ;;  %v460_v29 = vor.u32 %v459_v0, %v2455_v14  ;;  %v487_v30 = vshll.u32 %v2460_v5, 16  ;;  %v2486_v31 = vcombine.low %v2466_v23, %v2480_v28 }
  0x33   : > { %v492_v32 = vshrl.u32 %v2466_v23, 16  ;;  %v2494_v34 = vsel %vm2312_vm5, %v2046_v16, %v893_v19  ;;  %v895_v35 = vrot.slane %v893_v19, 4  ;;  %v474_v36 = vor.u32 %v473_v22, %v470_v20  ;;  %v2544_v22 = vld [vmem:[%s2292_s16 + $0x5c] sm:$0x1] }
  0x34   : > { %1423 = vrot.lane.b32.xlu0 %v2409_v46, %s2251_s27  ;;  %v495_v37 = vshll.u32 %v2466_v23, 16  ;;  %v900_v38 = vrot.slane %v2432_v60, 5  ;;  %v505_v39 = vshrl.u32 %v2480_v28, 16  ;;  %334 = vst.msk [vmem:[#allocation2 + $0x30] sm:$0xff] %vm327_vm0, %v2486_v31  ;;  %v501_v42 = vshll.u32 %v2480_v28, 16 }
  0x35   : > { %1425 = vrot.lane.b32.xlu1 %v2450_v4, %s2251_s27  ;;  %v494_v41 = vrot.slane %v492_v32, 4  ;;  %v451_v43 = vrot.slane %v450_v26, 4  ;;  %v484_v44 = vor.u32 %v483_v27, %v2477_v6  ;;  %v511_v47 = vshll.u32 %v2490_v33, 16  ;;  %v2567_v32 = vld [vmem:[%s2292_s16 + $0x64] sm:$0xf] }
  0x36   : > { %v497_v45 = vrot.slane %v495_v37, 5  ;;  %v461_v48 = vrot.slane %v460_v29, 4  ;;  %v489_v49 = vrot.slane %v487_v30, 5  ;;  %v503_v50 = vrot.slane %v501_v42, 5 }
  0x37   : > { %v507_v51 = vrot.slane %v505_v39, 4  ;;  %v475_v54 = vrot.slane %v474_v36, 4  ;;  %v2047_v56 = vrot.slane %v2423_v55, 9  ;;  %v903_v57 = vrot.slane %v2460_v5, 5 }
  0x38   : > { %1499 = vrot.lane.b32.xlu0 %v2369_v10, %s2252_s28  ;;  %v498_v58 = vor.u32 %v497_v45, %v494_v41  ;;  %v907_v61 = vrot.slane %v2480_v28, 5  ;;  %v2521_v62 = vcombine.low %v2509_v53, %v2514_v59  ;;  %v485_v55 = vrot.slane %v484_v44, 4 }
  0x39   : > { %783 = vrot.lane.b32.xlu1 %v2409_v46, %s2248_s20  ;;  %v902_v46 = vrot.slane %v900_v38, 4  ;;  %v508_v60 = vor.u32 %v507_v51, %v503_v50  ;;  %v513_v63 = vrot.slane %v511_v47, 5  ;;  %v516_v2 = vshrl.u32 %v2509_v53, 16  ;;  %v2599_v47 = vld [vmem:[%s2292_s16 + $0x68] sm:$0x1] }
  0x3a   : > { %v519_v7 = vshll.u32 %v2509_v53, 16  ;;  %v499_v9 = vrot.slane %v498_v58, 4  ;;  %v2048_v12 = vrot.slane %v2466_v23, 9  ;;  %v529_v3 = vshrl.u32 %v2514_v59, 16  ;;  %335 = vst.msk [vmem:[#allocation2 + $0x38] sm:$0xff] %vm327_vm0, %v2521_v62 }
  0x3b   : > { %v509_v11 = vrot.slane %v508_v60, 4  ;;  %v897_v0 = vsel %vm2312_vm5, %v895_v35, %v896_v25  ;;  %v909_v5 = vrot.slane %v907_v61, 4  ;;  %v910_v15 = vrot.slane %v2490_v33, 5 }
  0x3c   : > { %1501 = vrot.lane.b32.xlu0 %v2470_v24, %s2252_s28  ;;  %v525_v16 = vshll.u32 %v2514_v59, 16  ;;  %v456_v19 = vsel %vm2349_vm6, %v451_v43, %v2455_v14  ;;  %v466_v20 = vsel %vm2349_vm6, %v461_v48, %v2475_v1  ;;  %v518_v23 = vrot.slane %v516_v2, 4  ;;  %v204_v48 = vld [vmem:[%s2292_s16 + $0x6c] sm:$0xf] }
  0x3d   : > { %785 = vrot.lane.b32.xlu1 %v2450_v4, %s2248_s20  ;;  %v521_v25 = vrot.slane %v519_v7, 5  ;;  %v490_v26 = vsel %vm2349_vm6, %v485_v55, %v489_v49  ;;  %v901_v14 = vsel %vm2312_vm5, %v2047_v56, %v900_v38  ;;  %v904_v1 = vsel %vm2312_vm5, %v902_v46, %v903_v57  ;;  %v206_v55 = vld [vmem:[%s2292_s16 + $0x74] sm:$0x1] }
  0x3e   : > { %v504_v27 = vsel %vm2349_vm6, %v499_v9, %v503_v50  ;;  %v514_v28 = vsel %vm2349_vm6, %v509_v11, %v513_v63  ;;  %v908_v29 = vsel %vm2312_vm5, %v2048_v12, %v907_v61  ;;  %v531_v30 = vrot.slane %v529_v3, 4 }
  0x3f   : > { %v911_v33 = vsel %vm2312_vm5, %v909_v5, %v910_v15  ;;  %v2571_v35 = vrot.slane %v525_v16, 5  ;;  %v535_v36 = vshll.u32 %v2544_v22, 16  ;;  %v522_v38 = vor.u32 %v521_v25, %v518_v23 }
  0x40   : > { %1027 = vrot.lane.b32.xlu0 %v2369_v10, %s2247_s19  ;;  %v480_v10 = vsel %vm2349_vm6, %v475_v54, %v2477_v6  ;;  %v2564_v6 = vld [vmem:[%s2292_s16 + $0x60] sm:$0xf]  ;;  %v2582_v39 = vcombine.low %v456_v19, %v466_v20  ;;  %v2585_v41 = vcombine.low %v2494_v34, %v897_v0  ;;  %v2587_v42 = vcombine.low %v901_v14, %v904_v1  ;;  %v205_v54 = vld [vmem:[%s2292_s16 + $0x70] sm:$0xf] }
  0x41   : > { %1029 = vrot.lane.b32.xlu1 %v2470_v24, %s2247_s19  ;;  %v2576_v37 = vcombine.low %v2564_v6, %v2567_v32  ;;  %v2591_v43 = vcombine.low %v480_v10, %v490_v26  ;;  %v2593_v44 = vcombine.low %v504_v27, %v514_v28  ;;  %v2049_v45 = vrot.slane %v2509_v53, 9 }
  0x42   : > { %v532_v34 = vor.u32 %v531_v30, %v2571_v35  ;;  %v2603_v49 = vrot.slane %v535_v36, 5  ;;  %v914_v50 = vrot.slane %v2514_v59, 5  ;;  %v917_v51 = vrot.slane %v2544_v22, 5  ;;  %v208_v36 = vld [vmem:[%s2292_s16 + $0x7c] sm:$0xf] }
  0x43   : > { %336 = vst.msk [vmem:[#allocation2 + $0x40] sm:$0xff] %vm327_vm0, %v2576_v37  ;;  %v2610_v56 = vrot.slane %v522_v38, 4  ;;  %v2050_v53 = vrot.slane %v2564_v6, 9  ;;  %v921_v57 = vrot.slane %v2567_v32, 5  ;;  %v924_v58 = vrot.slane %v2599_v47, 5 }
  0x44   : > { %1097 = vrot.lane.b32.xlu0 %v2379_v17, %s2245_s17  ;;  %v2595_v17 = vcombine.low %v908_v29, %v911_v33  ;;  %v540_v46 = vshrl.u32 %v2564_v6, 16  ;;  %v543_v59 = vshll.u32 %v2564_v6, 16  ;;  %v2619_v60 = vcombine.low %v204_v48, %v205_v54  ;;  %v207_v29 = vld [vmem:[%s2292_s16 + $0x78] sm:$0xf] }
  0x45   : > { %1099 = vrot.lane.b32.xlu1 %v2402_v40, %s2245_s17  ;;  %v564_v61 = vshrl.u32 %v204_v48, 16  ;;  %v923_v63 = vrot.slane %v921_v57, 4  ;;  %v567_v2 = vshll.u32 %v204_v48, 16  ;;  %v577_v7 = vshrl.u32 %v205_v54, 16 }
  0x46   : > { %v533_v9 = vrot.slane %v532_v34, 4  ;;  %v2626_v11 = vsel %vm2312_vm5, %v2049_v45, %v914_v50  ;;  %337 = vst.msk [vmem:[#allocation2 + $0x48] sm:$0xff] %vm327_vm0, %v2619_v60  ;;  %v573_v3 = vshll.u32 %v205_v54, 16  ;;  %v583_v16 = vshll.u32 %v206_v55, 16 }
  0x47   : > { %v566_v12 = vrot.slane %v564_v61, 4  ;;  %v925_v0 = vsel %vm2312_vm5, %v923_v63, %v924_v58  ;;  %v569_v5 = vrot.slane %v567_v2, 5  ;;  %v579_v15 = vrot.slane %v577_v7, 4  ;;  %v211_v2 = vld [vmem:[%s2292_s16 + $0x88] sm:$0xf] }
  0x48   : > { %1189 = vrot.lane.b32.xlu0 %v2450_v4, %s2249_s23  ;;  %v922_v4 = vsel %vm2312_vm5, %v2050_v53, %v921_v57  ;;  %v916_v19 = vrot.slane %v914_v50, 4  ;;  %v553_v20 = vshrl.u32 %v2567_v32, 16  ;;  %v575_v23 = vrot.slane %v573_v3, 5  ;;  %v209_v50 = vld [vmem:[%s2292_s16 + $0x80] sm:$0x1] }
  0x49   : > { %1191 = vrot.lane.b32.xlu1 %v2582_v39, %s2249_s23  ;;  %v2637_v22 = vcombine.low %v922_v4, %v925_v0  ;;  %v2643_v25 = vrot.slane %v540_v46, 4  ;;  %v570_v10 = vor.u32 %v569_v5, %v566_v12  ;;  %v585_v26 = vrot.slane %v583_v16, 5  ;;  %v2214_v0 = vld [vmem:[%s3198_s1 + $0x10] ss:$0 sps:$4 sm:$0x33]  }
  0x4a   : > { %v580_v14 = vor.u32 %v579_v15, %v575_v23  ;;  %v2010_v1 = vcombine.low %v2321_v18, %v2326_v21  ;;  %v2051_v27 = vrot.slane %v204_v48, 9  ;;  %v928_v28 = vrot.slane %v205_v54, 5  ;;  %2166 = vmatprep.subr.msk.bf16.mxu0 %vm1649_vm7, %v2214_v0  ;;  %2167 = vmatprep.subr.msk.bf16.mxu1 %vm1649_vm7, %v2214_v0 }
  0x4b   : > { %v2650_v30 = vrot.slane %v543_v59, 5  ;;  %v549_v6 = vshll.u32 %v2567_v32, 16  ;;  %v571_v33 = vrot.slane %v570_v10, 4  ;;  %v538_v18 = vsel %vm2349_vm6, %v533_v9, %v2603_v49  ;;  %v210_v59 = vld [vmem:[%s2292_s16 + $0x84] sm:$0xf] }
  0x4c   : > { %1265 = vrot.lane.b32.xlu0 %v2470_v24, %s2246_s18  ;;  %v528_v24 = vsel %vm2349_vm6, %v2610_v56, %v2571_v35  ;;  %v931_v35 = vrot.slane %v206_v55, 5  ;;  %v581_v21 = vrot.slane %v580_v14, 4  ;;  %328 = vst.msk [vmem:[#allocation2] sm:$0xff] %vm327_vm0, %v2010_v1  ;;  %v930_v38 = vrot.slane %v928_v28, 4 }
  0x4d   : > { %1267 = vrot.lane.b32.xlu1 %v2585_v41, %s2246_s18  ;;  %v2664_v32 = vsel %vm2312_vm5, %v916_v19, %v917_v51  ;;  %v576_v45 = vsel %vm2349_vm6, %v571_v33, %v575_v23  ;;  %v2668_v48 = vcombine.low %v207_v29, %v208_v36  ;;  %v588_v34 = vshrl.u32 %v207_v29, 16 }
  0x4e   : > { %v586_v49 = vsel %vm2349_vm6, %v581_v21, %v585_v26  ;;  %v932_v54 = vsel %vm2312_vm5, %v930_v38, %v931_v35  ;;  %v591_v56 = vshll.u32 %v207_v29, 16  ;;  %v601_v53 = vshrl.u32 %v208_v36, 16 }
  0x4f   : > { %v2677_v51 = vrot.slane %v553_v20, 4  ;;  %v2679_v57 = vcombine.low %v576_v45, %v586_v49  ;;  %338 = vst.msk [vmem:[#allocation2 + $0x50] sm:$0xff] %vm327_vm0, %v2668_v48  ;;  %v590_v46 = vrot.slane %v588_v34, 4  ;;  %v597_v55 = vshll.u32 %v208_v36, 16  ;;  %v213_v34 = vld [vmem:[%s2292_s16 + $0x90] sm:$0xf] }
  0x50   : > { %1335 = vrot.lane.b32.xlu0 %v2402_v40, %s2250_s26  ;;  %v929_v40 = vsel %vm2312_vm5, %v2051_v27, %v928_v28  ;;  %v593_v61 = vrot.slane %v591_v56, 5  ;;  %v603_v4 = vrot.slane %v601_v53, 4  ;;  %v607_v63 = vshll.u32 %v209_v50, 16  ;;  %v212_v27 = vld [vmem:[%s2292_s16 + $0x8c] sm:$0x1] }
  0x51   : > { %1337 = vrot.lane.b32.xlu1 %v2445_v8, %s2250_s26  ;;  %v2681_v58 = vcombine.low %v929_v40, %v932_v54  ;;  %v2689_v7 = vcombine.low %v528_v24, %v538_v18  ;;  %v2052_v9 = vrot.slane %v207_v29, 9  ;;  %v935_v12 = vrot.slane %v208_v36, 5  ;;  %v214_v53 = vld [vmem:[%s2292_s16 + $0x94] sm:$0xf] }
  0x52   : > { %v938_v3 = vrot.slane %v209_v50, 5  ;;  %v594_v5 = vor.u32 %v593_v61, %v590_v46  ;;  %v599_v15 = vrot.slane %v597_v55, 5  ;;  %v609_v16 = vrot.slane %v607_v63, 5  ;;  %v215_v63 = vld [vmem:[%s2292_s16 + $0x98] sm:$0x1] }
  0x53   : > { %v2694_v19 = vcombine.low %v210_v59, %v211_v2  ;;  %v936_v20 = vsel %vm2312_vm5, %v2052_v9, %v935_v12  ;;  %v937_v23 = vrot.slane %v935_v12, 4  ;;  %v612_v24 = vshrl.u32 %v210_v59, 16 }
  0x54   : > { %1427 = vrot.lane.b32.xlu0 %v2582_v39, %s2251_s27  ;;  %v615_v10 = vshll.u32 %v210_v59, 16  ;;  %v595_v26 = vrot.slane %v594_v5, 4  ;;  %v604_v14 = vor.u32 %v603_v4, %v599_v15  ;;  %v625_v1 = vshrl.u32 %v211_v2, 16 }
  0x55   : > { %1429 = vrot.lane.b32.xlu1 %v2591_v43, %s2251_s27  ;;  %339 = vst.msk [vmem:[#allocation2 + $0x58] sm:$0xff] %vm327_vm0, %v2694_v19  ;;  %v2705_v28 = vrot.slane %v549_v6, 5  ;;  %v939_v29 = vsel %vm2312_vm5, %v937_v23, %v938_v3  ;;  %v1651_v33 = vsel %vm1649_vm7, %v2214_v0, 0  ;;  %v614_v35 = vrot.slane %v612_v24, 4 }
  0x56   : > { %v605_v36 = vrot.slane %v604_v14, 4  ;;  %v2711_v18 = vcombine.low %v936_v20, %v939_v29  ;;  %2127 = vmatpush3.bf16.msra.mxu0 %v1651_v33  ;;  %v617_v21 = vrot.slane %v615_v10, 5  ;;  %2165 = vmatpush3.bf16.msra.mxu1 %v1651_v33  ;;  %v621_v6 = vshll.u32 %v211_v2, 16 }
  0x57   : > { %v627_v40 = vrot.slane %v625_v1, 4  ;;  %v631_v38 = vshll.u32 %v212_v27, 16  ;;  %v2053_v45 = vrot.slane %v210_v59, 9  ;;  %v942_v54 = vrot.slane %v211_v2, 5  ;;  %v216_v1 = vld [vmem:[%s2292_s16 + $0x9c] sm:$0xf] }
  0x58   : > { %1503 = vrot.lane.b32.xlu0 %v2585_v41, %s2252_s28  ;;  %v610_v50 = vsel %vm2349_vm6, %v605_v36, %v609_v16  ;;  %v618_v49 = vor.u32 %v617_v21, %v614_v35  ;;  %v945_v56 = vrot.slane %v212_v27, 5  ;;  %v623_v61 = vrot.slane %v621_v6, 5 }
  0x59   : > { %787 = vrot.lane.b32.xlu1 %v2582_v39, %s2248_s20  ;;  %v600_v39 = vsel %vm2349_vm6, %v595_v26, %v599_v15  ;;  %v633_v55 = vrot.slane %v631_v38, 5  ;;  %v2723_v4 = vcombine.low %v213_v34, %v214_v53  ;;  %v943_v59 = vsel %vm2312_vm5, %v2053_v45, %v942_v54  ;;  %v218_v38 = vld [vmem:[%s2292_s16 + $0xa4] sm:$0x1] }
  0x5a   : > { %v2721_v46 = vcombine.low %v600_v39, %v610_v50  ;;  %v619_v9 = vrot.slane %v618_v49, 4  ;;  %v944_v12 = vrot.slane %v942_v54, 4  ;;  %v636_v3 = vshrl.u32 %v213_v34, 16  ;;  %v217_v39 = vld [vmem:[%s2292_s16 + $0xa0] sm:$0xf] }
  0x5b   : > { %v628_v2 = vor.u32 %v627_v40, %v623_v61  ;;  %v639_v0 = vshll.u32 %v213_v34, 16  ;;  %v649_v5 = vshrl.u32 %v214_v53, 16  ;;  %340 = vst.msk [vmem:[#allocation2 + $0x60] sm:$0xff] %vm327_vm0, %v2723_v4  ;;  %v645_v15 = vshll.u32 %v214_v53, 16 }
  0x5c   : > { %1505 = vrot.lane.b32.xlu0 %v2587_v42, %s2252_s28  ;;  %v624_v16 = vsel %vm2349_vm6, %v619_v9, %v623_v61  ;;  %v946_v20 = vsel %vm2312_vm5, %v944_v12, %v945_v56  ;;  %v638_v23 = vrot.slane %v636_v3, 4  ;;  %v655_v24 = vshll.u32 %v215_v63, 16 }
  0x5d   : > { %789 = vrot.lane.b32.xlu1 %v2591_v43, %s2248_s20  ;;  %v2738_v10 = vcombine.low %v943_v59, %v946_v20  ;;  %v641_v26 = vrot.slane %v639_v0, 5  ;;  %v647_v14 = vrot.slane %v645_v15, 5  ;;  %v651_v27 = vrot.slane %v649_v5, 4  ;;  %v219_v0 = vld [vmem:[%s2292_s16 + $0xa8] sm:$0xf] }
  0x5e   : > { %v657_v29 = vrot.slane %v655_v24, 5  ;;  %v2054_v33 = vrot.slane %v213_v34, 9  ;;  %v949_v35 = vrot.slane %v214_v53, 5  ;;  %v952_v6 = vrot.slane %v215_v63, 5 }
  0x5f   : > { %v642_v21 = vor.u32 %v641_v26, %v638_v23  ;;  %v2746_v40 = vcombine.low %v216_v1, %v217_v39  ;;  %v652_v50 = vor.u32 %v651_v27, %v647_v14  ;;  %v660_v54 = vshrl.u32 %v216_v1, 16  ;;  %v220_v26 = vld [vmem:[%s2292_s16 + $0xac] sm:$0xf] }
  0x60   : > { %1031 = vrot.lane.b32.xlu0 %v2585_v41, %s2247_s19  ;;  %v629_v41 = vrot.slane %v628_v2, 4  ;;  %v950_v34 = vsel %vm2312_vm5, %v2054_v33, %v949_v35  ;;  %v951_v49 = vrot.slane %v949_v35, 4  ;;  %v663_v56 = vshll.u32 %v216_v1, 16 }
  0x61   : > { %1033 = vrot.lane.b32.xlu1 %v2587_v42, %s2247_s19  ;;  %v673_v53 = vshrl.u32 %v217_v39, 16  ;;  %341 = vst.msk [vmem:[#allocation2 + $0x68] sm:$0xff] %vm327_vm0, %v2746_v40  ;;  %v653_v61 = vrot.slane %v652_v50, 4  ;;  %v669_v63 = vshll.u32 %v217_v39, 16  ;;  %v679_v9 = vshll.u32 %v218_v38, 16 }
  0x62   : > { %v634_v36 = vsel %vm2349_vm6, %v629_v41, %v633_v55  ;;  %v953_v55 = vsel %vm2312_vm5, %v951_v49, %v952_v6  ;;  %v662_v3 = vrot.slane %v660_v54, 4  ;;  %v665_v2 = vrot.slane %v663_v56, 5 }
  0x63   : > { %v2751_v45 = vcombine.low %v624_v16, %v634_v36  ;;  %v2763_v12 = vcombine.low %v950_v34, %v953_v55  ;;  %v658_v5 = vsel %vm2349_vm6, %v653_v61, %v657_v29  ;;  %v671_v15 = vrot.slane %v669_v63, 5  ;;  %v221_v36 = vld [vmem:[%s2292_s16 + $0xb0] sm:$0x1]  ;;  %v222_v63 = vld [vmem:[%s2292_s16 + $0xb4] sm:$0xf] }
  0x64   : > { %1101 = vrot.lane.b32.xlu0 %v2445_v8, %s2245_s17  ;;  %v643_v8 = vrot.slane %v642_v21, 4  ;;  %v675_v16 = vrot.slane %v673_v53, 4  ;;  %v681_v20 = vrot.slane %v679_v9, 5  ;;  %v2055_v24 = vrot.slane %v216_v1, 9  ;;  %v223_v9 = vld [vmem:[%s2292_s16 + $0xb8] sm:$0xf] }
  0x65   : > { %1103 = vrot.lane.b32.xlu1 %v2486_v31, %s2245_s17  ;;  %v956_v41 = vrot.slane %v217_v39, 5  ;;  %v959_v27 = vrot.slane %v218_v38, 5  ;;  %v2773_v33 = vcombine.low %v219_v0, %v220_v26  ;;  %v684_v35 = vshrl.u32 %v219_v0, 16 }
  0x66   : > { %v648_v59 = vsel %vm2349_vm6, %v643_v8, %v647_v14  ;;  %v676_v14 = vor.u32 %v675_v16, %v671_v15  ;;  %v687_v50 = vshll.u32 %v219_v0, 16  ;;  %v697_v39 = vshrl.u32 %v220_v26, 16 }
  0x67   : > { %v2770_v23 = vcombine.low %v648_v59, %v658_v5  ;;  %v957_v29 = vsel %vm2312_vm5, %v2055_v24, %v956_v41  ;;  %v958_v6 = vrot.slane %v956_v41, 4  ;;  %342 = vst.msk [vmem:[#allocation2 + $0x70] sm:$0xff] %vm327_vm0, %v2773_v33  ;;  %v686_v38 = vrot.slane %v684_v35, 4  ;;  %v224_v35 = vld [vmem:[%s2292_s16 + $0xbc] sm:$0x1] }
  0x68   : > { %1193 = vrot.lane.b32.xlu0 %v2591_v43, %s2249_s23  ;;  %v666_v43 = vor.u32 %v665_v2, %v662_v3  ;;  %v677_v1 = vrot.slane %v676_v14, 4  ;;  %v693_v34 = vshll.u32 %v220_v26, 16  ;;  %v689_v8 = vrot.slane %v687_v50, 5 }
  0x69   : > { %1195 = vrot.lane.b32.xlu1 %v2593_v44, %s2249_s23  ;;  %v960_v49 = vsel %vm2312_vm5, %v958_v6, %v959_v27  ;;  %v703_v54 = vshll.u32 %v221_v36, 16  ;;  %v699_v55 = vrot.slane %v697_v39, 4  ;;  %v2056_v5 = vrot.slane %v219_v0, 9 }
  0x6a   : > { %v667_v21 = vrot.slane %v666_v43, 4  ;;  %v682_v56 = vsel %vm2349_vm6, %v677_v1, %v681_v20  ;;  %v2790_v53 = vcombine.low %v957_v29, %v960_v49  ;;  %v695_v61 = vrot.slane %v693_v34, 5 }
  0x6b   : > { %v690_v3 = vor.u32 %v689_v8, %v686_v38  ;;  %v705_v2 = vrot.slane %v703_v54, 5  ;;  %v963_v16 = vrot.slane %v220_v26, 5  ;;  %v966_v20 = vrot.slane %v221_v36, 5 }
  0x6c   : > { %1269 = vrot.lane.b32.xlu0 %v2587_v42, %s2246_s18  ;;  %v672_v42 = vsel %vm2349_vm6, %v667_v21, %v671_v15  ;;  %v700_v15 = vor.u32 %v699_v55, %v695_v61  ;;  %v2800_v43 = vcombine.low %v222_v63, %v223_v9  ;;  %v708_v41 = vshrl.u32 %v222_v63, 16 }
  0x6d   : > { %1271 = vrot.lane.b32.xlu1 %v2595_v17, %s2246_s18  ;;  %v2796_v59 = vcombine.low %v672_v42, %v682_v56  ;;  %v691_v24 = vrot.slane %v690_v3, 4  ;;  %v711_v14 = vshll.u32 %v222_v63, 16  ;;  %v721_v27 = vshrl.u32 %v223_v9, 16 }
  0x6e   : > { %v701_v21 = vrot.slane %v700_v15, 4  ;;  %v965_v29 = vrot.slane %v963_v16, 4  ;;  %343 = vst.msk [vmem:[#allocation2 + $0x78] sm:$0xff] %vm327_vm0, %v2800_v43  ;;  %v717_v0 = vshll.u32 %v223_v9, 16  ;;  %v710_v36 = vrot.slane %v708_v41, 4 }
  0x6f   : > { %v696_v26 = vsel %vm2349_vm6, %v691_v24, %v695_v61  ;;  %v713_v6 = vrot.slane %v711_v14, 5  ;;  %v723_v50 = vrot.slane %v721_v27, 4  ;;  %v727_v34 = vshll.u32 %v224_v35, 16 }
  0x70   : > { %1339 = vrot.lane.b32.xlu0 %v2486_v31, %s2250_s26  ;;  %v964_v31 = vsel %vm2312_vm5, %v2056_v5, %v963_v16  ;;  %v706_v1 = vsel %vm2349_vm6, %v701_v21, %v705_v2  ;;  %v967_v39 = vsel %vm2312_vm5, %v965_v29, %v966_v20  ;;  %v719_v38 = vrot.slane %v717_v0, 5 }
  0x71   : > { %1341 = vrot.lane.b32.xlu1 %v2521_v62, %s2250_s26  ;;  %v2817_v42 = vcombine.low %v696_v26, %v706_v1  ;;  %v2819_v49 = vcombine.low %v964_v31, %v967_v39  ;;  %v714_v8 = vor.u32 %v713_v6, %v710_v36  ;;  %v970_v54 = vrot.slane %v223_v9, 5 }
  0x72   : > { %v2065_v56 = vcombine.low %v2626_v11, %v2664_v32  ;;  %v724_v61 = vor.u32 %v723_v50, %v719_v38  ;;  %v729_v55 = vrot.slane %v727_v34, 5  ;;  %v2057_v2 = vrot.slane %v222_v63, 9 }
  0x73   : > { %v715_v3 = vrot.slane %v714_v8, 4  ;;  %v972_v5 = vrot.slane %v970_v54, 4  ;;  %v973_v15 = vrot.slane %v224_v35, 5  ;;  %v546_v16 = vor.u32 %v2650_v30, %v2643_v25 }
  0x74   : > { %1431 = vrot.lane.b32.xlu0 %v2593_v44, %s2251_s27  ;;  %v559_v9 = vshll.u32 %v2599_v47, 16  ;;  %v725_v20 = vrot.slane %v724_v61, 4  ;;  %v556_v11 = vor.u32 %v2677_v51, %v2705_v28  ;;  %v971_v63 = vsel %vm2312_vm5, %v2057_v2, %v970_v54 }
  0x75   : > { %1433 = vrot.lane.b32.xlu1 %v2689_v7, %s2251_s27  ;;  %v720_v32 = vsel %vm2349_vm6, %v715_v3, %v719_v38  ;;  %v974_v24 = vsel %vm2312_vm5, %v972_v5, %v973_v15  ;;  %v547_v25 = vrot.slane %v546_v16, 4  ;;  %vm1600_vm0 = vcmask 293888  }
  0x76   : > { %v2840_v41 = vcombine.low %v971_v63, %v974_v24  ;;  %v557_v30 = vrot.slane %v556_v11, 4  ;;  %v561_v51 = vrot.slane %v559_v9, 5 }
  0x77   : > { %v552_v14 = vsel %vm2349_vm6, %v547_v25, %v2705_v28 }
  0x78   : > { %1507 = vrot.lane.b32.xlu0 %v2595_v17, %s2252_s28  ;;  %v562_v27 = vsel %vm2349_vm6, %v557_v30, %v561_v51 }
  0x79   : > { %791 = vrot.lane.b32.xlu1 %v2593_v44, %s2248_s20  ;;  %v730_v44 = vsel %vm2349_vm6, %v725_v20, %v729_v55  ;;  %v2034_v35 = vcombine.low %v552_v14, %v562_v27  ;;  %v3012_v27 = vld [vmem:[%s2292_s16 + $0xc0] sm:$0xf] }
  0x7a   : > { %v2843_v47 = vcombine.low %v720_v32, %v730_v44 }
  0x7c   : > { %1509 = vrot.lane.b32.xlu0 %v2065_v56, %s2252_s28 }
  0x7d   : > { %793 = vrot.lane.b32.xlu1 %v2689_v7, %s2248_s20 }
  0x80   : > { %1035 = vrot.lane.b32.xlu0 %v2595_v17, %s2247_s19 }
  0x81   : > { %1037 = vrot.lane.b32.xlu1 %v2065_v56, %s2247_s19 }
  0x84   : > { %1105 = vrot.lane.b32.xlu0 %v2521_v62, %s2245_s17 }
  0x85   : > { %1107 = vrot.lane.b32.xlu1 %v2576_v37, %s2245_s17 }
  0x87   : > { %v1096_v21 = vpop.permute.xlu1 %1095 }
  0x88   : > { %1197 = vrot.lane.b32.xlu0 %v2689_v7, %s2249_s23  ;;  %v1094_v17 = vpop.permute.xlu0 %1093 }
  0x89   : > { %1199 = vrot.lane.b32.xlu1 %v2034_v35, %s2249_s23 }
  0x8c   : > { %1273 = vrot.lane.b32.xlu0 %v2065_v56, %s2246_s18 }
  0x8d   : > { %1275 = vrot.lane.b32.xlu1 %v2637_v22, %s2246_s18 }
  0x8e   : > { %v1262_v62 = vpop.permute.xlu0 %1261 }
  0x90   : > { %1343 = vrot.lane.b32.xlu0 %v2576_v37, %s2250_s26 }
  0x91   : > { %1345 = vrot.lane.b32.xlu1 %v2619_v60, %s2250_s26  ;;  %v1024_v28 = vpop.permute.xlu1 %1023 }
  0x94   : > { %1435 = vrot.lane.b32.xlu0 %v2034_v35, %s2251_s27 }
  0x95   : > { %1437 = vrot.lane.b32.xlu1 %v2679_v57, %s2251_s27  ;;  %v1026_v7 = vpop.permute.xlu1 %1025 }
  0x96   : > { %v780_v31 = vpop.permute.xlu0 %779 }
  0x97   : > { %828 = vst.msk [vmem:[#allocation2] sm:$0xff] %vm827_vm8, %v780_v31 }
  0x98   : > { %1072 = vst.msk [vmem:[#allocation2] sm:$0xff] %vm1071_vm9, %v1024_v28  ;;  %1511 = vrot.lane.b32.xlu0 %v2637_v22, %s2252_s28 }
  0x99   : > { %795 = vrot.lane.b32.xlu1 %v2034_v35, %s2248_s20  ;;  %v1264_v37 = vpop.permute.xlu1 %1263  ;;  %1142 = vst.msk [vmem:[#allocation2] sm:$0xff] %vm1141_vm10, %v1094_v17  ;;  %v3015_v17 = vld [vmem:[%s2292_s16 + $0xc4] sm:$0xf] }
  0x9a   : > { %v782_v29 = vpop.permute.xlu0 %781  ;;  %v1168_v28 = vshll.u32 %v3015_v17, 16 }
  0x9b   : > { %829 = vst.msk [vmem:[#allocation2 + $0x8] sm:$0xff] %vm827_vm8, %v782_v29 }
  0x9c   : > { %1073 = vst.msk [vmem:[#allocation2 + $0x8] sm:$0xff] %vm1071_vm9, %v1026_v7  ;;  %1513 = vrot.lane.b32.xlu0 %v2681_v58, %s2252_s28 }
  0x9d   : > { %797 = vrot.lane.b32.xlu1 %v2679_v57, %s2248_s20  ;;  %1143 = vst.msk [vmem:[#allocation2 + $0x8] sm:$0xff] %vm1141_vm10, %v1096_v21  ;;  %v1159_v21 = vshrl.u32 %v3012_v27, 16 }
  0x9e   : > { %v1186_v0 = vpop.permute.xlu0 %1185 }
  0x9f   : > { %v1188_v26 = vpop.permute.xlu1 %1187  ;;  %1234 = vst.msk [vmem:[#allocation2] sm:$0xff] %vm1233_vm11, %v1186_v0  ;;  %v1170_v0 = vrot.slane %v1168_v28, 5 }
  0xa0   : > { %1235 = vst.msk [vmem:[#allocation2 + $0x8] sm:$0xff] %vm1233_vm11, %v1188_v26  ;;  %1039 = vrot.lane.b32.xlu0 %v2637_v22, %s2247_s19 }
  0xa1   : > { %1310 = vst.msk [vmem:[#allocation2] sm:$0xff] %vm1309_vm12, %v1262_v62  ;;  %1041 = vrot.lane.b32.xlu1 %v2681_v58, %s2247_s19  ;;  %1311 = vst.msk [vmem:[#allocation2 + $0x8] sm:$0xff] %vm1309_vm12, %v1264_v37  ;;  %v1172_v62 = vshrl.u32 %v3015_v17, 16 }
  0xa2   : > { %v1332_v36 = vpop.permute.xlu0 %1331 }
  0xa3   : > { %1380 = vst.msk [vmem:[#allocation2] sm:$0xff] %vm1379_vm13, %v1332_v36  ;;  %v1334_v6 = vpop.permute.xlu1 %1333  ;;  %v1174_v26 = vrot.slane %v1172_v62, 4 }
  0xa4   : > { %1381 = vst.msk [vmem:[#allocation2 + $0x8] sm:$0xff] %vm1379_vm13, %v1334_v6  ;;  %1109 = vrot.lane.b32.xlu0 %v2619_v60, %s2245_s17 }
  0xa5   : > { %1111 = vrot.lane.b32.xlu1 %v2668_v48, %s2245_s17 }
  0xa6   : > { %v1424_v22 = vpop.permute.xlu0 %1423 }
  0xa7   : > { %1472 = vst.msk [vmem:[#allocation2] sm:$0xff] %vm1471_vm14, %v1424_v22  ;;  %v1426_v50 = vpop.permute.xlu1 %1425  ;;  %v227_v22 = vld [vmem:[%s2292_s16 + $0xc8] sm:$0x1] }
  0xa8   : > { %1473 = vst.msk [vmem:[#allocation2 + $0x8] sm:$0xff] %vm1471_vm14, %v1426_v50  ;;  %1201 = vrot.lane.b32.xlu0 %v2679_v57, %s2249_s23 }
  0xa9   : > { %1203 = vrot.lane.b32.xlu1 %v2721_v46, %s2249_s23 }
  0xaa   : > { %v1500_v1 = vpop.permute.xlu0 %1499 }
  0xab   : > { %1548 = vst.msk [vmem:[#allocation2] sm:$0xff] %vm1547_vm15, %v1500_v1  ;;  %v784_v60 = vpop.permute.xlu1 %783 }
  0xac   : > { %830 = vst.msk [vmem:[#allocation2 + $0x10] sm:$0xff] %vm827_vm8, %v784_v60  ;;  %1277 = vrot.lane.b32.xlu0 %v2681_v58, %s2246_s18  ;;  %v1175_v60 = vor.u32 %v1174_v26, %v1170_v0 }
  0xad   : > { %1279 = vrot.lane.b32.xlu1 %v2711_v18, %s2246_s18 }
  0xae   : > { %v1502_v39 = vpop.permute.xlu0 %1501 }
  0xaf   : > { %1549 = vst.msk [vmem:[#allocation2 + $0x8] sm:$0xff] %vm1547_vm15, %v1502_v39  ;;  %v786_v57 = vpop.permute.xlu1 %785  ;;  %v1178_v39 = vshll.u32 %v227_v22, 16 }
  0xb0   : > { %831 = vst.msk [vmem:[#allocation2 + $0x18] sm:$0xff] %vm827_vm8, %v786_v57  ;;  %1347 = vrot.lane.b32.xlu0 %v2668_v48, %s2250_s26 }
  0xb1   : > { %1349 = vrot.lane.b32.xlu1 %v2694_v19, %s2250_s26 }
  0xb2   : > { %v1028_v38 = vpop.permute.xlu0 %1027  ;;  %v1564_v34 = vld [vmem:[#allocation2] sm:$0xff] }
  0xb3   : > { %1074 = vst.msk [vmem:[#allocation2 + $0x10] sm:$0xff] %vm1071_vm9, %v1028_v38  ;;  %v1030_v58 = vpop.permute.xlu1 %1029  ;;  %2128 = vmatprep.mubr.msk.bf16.mxu0 %vm1600_vm0, %v1564_v34  ;;  %v3043_v38 = vld [vmem:[%s2292_s16 + $0xcc] sm:$0xf] }
  0xb4   : > { %1075 = vst.msk [vmem:[#allocation2 + $0x18] sm:$0xff] %vm1071_vm9, %v1030_v58  ;;  %1439 = vrot.lane.b32.xlu0 %v2721_v46, %s2251_s27  ;;  %v3047_v58 = vld [vmem:[%s2292_s16 + $0xd0] sm:$0xf]  ;;  %v2080_v28 = vrot.slane %v3043_v38, 9 }
  0xb5   : > { %1441 = vrot.lane.b32.xlu1 %v2751_v45, %s2251_s27 }
  0xb6   : > { %v1098_v48 = vpop.permute.xlu0 %1097  ;;  %v1565_v8 = vld [vmem:[#allocation2 + $0x8] sm:$0xff] }
  0xb7   : > { %1144 = vst.msk [vmem:[#allocation2 + $0x10] sm:$0xff] %vm1141_vm10, %v1098_v48  ;;  %v1100_v54 = vpop.permute.xlu1 %1099  ;;  %2129 = vmatmul.mubr.msk.bf16.vlgmr.msra.gmra.mrb[0].mxu0 %vm1600_vm0, %v1565_v8  ;;  %v1180_v8 = vrot.slane %v1178_v39, 5 }
  0xb8   : > { %1145 = vst.msk [vmem:[#allocation2 + $0x18] sm:$0xff] %vm1141_vm10, %v1100_v54  ;;  %1515 = vrot.lane.b32.xlu0 %v2711_v18, %s2252_s28  ;;  %v1397_v54 = vshrl.u32 %v3043_v38, 16 }
  0xb9   : > { %799 = vrot.lane.b32.xlu1 %v2721_v46, %s2248_s20 }
  0xba   : > { %v1190_v56 = vpop.permute.xlu0 %1189 }
  0xbb   : > { %1236 = vst.msk [vmem:[#allocation2 + $0x10] sm:$0xff] %vm1233_vm11, %v1190_v56  ;;  %v1192_v61 = vpop.permute.xlu1 %1191  ;;  %v1400_v56 = vshll.u32 %v3043_v38, 16 }
  0xbc   : > { %1237 = vst.msk [vmem:[#allocation2 + $0x18] sm:$0xff] %vm1233_vm11, %v1192_v61  ;;  %1517 = vrot.lane.b32.xlu0 %v2738_v10, %s2252_s28 }
  0xbd   : > { %801 = vrot.lane.b32.xlu1 %v2751_v45, %s2248_s20 }
  0xbe   : > { %v1266_v55 = vpop.permute.xlu0 %1265 }
  0xbf   : > { %1312 = vst.msk [vmem:[#allocation2 + $0x10] sm:$0xff] %vm1309_vm12, %v1266_v55  ;;  %v1268_v3 = vpop.permute.xlu1 %1267  ;;  %v1253_v55 = vrot.slane %v3015_v17, 5 }
  0xc0   : > { %1313 = vst.msk [vmem:[#allocation2 + $0x18] sm:$0xff] %vm1309_vm12, %v1268_v3  ;;  %1043 = vrot.lane.b32.xlu0 %v2711_v18, %s2247_s19  ;;  %v1410_v3 = vshrl.u32 %v3047_v58, 16 }
  0xc1   : > { %1045 = vrot.lane.b32.xlu1 %v2738_v10, %s2247_s19 }
  0xc2   : > { %v1336_v46 = vpop.permute.xlu0 %1335 }
  0xc3   : > { %1382 = vst.msk [vmem:[#allocation2 + $0x10] sm:$0xff] %vm1379_vm13, %v1336_v46  ;;  %v1338_v2 = vpop.permute.xlu1 %1337  ;;  %v1406_v46 = vshll.u32 %v3047_v58, 16 }
  0xc4   : > { %1383 = vst.msk [vmem:[#allocation2 + $0x18] sm:$0xff] %vm1379_vm13, %v1338_v2  ;;  %1113 = vrot.lane.b32.xlu0 %v2694_v19, %s2245_s17 }
  0xc5   : > { %1115 = vrot.lane.b32.xlu1 %v2723_v4, %s2245_s17 }
  0xc6   : > { %v1428_v5 = vpop.permute.xlu0 %1427 }
  0xc7   : > { %1474 = vst.msk [vmem:[#allocation2 + $0x10] sm:$0xff] %vm1471_vm14, %v1428_v5  ;;  %v1430_v15 = vpop.permute.xlu1 %1429  ;;  %v2074_v5 = vcombine.low %v3012_v27, %v3015_v17  ;;  %v1491_v17 = vrot.slane %v3047_v58, 5 }
  0xc8   : > { %1475 = vst.msk [vmem:[#allocation2 + $0x18] sm:$0xff] %vm1471_vm14, %v1430_v15  ;;  %1205 = vrot.lane.b32.xlu0 %v2751_v45, %s2249_s23 }
  0xc9   : > { %1207 = vrot.lane.b32.xlu1 %v2770_v23, %s2249_s23  ;;  %v1492_v52 = vsel %vm2312_vm5, %v2080_v28, %v1491_v17 }
  0xca   : > { %v1504_v18 = vpop.permute.xlu0 %1503 }
  0xcb   : > { %1550 = vst.msk [vmem:[#allocation2 + $0x10] sm:$0xff] %vm1547_vm15, %v1504_v18  ;;  %v788_v16 = vpop.permute.xlu1 %787 }
  0xcc   : > { %832 = vst.msk [vmem:[#allocation2 + $0x20] sm:$0xff] %vm827_vm8, %v788_v16  ;;  %1281 = vrot.lane.b32.xlu0 %v2738_v10, %s2246_s18  ;;  %v2076_v16 = vrot.slane %v3012_v27, 9 }
  0xcd   : > { %1283 = vrot.lane.b32.xlu1 %v2763_v12, %s2246_s18 }
  0xce   : > { %v1506_v19 = vpop.permute.xlu0 %1505 }
  0xcf   : > { %1551 = vst.msk [vmem:[#allocation2 + $0x18] sm:$0xff] %vm1547_vm15, %v1506_v19  ;;  %v790_v9 = vpop.permute.xlu1 %789  ;;  %v1399_v19 = vrot.slane %v1397_v54, 4 }
  0xd0   : > { %833 = vst.msk [vmem:[#allocation2 + $0x28] sm:$0xff] %vm827_vm8, %v790_v9  ;;  %1351 = vrot.lane.b32.xlu0 %v2723_v4, %s2250_s26  ;;  %v1402_v9 = vrot.slane %v1400_v56, 5 }
  0xd1   : > { %1353 = vrot.lane.b32.xlu1 %v2746_v40, %s2250_s26 }
  0xd2   : > { %v1032_v45 = vpop.permute.xlu0 %1031  ;;  %v1566_v20 = vld [vmem:[#allocation2 + $0x10] sm:$0xff] }
  0xd3   : > { %1076 = vst.msk [vmem:[#allocation2 + $0x20] sm:$0xff] %vm1071_vm9, %v1032_v45  ;;  %v1034_v10 = vpop.permute.xlu1 %1033  ;;  %2132 = vmatprep.mubr.msk.bf16.mxu0 %vm1600_vm0, %v1566_v20  ;;  %v1255_v20 = vrot.slane %v1253_v55, 4 }
  0xd4   : > { %1077 = vst.msk [vmem:[#allocation2 + $0x28] sm:$0xff] %vm1071_vm9, %v1034_v10  ;;  %1443 = vrot.lane.b32.xlu0 %v2770_v23, %s2251_s27  ;;  %v1256_v10 = vrot.slane %v227_v22, 5 }
  0xd5   : > { %1445 = vrot.lane.b32.xlu1 %v2796_v59, %s2251_s27 }
  0xd6   : > { %v1102_v11 = vpop.permute.xlu0 %1101  ;;  %v1567_v4 = vld [vmem:[#allocation2 + $0x18] sm:$0xff] }
  0xd7   : > { %1146 = vst.msk [vmem:[#allocation2 + $0x20] sm:$0xff] %vm1141_vm10, %v1102_v11  ;;  %v1104_v32 = vpop.permute.xlu1 %1103  ;;  %2133 = vmatmul.mubr.msk.bf16.gmra.mrb[4].mxu0 %vm1600_vm0, %v1567_v4  ;;  %v1412_v11 = vrot.slane %v1410_v3, 4 }
  0xd8   : > { %1147 = vst.msk [vmem:[#allocation2 + $0x28] sm:$0xff] %vm1141_vm10, %v1104_v32  ;;  %1519 = vrot.lane.b32.xlu0 %v2763_v12, %s2252_s28  ;;  %v230_v32 = vld [vmem:[%s2292_s16 + $0xd4] sm:$0x1] }
  0xd9   : > { %803 = vrot.lane.b32.xlu1 %v2770_v23, %s2248_s20 }
  0xda   : > { %v1194_v63 = vpop.permute.xlu0 %1193 }
  0xdb   : > { %1238 = vst.msk [vmem:[#allocation2 + $0x20] sm:$0xff] %vm1233_vm11, %v1194_v63  ;;  %v1196_v24 = vpop.permute.xlu1 %1195 }
  0xdc   : > { %1239 = vst.msk [vmem:[#allocation2 + $0x28] sm:$0xff] %vm1233_vm11, %v1196_v24  ;;  %1521 = vrot.lane.b32.xlu0 %v2790_v53, %s2252_s28  ;;  %v1403_v24 = vor.u32 %v1402_v9, %v1399_v19 }
  0xdd   : > { %805 = vrot.lane.b32.xlu1 %v2796_v59, %s2248_s20 }
  0xde   : > { %v1270_v44 = vpop.permute.xlu0 %1269 }
  0xdf   : > { %1314 = vst.msk [vmem:[#allocation2 + $0x20] sm:$0xff] %vm1309_vm12, %v1270_v44  ;;  %v1272_v25 = vpop.permute.xlu1 %1271 }
  0xe0   : > { %1315 = vst.msk [vmem:[#allocation2 + $0x28] sm:$0xff] %vm1309_vm12, %v1272_v25  ;;  %1047 = vrot.lane.b32.xlu0 %v2763_v12, %s2247_s19  ;;  %v1254_v25 = vsel %vm2312_vm5, %v2076_v16, %v1253_v55 }
  0xe1   : > { %1049 = vrot.lane.b32.xlu1 %v2790_v53, %s2247_s19 }
  0xe2   : > { %v1340_v23 = vpop.permute.xlu0 %1339 }
  0xe3   : > { %1384 = vst.msk [vmem:[#allocation2 + $0x20] sm:$0xff] %vm1379_vm13, %v1340_v23  ;;  %v1342_v30 = vpop.permute.xlu1 %1341  ;;  %v1257_v23 = vsel %vm2312_vm5, %v1255_v20, %v1256_v10 }
  0xe4   : > { %1385 = vst.msk [vmem:[#allocation2 + $0x28] sm:$0xff] %vm1379_vm13, %v1342_v30  ;;  %1117 = vrot.lane.b32.xlu0 %v2746_v40, %s2245_s17 }
  0xe5   : > { %1119 = vrot.lane.b32.xlu1 %v2773_v33, %s2245_s17 }
  0xe6   : > { %v1432_v51 = vpop.permute.xlu0 %1431 }
  0xe7   : > { %1476 = vst.msk [vmem:[#allocation2 + $0x20] sm:$0xff] %vm1471_vm14, %v1432_v51  ;;  %v1434_v12 = vpop.permute.xlu1 %1433  ;;  %v1416_v51 = vshll.u32 %v230_v32, 16 }
  0xe8   : > { %1477 = vst.msk [vmem:[#allocation2 + $0x28] sm:$0xff] %vm1471_vm14, %v1434_v12  ;;  %1209 = vrot.lane.b32.xlu0 %v2796_v59, %s2249_s23 }
  0xe9   : > { %1211 = vrot.lane.b32.xlu1 %v2817_v42, %s2249_s23 }
  0xea   : > { %v1508_v14 = vpop.permute.xlu0 %1507 }
  0xeb   : > { %1552 = vst.msk [vmem:[#allocation2 + $0x20] sm:$0xff] %vm1547_vm15, %v1508_v14  ;;  %v792_v40 = vpop.permute.xlu1 %791  ;;  %v1404_v14 = vrot.slane %v1403_v24, 4 }
  0xec   : > { %834 = vst.msk [vmem:[#allocation2 + $0x30] sm:$0xff] %vm827_vm8, %v792_v40  ;;  %1285 = vrot.lane.b32.xlu0 %v2790_v53, %s2246_s18  ;;  %v1162_v53 = vshll.u32 %v3012_v27, 16 }
  0xed   : > { %1287 = vrot.lane.b32.xlu1 %v2819_v49, %s2246_s18 }
  0xee   : > { %v1510_v35 = vpop.permute.xlu0 %1509  ;;  %v1164_v29 = vrot.slane %v1162_v53, 5 }
  0xef   : > { %1553 = vst.msk [vmem:[#allocation2 + $0x28] sm:$0xff] %vm1547_vm15, %v1510_v35  ;;  %v794_v59 = vpop.permute.xlu1 %793  ;;  %v1418_v35 = vrot.slane %v1416_v51, 5 }
  0xf0   : > { %835 = vst.msk [vmem:[#allocation2 + $0x38] sm:$0xff] %vm827_vm8, %v794_v59  ;;  %1355 = vrot.lane.b32.xlu0 %v2773_v33, %s2250_s26  ;;  %v1161_v33 = vrot.slane %v1159_v21, 4 }
  0xf1   : > { %1357 = vrot.lane.b32.xlu1 %v2800_v43, %s2250_s26 }
  0xf2   : > { %v1036_v7 = vpop.permute.xlu0 %1035  ;;  %v1568_v31 = vld [vmem:[#allocation2 + $0x20] sm:$0xff]  ;;  %v1165_v1 = vor.u32 %v1164_v29, %v1161_v33 }
  0xf3   : > { %1078 = vst.msk [vmem:[#allocation2 + $0x30] sm:$0xff] %vm1071_vm9, %v1036_v7  ;;  %v1038_v37 = vpop.permute.xlu1 %1037  ;;  %2136 = vmatprep.mubr.msk.bf16.mxu0 %vm1600_vm0, %v1568_v31  ;;  %v1493_v7 = vrot.slane %v1491_v17, 4  ;;  %v1494_v31 = vrot.slane %v230_v32, 5 }
  0xf4   : > { %1079 = vst.msk [vmem:[#allocation2 + $0x38] sm:$0xff] %vm1071_vm9, %v1038_v37  ;;  %1447 = vrot.lane.b32.xlu0 %v2817_v42, %s2251_s27  ;;  %v1166_v48 = vrot.slane %v1165_v1, 4 }
  0xf5   : > { %1449 = vrot.lane.b32.xlu1 %v2843_v47, %s2251_s27 }
  0xf6   : > { %v1106_v36 = vpop.permute.xlu0 %1105  ;;  %v1569_v6 = vld [vmem:[#allocation2 + $0x28] sm:$0xff]  ;;  %v1171_v15 = vsel %vm2349_vm6, %v1166_v48, %v1170_v0  ;;  %v1495_v0 = vsel %vm2312_vm5, %v1493_v7, %v1494_v31 }
  0xf7   : > { %1148 = vst.msk [vmem:[#allocation2 + $0x30] sm:$0xff] %vm1141_vm10, %v1106_v36  ;;  %v1108_v50 = vpop.permute.xlu1 %1107  ;;  %2137 = vmatmul.mubr.msk.bf16.gmra.mrb[8].mxu0 %vm1600_vm0, %v1569_v6  ;;  %v2081_v36 = vcombine.low %v1492_v52, %v1495_v0 }
  0xf8   : > { %1149 = vst.msk [vmem:[#allocation2 + $0x38] sm:$0xff] %vm1141_vm10, %v1108_v50  ;;  %1523 = vrot.lane.b32.xlu0 %v2819_v49, %s2252_s28 }
  0xf9   : > { %807 = vrot.lane.b32.xlu1 %v2817_v42, %s2248_s20  ;;  %v1176_v42 = vrot.slane %v1175_v60, 4 }
  0xfa   : > { %v1198_v57 = vpop.permute.xlu0 %1197 }
  0xfb   : > { %1240 = vst.msk [vmem:[#allocation2 + $0x30] sm:$0xff] %vm1233_vm11, %v1198_v57  ;;  %v1200_v34 = vpop.permute.xlu1 %1199  ;;  %v1181_v18 = vsel %vm2349_vm6, %v1176_v42, %v1180_v8 }
  0xfc   : > { %1241 = vst.msk [vmem:[#allocation2 + $0x38] sm:$0xff] %vm1233_vm11, %v1200_v34  ;;  %1525 = vrot.lane.b32.xlu0 %v2840_v41, %s2252_s28  ;;  %v2075_v63 = vcombine.low %v1171_v15, %v1181_v18 }
  0xfd   : > { %809 = vrot.lane.b32.xlu1 %v2843_v47, %s2248_s20 }
  0xfe   : > { %v1274_v61 = vpop.permute.xlu0 %1273 }
  0xff   : > { %1316 = vst.msk [vmem:[#allocation2 + $0x30] sm:$0xff] %vm1309_vm12, %v1274_v61  ;;  %v1276_v2 = vpop.permute.xlu1 %1275 }
 0x100   : > { %1317 = vst.msk [vmem:[#allocation2 + $0x38] sm:$0xff] %vm1309_vm12, %v1276_v2  ;;  %1051 = vrot.lane.b32.xlu0 %v2819_v49, %s2247_s19  ;;  %v1408_v49 = vrot.slane %v1406_v46, 5 }
 0x101   : > { %1053 = vrot.lane.b32.xlu1 %v2840_v41, %s2247_s19 }
 0x102   : > { %v1344_v45 = vpop.permute.xlu0 %1343  ;;  %v1413_v30 = vor.u32 %v1412_v11, %v1408_v49  ;;  %v1409_v21 = vsel %vm2349_vm6, %v1404_v14, %v1408_v49 }
 0x103   : > { %1386 = vst.msk [vmem:[#allocation2 + $0x30] sm:$0xff] %vm1379_vm13, %v1344_v45  ;;  %v1346_v4 = vpop.permute.xlu1 %1345 }
 0x104   : > { %1387 = vst.msk [vmem:[#allocation2 + $0x38] sm:$0xff] %vm1379_vm13, %v1346_v4  ;;  %1121 = vrot.lane.b32.xlu0 %v2800_v43, %s2245_s17  ;;  %v2077_v43 = vcombine.low %v1254_v25, %v1257_v23  ;;  %v1414_v27 = vrot.slane %v1413_v30, 4 }
 0x105   : > { %1123 = vrot.lane.b32.xlu1 %v2074_v5, %s2245_s17 }
 0x106   : > { %v1436_v44 = vpop.permute.xlu0 %1435  ;;  %v1419_v62 = vsel %vm2349_vm6, %v1414_v27, %v1418_v35 }
 0x107   : > { %1478 = vst.msk [vmem:[#allocation2 + $0x30] sm:$0xff] %vm1471_vm14, %v1436_v44  ;;  %v1438_v12 = vpop.permute.xlu1 %1437 }
 0x108   : > { %1479 = vst.msk [vmem:[#allocation2 + $0x38] sm:$0xff] %vm1471_vm14, %v1438_v12  ;;  %1213 = vrot.lane.b32.xlu0 %v2843_v47, %s2249_s23  ;;  %v2078_v47 = vcombine.low %v3043_v38, %v3047_v58 }
 0x109   : > { %1215 = vrot.lane.b32.xlu1 %v2075_v63, %s2249_s23 }
 0x10a   : > { %v1512_v40 = vpop.permute.xlu0 %1511 }
 0x10b   : > { %1554 = vst.msk [vmem:[#allocation2 + $0x30] sm:$0xff] %vm1547_vm15, %v1512_v40  ;;  %v796_v59 = vpop.permute.xlu1 %795 }
 0x10c   : > { %836 = vst.msk [vmem:[#allocation2 + $0x40] sm:$0xff] %vm827_vm8, %v796_v59  ;;  %1289 = vrot.lane.b32.xlu0 %v2840_v41, %s2246_s18  ;;  %v2079_v41 = vcombine.low %v1409_v21, %v1419_v62 }
 0x10d   : > { %1291 = vrot.lane.b32.xlu1 %v2077_v43, %s2246_s18 }
 0x10e   : > { %v1514_v53 = vpop.permute.xlu0 %1513 }
 0x10f   : > { %1555 = vst.msk [vmem:[#allocation2 + $0x38] sm:$0xff] %vm1547_vm15, %v1514_v53  ;;  %v798_v37 = vpop.permute.xlu1 %797 }
 0x110   : > { %837 = vst.msk [vmem:[#allocation2 + $0x48] sm:$0xff] %vm827_vm8, %v798_v37  ;;  %1359 = vrot.lane.b32.xlu0 %v2074_v5, %s2250_s26 }
 0x111   : > { %1361 = vrot.lane.b32.xlu1 %v2078_v47, %s2250_s26 }
 0x112   : > { %v1040_v33 = vpop.permute.xlu0 %1039  ;;  %v1570_v29 = vld [vmem:[#allocation2 + $0x30] sm:$0xff] }
 0x113   : > { %1080 = vst.msk [vmem:[#allocation2 + $0x40] sm:$0xff] %vm1071_vm9, %v1040_v33  ;;  %v1042_v26 = vpop.permute.xlu1 %1041  ;;  %2140 = vmatprep.mubr.msk.bf16.mxu0 %vm1600_vm0, %v1570_v29 }
 0x114   : > { %1081 = vst.msk [vmem:[#allocation2 + $0x48] sm:$0xff] %vm1071_vm9, %v1042_v26  ;;  %1451 = vrot.lane.b32.xlu0 %v2075_v63, %s2251_s27 }
 0x115   : > { %1453 = vrot.lane.b32.xlu1 %v2079_v41, %s2251_s27 }
 0x116   : > { %v1110_v6 = vpop.permute.xlu0 %1109  ;;  %v1571_v22 = vld [vmem:[#allocation2 + $0x38] sm:$0xff] }
 0x117   : > { %1150 = vst.msk [vmem:[#allocation2 + $0x40] sm:$0xff] %vm1141_vm10, %v1110_v6  ;;  %v1112_v50 = vpop.permute.xlu1 %1111  ;;  %2141 = vmatmul.mubr.msk.bf16.gmra.mrb[12].mxu0 %vm1600_vm0, %v1571_v22 }
 0x118   : > { %1151 = vst.msk [vmem:[#allocation2 + $0x48] sm:$0xff] %vm1141_vm10, %v1112_v50  ;;  %1527 = vrot.lane.b32.xlu0 %v2077_v43, %s2252_s28 }
 0x119   : > { %1529 = vrot.lane.b32.xlu1 %v2081_v36, %s2252_s28 }
 0x11a   : > { %v1202_v13 = vpop.permute.xlu0 %1201 }
 0x11b   : > { %1242 = vst.msk [vmem:[#allocation2 + $0x40] sm:$0xff] %vm1233_vm11, %v1202_v13  ;;  %v1204_v1 = vpop.permute.xlu1 %1203 }
 0x11c   : > { %1243 = vst.msk [vmem:[#allocation2 + $0x48] sm:$0xff] %vm1233_vm11, %v1204_v1 }
 0x11e   : > { %v1278_v60 = vpop.permute.xlu0 %1277 }
 0x11f   : > { %1318 = vst.msk [vmem:[#allocation2 + $0x40] sm:$0xff] %vm1309_vm12, %v1278_v60  ;;  %v1280_v39 = vpop.permute.xlu1 %1279 }
 0x120   : > { %1319 = vst.msk [vmem:[#allocation2 + $0x48] sm:$0xff] %vm1309_vm12, %v1280_v39 }
 0x122   : > { %v1348_v57 = vpop.permute.xlu0 %1347 }
 0x123   : > { %1388 = vst.msk [vmem:[#allocation2 + $0x40] sm:$0xff] %vm1379_vm13, %v1348_v57  ;;  %v1350_v38 = vpop.permute.xlu1 %1349 }
 0x124   : > { %1389 = vst.msk [vmem:[#allocation2 + $0x48] sm:$0xff] %vm1379_vm13, %v1350_v38 }
 0x126   : > { %v1440_v34 = vpop.permute.xlu0 %1439 }
 0x127   : > { %1480 = vst.msk [vmem:[#allocation2 + $0x40] sm:$0xff] %vm1471_vm14, %v1440_v34  ;;  %v1442_v58 = vpop.permute.xlu1 %1441 }
 0x128   : > { %1481 = vst.msk [vmem:[#allocation2 + $0x48] sm:$0xff] %vm1471_vm14, %v1442_v58 }
 0x12a   : > { %v1516_v48 = vpop.permute.xlu0 %1515 }
 0x12b   : > { %1556 = vst.msk [vmem:[#allocation2 + $0x40] sm:$0xff] %vm1547_vm15, %v1516_v48  ;;  %v800_v42 = vpop.permute.xlu1 %799 }
 0x12c   : > { %838 = vst.msk [vmem:[#allocation2 + $0x50] sm:$0xff] %vm827_vm8, %v800_v42 }
 0x12e   : > { %v1518_v8 = vpop.permute.xlu0 %1517 }
 0x12f   : > { %1557 = vst.msk [vmem:[#allocation2 + $0x48] sm:$0xff] %vm1547_vm15, %v1518_v8  ;;  %v802_v54 = vpop.permute.xlu1 %801 }
 0x130   : > { %839 = vst.msk [vmem:[#allocation2 + $0x58] sm:$0xff] %vm827_vm8, %v802_v54 }
 0x132   : > { %v1044_v56 = vpop.permute.xlu0 %1043  ;;  %v1572_v61 = vld [vmem:[#allocation2 + $0x40] sm:$0xff] }
 0x133   : > { %1082 = vst.msk [vmem:[#allocation2 + $0x50] sm:$0xff] %vm1071_vm9, %v1044_v56  ;;  %v1046_v55 = vpop.permute.xlu1 %1045  ;;  %2144 = vmatprep.mubr.msk.bf16.mxu1 %vm1600_vm0, %v1572_v61 }
 0x134   : > { %1083 = vst.msk [vmem:[#allocation2 + $0x58] sm:$0xff] %vm1071_vm9, %v1046_v55 }
 0x136   : > { %v1114_v3 = vpop.permute.xlu0 %1113  ;;  %v1573_v46 = vld [vmem:[#allocation2 + $0x48] sm:$0xff] }
 0x137   : > { %1152 = vst.msk [vmem:[#allocation2 + $0x50] sm:$0xff] %vm1141_vm10, %v1114_v3  ;;  %v1116_v2 = vpop.permute.xlu1 %1115  ;;  %2145 = vmatmul.mubr.msk.bf16.vlgmr.msra.gmra.mrb[0].mxu1 %vm1600_vm0, %v1573_v46 }
 0x138   : > { %1153 = vst.msk [vmem:[#allocation2 + $0x58] sm:$0xff] %vm1141_vm10, %v1116_v2 }
 0x13a   : > { %v1206_v5 = vpop.permute.xlu0 %1205 }
 0x13b   : > { %1244 = vst.msk [vmem:[#allocation2 + $0x50] sm:$0xff] %vm1233_vm11, %v1206_v5  ;;  %v1208_v15 = vpop.permute.xlu1 %1207 }
 0x13c   : > { %1245 = vst.msk [vmem:[#allocation2 + $0x58] sm:$0xff] %vm1233_vm11, %v1208_v15 }
 0x13e   : > { %v1282_v18 = vpop.permute.xlu0 %1281 }
 0x13f   : > { %1320 = vst.msk [vmem:[#allocation2 + $0x50] sm:$0xff] %vm1309_vm12, %v1282_v18  ;;  %v1284_v16 = vpop.permute.xlu1 %1283 }
 0x140   : > { %1321 = vst.msk [vmem:[#allocation2 + $0x58] sm:$0xff] %vm1309_vm12, %v1284_v16 }
 0x142   : > { %v1352_v19 = vpop.permute.xlu0 %1351 }
 0x143   : > { %1390 = vst.msk [vmem:[#allocation2 + $0x50] sm:$0xff] %vm1379_vm13, %v1352_v19  ;;  %v1354_v9 = vpop.permute.xlu1 %1353 }
 0x144   : > { %1391 = vst.msk [vmem:[#allocation2 + $0x58] sm:$0xff] %vm1379_vm13, %v1354_v9 }
 0x146   : > { %v1444_v45 = vpop.permute.xlu0 %1443 }
 0x147   : > { %1482 = vst.msk [vmem:[#allocation2 + $0x50] sm:$0xff] %vm1471_vm14, %v1444_v45  ;;  %v1446_v20 = vpop.permute.xlu1 %1445 }
 0x148   : > { %1483 = vst.msk [vmem:[#allocation2 + $0x58] sm:$0xff] %vm1471_vm14, %v1446_v20 }
 0x14a   : > { %v1520_v10 = vpop.permute.xlu0 %1519 }
 0x14b   : > { %1558 = vst.msk [vmem:[#allocation2 + $0x50] sm:$0xff] %vm1547_vm15, %v1520_v10  ;;  %v804_v49 = vpop.permute.xlu1 %803 }
 0x14c   : > { %840 = vst.msk [vmem:[#allocation2 + $0x60] sm:$0xff] %vm827_vm8, %v804_v49 }
 0x14e   : > { %v1522_v11 = vpop.permute.xlu0 %1521 }
 0x14f   : > { %1559 = vst.msk [vmem:[#allocation2 + $0x58] sm:$0xff] %vm1547_vm15, %v1522_v11  ;;  %v806_v4 = vpop.permute.xlu1 %805 }
 0x150   : > { %841 = vst.msk [vmem:[#allocation2 + $0x68] sm:$0xff] %vm827_vm8, %v806_v4 }
 0x152   : > { %v1048_v32 = vpop.permute.xlu0 %1047  ;;  %v1574_v63 = vld [vmem:[#allocation2 + $0x50] sm:$0xff] }
 0x153   : > { %1084 = vst.msk [vmem:[#allocation2 + $0x60] sm:$0xff] %vm1071_vm9, %v1048_v32  ;;  %v1050_v24 = vpop.permute.xlu1 %1049  ;;  %2148 = vmatprep.mubr.msk.bf16.mxu1 %vm1600_vm0, %v1574_v63 }
 0x154   : > { %1085 = vst.msk [vmem:[#allocation2 + $0x68] sm:$0xff] %vm1071_vm9, %v1050_v24 }
 0x156   : > { %v1118_v44 = vpop.permute.xlu0 %1117  ;;  %v1575_v25 = vld [vmem:[#allocation2 + $0x58] sm:$0xff] }
 0x157   : > { %1154 = vst.msk [vmem:[#allocation2 + $0x60] sm:$0xff] %vm1141_vm10, %v1118_v44  ;;  %v1120_v23 = vpop.permute.xlu1 %1119  ;;  %2149 = vmatmul.mubr.msk.bf16.gmra.mrb[4].mxu1 %vm1600_vm0, %v1575_v25 }
 0x158   : > { %1155 = vst.msk [vmem:[#allocation2 + $0x68] sm:$0xff] %vm1141_vm10, %v1120_v23 }
 0x15a   : > { %v1210_v30 = vpop.permute.xlu0 %1209 }
 0x15b   : > { %1246 = vst.msk [vmem:[#allocation2 + $0x60] sm:$0xff] %vm1233_vm11, %v1210_v30  ;;  %v1212_v51 = vpop.permute.xlu1 %1211 }
 0x15c   : > { %1247 = vst.msk [vmem:[#allocation2 + $0x68] sm:$0xff] %vm1233_vm11, %v1212_v51 }
 0x15e   : > { %v1286_v12 = vpop.permute.xlu0 %1285 }
 0x15f   : > { %1322 = vst.msk [vmem:[#allocation2 + $0x60] sm:$0xff] %vm1309_vm12, %v1286_v12  ;;  %v1288_v43 = vpop.permute.xlu1 %1287 }
 0x160   : > { %1323 = vst.msk [vmem:[#allocation2 + $0x68] sm:$0xff] %vm1309_vm12, %v1288_v43 }
 0x162   : > { %v1356_v14 = vpop.permute.xlu0 %1355 }
 0x163   : > { %1392 = vst.msk [vmem:[#allocation2 + $0x60] sm:$0xff] %vm1379_vm13, %v1356_v14  ;;  %v1358_v40 = vpop.permute.xlu1 %1357 }
 0x164   : > { %1393 = vst.msk [vmem:[#allocation2 + $0x68] sm:$0xff] %vm1379_vm13, %v1358_v40 }
 0x166   : > { %v1448_v27 = vpop.permute.xlu0 %1447 }
 0x167   : > { %1484 = vst.msk [vmem:[#allocation2 + $0x60] sm:$0xff] %vm1471_vm14, %v1448_v27  ;;  %v1450_v35 = vpop.permute.xlu1 %1449 }
 0x168   : > { %1485 = vst.msk [vmem:[#allocation2 + $0x68] sm:$0xff] %vm1471_vm14, %v1450_v35 }
 0x16a   : > { %v1524_v17 = vpop.permute.xlu0 %1523 }
 0x16b   : > { %1560 = vst.msk [vmem:[#allocation2 + $0x60] sm:$0xff] %vm1547_vm15, %v1524_v17  ;;  %v808_v59 = vpop.permute.xlu1 %807 }
 0x16c   : > { %842 = vst.msk [vmem:[#allocation2 + $0x70] sm:$0xff] %vm827_vm8, %v808_v59 }
 0x16e   : > { %v1526_v47 = vpop.permute.xlu0 %1525 }
 0x16f   : > { %1561 = vst.msk [vmem:[#allocation2 + $0x68] sm:$0xff] %vm1547_vm15, %v1526_v47  ;;  %v810_v21 = vpop.permute.xlu1 %809 }
 0x170   : > { %843 = vst.msk [vmem:[#allocation2 + $0x78] sm:$0xff] %vm827_vm8, %v810_v21 }
 0x172   : > { %v1052_v53 = vpop.permute.xlu0 %1051  ;;  %v1576_v62 = vld [vmem:[#allocation2 + $0x60] sm:$0xff] }
 0x173   : > { %1086 = vst.msk [vmem:[#allocation2 + $0x70] sm:$0xff] %vm1071_vm9, %v1052_v53  ;;  %v1054_v28 = vpop.permute.xlu1 %1053  ;;  %2152 = vmatprep.mubr.msk.bf16.mxu1 %vm1600_vm0, %v1576_v62 }
 0x174   : > { %1087 = vst.msk [vmem:[#allocation2 + $0x78] sm:$0xff] %vm1071_vm9, %v1054_v28 }
 0x176   : > { %v1122_v7 = vpop.permute.xlu0 %1121  ;;  %v1577_v31 = vld [vmem:[#allocation2 + $0x68] sm:$0xff] }
 0x177   : > { %1156 = vst.msk [vmem:[#allocation2 + $0x70] sm:$0xff] %vm1141_vm10, %v1122_v7  ;;  %v1124_v37 = vpop.permute.xlu1 %1123  ;;  %2153 = vmatmul.mubr.msk.bf16.gmra.mrb[8].mxu1 %vm1600_vm0, %v1577_v31 }
 0x178   : > { %1157 = vst.msk [vmem:[#allocation2 + $0x78] sm:$0xff] %vm1141_vm10, %v1124_v37 }
 0x17a   : > { %v1214_v41 = vpop.permute.xlu0 %1213 }
 0x17b   : > { %1248 = vst.msk [vmem:[#allocation2 + $0x70] sm:$0xff] %vm1233_vm11, %v1214_v41  ;;  %v1216_v33 = vpop.permute.xlu1 %1215 }
 0x17c   : > { %1249 = vst.msk [vmem:[#allocation2 + $0x78] sm:$0xff] %vm1233_vm11, %v1216_v33 }
 0x17e   : > { %v1290_v29 = vpop.permute.xlu0 %1289 }
 0x17f   : > { %1324 = vst.msk [vmem:[#allocation2 + $0x70] sm:$0xff] %vm1309_vm12, %v1290_v29  ;;  %v1292_v52 = vpop.permute.xlu1 %1291 }
 0x180   : > { %1325 = vst.msk [vmem:[#allocation2 + $0x78] sm:$0xff] %vm1309_vm12, %v1292_v52 }
 0x182   : > { %v1360_v0 = vpop.permute.xlu0 %1359 }
 0x183   : > { %1394 = vst.msk [vmem:[#allocation2 + $0x70] sm:$0xff] %vm1379_vm13, %v1360_v0  ;;  %v1362_v26 = vpop.permute.xlu1 %1361 }
 0x184   : > { %1395 = vst.msk [vmem:[#allocation2 + $0x78] sm:$0xff] %vm1379_vm13, %v1362_v26 }
 0x186   : > { %v1452_v36 = vpop.permute.xlu0 %1451 }
 0x187   : > { %1486 = vst.msk [vmem:[#allocation2 + $0x70] sm:$0xff] %vm1471_vm14, %v1452_v36  ;;  %v1454_v6 = vpop.permute.xlu1 %1453 }
 0x188   : > { %1487 = vst.msk [vmem:[#allocation2 + $0x78] sm:$0xff] %vm1471_vm14, %v1454_v6 }
 0x18a   : > { %v1528_v22 = vpop.permute.xlu0 %1527  ;;  %v2130_v50 = vpop.f32.mrb[0].mxu0 }
 0x18b   : > { %1562 = vst.msk [vmem:[#allocation2 + $0x70] sm:$0xff] %vm1547_vm15, %v1528_v22  ;;  %v1530_v13 = vpop.permute.xlu1 %1529  ;;  %v1687_v1 = vpop.f32.mrb[1].mxu0  ;;  %v1853_v58 = vmul.f32 %v2130_v50, %v2130_v50 }
 0x18c   : > { %1563 = vst.msk [vmem:[#allocation2 + $0x78] sm:$0xff] %vm1547_vm15, %v1530_v13  ;;  %v2131_v60 = vpop.f32.mrb[2].mxu0  ;;  %v1851_v57 = vmul.f32 %v1687_v1, %v1687_v1 }
 0x18d   : > { %v1690_v39 = vpop.f32.mrb[3].mxu0  ;;  %v1854_v8 = vmul.f32 %v2131_v60, %v2131_v60 }
 0x18e   : > { %v1814_v38 = vadd.f32 %v1690_v39, %v1687_v1  ;;  %v1852_v34 = vmul.f32 %v1690_v39, %v1690_v39 }
 0x190   : > { %v1815_v48 = vadd.f32 %v2130_v50, %v1814_v38  ;;  %v1883_v42 = vadd.f32 %v1852_v34, %v1851_v57 }
 0x192   : > { %v1884_v54 = vadd.f32 %v1883_v42, %v1853_v58  ;;  %v1578_v56 = vld [vmem:[#allocation2 + $0x70] sm:$0xff]  ;;  %v1816_v61 = vadd.f32 %v2131_v60, %v1815_v48 }
 0x193   : > { %2156 = vmatprep.mubr.msk.bf16.mxu1 %vm1600_vm0, %v1578_v56  ;;  %v1579_v55 = vld [vmem:[#allocation2 + $0x78] sm:$0xff] }
 0x194   : > { %2157 = vmatmul.mubr.msk.bf16.gmra.mrb[12].mxu1 %vm1600_vm0, %v1579_v55  ;;  %v1885_v3 = vadd.f32 %v1884_v54, %v1854_v8 }
 0x1aa   : > { %v2134_v46 = vpop.f32.mrb[4].mxu0 }
 0x1ab   : > { %v1703_v2 = vpop.f32.mrb[5].mxu0  ;;  %v1857_v20 = vmul.f32 %v2134_v46, %v2134_v46 }
 0x1ac   : > { %v1817_v5 = vadd.f32 %v1816_v61, %v1703_v2  ;;  %v1855_v15 = vmul.f32 %v1703_v2, %v1703_v2  ;;  %v2135_v18 = vpop.f32.mrb[6].mxu0 }
 0x1ad   : > { %v1706_v16 = vpop.f32.mrb[7].mxu0  ;;  %v1858_v11 = vmul.f32 %v2135_v18, %v2135_v18 }
 0x1ae   : > { %v1886_v19 = vadd.f32 %v1885_v3, %v1855_v15  ;;  %v1818_v9 = vadd.f32 %v1817_v5, %v1706_v16  ;;  %v1856_v45 = vmul.f32 %v1706_v16, %v1706_v16 }
 0x1b0   : > { %v1819_v10 = vadd.f32 %v2134_v46, %v1818_v9  ;;  %v1887_v49 = vadd.f32 %v1886_v19, %v1856_v45 }
 0x1b2   : > { %v1888_v4 = vadd.f32 %v1887_v49, %v1857_v20  ;;  %v1820_v32 = vadd.f32 %v2135_v18, %v1819_v10 }
 0x1b4   : > { %v1889_v63 = vadd.f32 %v1888_v4, %v1858_v11 }
 0x1ca   : > { %v2138_v24 = vpop.f32.mrb[8].mxu0 }
 0x1cb   : > { %v1719_v44 = vpop.f32.mrb[9].mxu0  ;;  %v1861_v40 = vmul.f32 %v2138_v24, %v2138_v24 }
 0x1cc   : > { %v1821_v25 = vadd.f32 %v1820_v32, %v1719_v44  ;;  %v1859_v23 = vmul.f32 %v1719_v44, %v1719_v44  ;;  %v2139_v30 = vpop.f32.mrb[10].mxu0 }
 0x1cd   : > { %v1722_v51 = vpop.f32.mrb[11].mxu0  ;;  %v1862_v17 = vmul.f32 %v2139_v30, %v2139_v30 }
 0x1ce   : > { %v1890_v12 = vadd.f32 %v1889_v63, %v1859_v23  ;;  %v1822_v43 = vadd.f32 %v1821_v25, %v1722_v51  ;;  %v1860_v14 = vmul.f32 %v1722_v51, %v1722_v51 }
 0x1d0   : > { %v1823_v27 = vadd.f32 %v2138_v24, %v1822_v43  ;;  %v1891_v35 = vadd.f32 %v1890_v12, %v1860_v14 }
 0x1d2   : > { %v1892_v59 = vadd.f32 %v1891_v35, %v1861_v40  ;;  %v1824_v47 = vadd.f32 %v2139_v30, %v1823_v27 }
 0x1d4   : > { %v1893_v21 = vadd.f32 %v1892_v59, %v1862_v17 }
 0x1ea   : > { %v2142_v53 = vpop.f32.mrb[12].mxu0 }
 0x1eb   : > { %v1735_v62 = vpop.f32.mrb[13].mxu0  ;;  %v1865_v52 = vmul.f32 %v2142_v53, %v2142_v53 }
 0x1ec   : > { %v1825_v28 = vadd.f32 %v1824_v47, %v1735_v62  ;;  %v1863_v7 = vmul.f32 %v1735_v62, %v1735_v62  ;;  %v2143_v31 = vpop.f32.mrb[14].mxu0 }
 0x1ed   : > { %v1738_v37 = vpop.f32.mrb[15].mxu0  ;;  %v1866_v36 = vmul.f32 %v2143_v31, %v2143_v31 }
 0x1ee   : > { %v1894_v41 = vadd.f32 %v1893_v21, %v1863_v7  ;;  %v1826_v33 = vadd.f32 %v1825_v28, %v1738_v37  ;;  %v1864_v29 = vmul.f32 %v1738_v37, %v1738_v37 }
 0x1f0   : > { %v1827_v0 = vadd.f32 %v2142_v53, %v1826_v33  ;;  %v1895_v26 = vadd.f32 %v1894_v41, %v1864_v29 }
 0x1f2   : > { %v1896_v6 = vadd.f32 %v1895_v26, %v1865_v52  ;;  %v1828_v22 = vadd.f32 %v2143_v31, %v1827_v0 }
 0x1f4   : > { %v1897_v50 = vadd.f32 %v1896_v6, %v1866_v36 }
 0x20a   : > { %v2146_v13 = vpop.f32.mrb[0].mxu1 }
 0x20b   : > { %v1751_v1 = vpop.f32.mrb[1].mxu1  ;;  %v1869_v42 = vmul.f32 %v2146_v13, %v2146_v13 }
 0x20c   : > { %v1829_v60 = vadd.f32 %v1828_v22, %v1751_v1  ;;  %v1867_v39 = vmul.f32 %v1751_v1, %v1751_v1  ;;  %v2147_v57 = vpop.f32.mrb[2].mxu1 }
 0x20d   : > { %v1754_v38 = vpop.f32.mrb[3].mxu1  ;;  %v1870_v56 = vmul.f32 %v2147_v57, %v2147_v57 }
 0x20e   : > { %v1898_v34 = vadd.f32 %v1897_v50, %v1867_v39  ;;  %v1830_v58 = vadd.f32 %v1829_v60, %v1754_v38  ;;  %v1868_v48 = vmul.f32 %v1754_v38, %v1754_v38 }
 0x210   : > { %v1831_v8 = vadd.f32 %v2146_v13, %v1830_v58  ;;  %v1899_v54 = vadd.f32 %v1898_v34, %v1868_v48 }
 0x212   : > { %v1900_v61 = vadd.f32 %v1899_v54, %v1869_v42  ;;  %v1832_v55 = vadd.f32 %v2147_v57, %v1831_v8 }
 0x214   : > { %v1901_v3 = vadd.f32 %v1900_v61, %v1870_v56 }
 0x22a   : > { %v2150_v46 = vpop.f32.mrb[4].mxu1 }
 0x22b   : > { %v1767_v2 = vpop.f32.mrb[5].mxu1  ;;  %v1873_v20 = vmul.f32 %v2150_v46, %v2150_v46 }
 0x22c   : > { %v1833_v5 = vadd.f32 %v1832_v55, %v1767_v2  ;;  %v1871_v15 = vmul.f32 %v1767_v2, %v1767_v2  ;;  %v2151_v18 = vpop.f32.mrb[6].mxu1 }
 0x22d   : > { %v1770_v16 = vpop.f32.mrb[7].mxu1  ;;  %v1874_v11 = vmul.f32 %v2151_v18, %v2151_v18 }
 0x22e   : > { %v1902_v19 = vadd.f32 %v1901_v3, %v1871_v15  ;;  %v1834_v9 = vadd.f32 %v1833_v5, %v1770_v16  ;;  %v1872_v45 = vmul.f32 %v1770_v16, %v1770_v16 }
 0x230   : > { %v1835_v10 = vadd.f32 %v2150_v46, %v1834_v9  ;;  %v1903_v49 = vadd.f32 %v1902_v19, %v1872_v45 }
 0x232   : > { %v1904_v4 = vadd.f32 %v1903_v49, %v1873_v20  ;;  %v1836_v32 = vadd.f32 %v2151_v18, %v1835_v10 }
 0x234   : > { %v1905_v63 = vadd.f32 %v1904_v4, %v1874_v11 }
 0x24a   : > { %v2154_v24 = vpop.f32.mrb[8].mxu1 }
 0x24b   : > { %v1783_v44 = vpop.f32.mrb[9].mxu1  ;;  %v1877_v40 = vmul.f32 %v2154_v24, %v2154_v24 }
 0x24c   : > { %v1837_v25 = vadd.f32 %v1836_v32, %v1783_v44  ;;  %v1875_v23 = vmul.f32 %v1783_v44, %v1783_v44  ;;  %v2155_v30 = vpop.f32.mrb[10].mxu1 }
 0x24d   : > { %v1786_v51 = vpop.f32.mrb[11].mxu1  ;;  %v1878_v17 = vmul.f32 %v2155_v30, %v2155_v30 }
 0x24e   : > { %v1906_v12 = vadd.f32 %v1905_v63, %v1875_v23  ;;  %v1838_v43 = vadd.f32 %v1837_v25, %v1786_v51  ;;  %v1876_v14 = vmul.f32 %v1786_v51, %v1786_v51 }
 0x250   : > { %v1839_v27 = vadd.f32 %v2154_v24, %v1838_v43  ;;  %v1907_v35 = vadd.f32 %v1906_v12, %v1876_v14 }
 0x252   : > { %v1908_v59 = vadd.f32 %v1907_v35, %v1877_v40  ;;  %v1840_v47 = vadd.f32 %v2155_v30, %v1839_v27 }
 0x254   : > { %v1909_v21 = vadd.f32 %v1908_v59, %v1878_v17 }
 0x267   : > { %v2158_v53 = vpop.f32.mrb[12].mxu1 }
 0x268   : > { %v1799_v62 = vpop.f32.mrb[13].mxu1  ;;  %v1881_v52 = vmul.f32 %v2158_v53, %v2158_v53 }
 0x269   : > { %v1841_v28 = vadd.f32 %v1840_v47, %v1799_v62  ;;  %v1879_v7 = vmul.f32 %v1799_v62, %v1799_v62  ;;  %v2159_v31 = vpop.f32.mrb[14].mxu1 }
 0x26a   : > { %v1802_v37 = vpop.f32.mrb[15].mxu1  ;;  %v1882_v36 = vmul.f32 %v2159_v31, %v2159_v31 }
 0x26b   : > { %v1910_v41 = vadd.f32 %v1909_v21, %v1879_v7  ;;  %v1842_v33 = vadd.f32 %v1841_v28, %v1802_v37  ;;  %v1880_v29 = vmul.f32 %v1802_v37, %v1802_v37 }
 0x26d   : > { %v1843_v0 = vadd.f32 %v2158_v53, %v1842_v33  ;;  %v1911_v26 = vadd.f32 %v1910_v41, %v1880_v29 }
 0x26f   : > { %v1844_v6 = vadd.f32 %v2159_v31, %v1843_v0  ;;  %v1912_v22 = vadd.f32 %v1911_v26, %v1881_v52 }
 0x271   : > { %v1845_v50 = vrot.slane %v1844_v6, 4  ;;  %v1913_v13 = vadd.f32 %v1912_v22, %v1882_v36 }
 0x273   : > { %v1846_v1 = vadd.f32 %v1845_v50, %v1844_v6  ;;  %v1914_v60 = vrot.slane %v1913_v13, 4 }
 0x275   : > { %v1847_v39 = vrot.slane %v1846_v1, 2  ;;  %v1915_v57 = vadd.f32 %v1914_v60, %v1913_v13 }
 0x277   : > { %v1848_v38 = vadd.f32 %v1847_v39, %v1846_v1  ;;  %v1916_v34 = vrot.slane %v1915_v57, 2 }
 0x279   : > { %v1849_v58 = vrot.slane %v1848_v38, 1  ;;  %v1917_v48 = vadd.f32 %v1916_v34, %v1915_v57 }
 0x27b   : > { %v1918_v42 = vrot.slane %v1917_v48, 1  ;;  %v1850_v8 = vadd.f32 %v1849_v58, %v1848_v38 }
 0x27d   : > { %v1919_v54 = vadd.f32 %v1918_v42, %v1917_v48 }
 0x27f   : > { %v1921_v56 = vsel %vm1920_vm1, %v1850_v8, %v1919_v54 }
 0x280   : > { %1922 = vst [vmem:[%s175_s6] sm:$0x3] %v1921_v56 }
 0x281 PF: > { %s12_s11 = sadd.s32 1, %s2243_s11   ;;  %s3204_s9 = smov %s2239_s10 }
 0x282   : > { %p9_p5 = scmp.ge.s32.totalorder %s12_s11, 4   ;;  %s3205_s10 = smov %s3207_s12 }
 0x284   :  { %11 = sbr.rel (!%p9_p5) target bundleno = 2 (0x2), region = 58 }

</bundles_post_ra>
